<compile_context>
chip_gen: v5e
topology: v5e:2x2
jax: 0.10.0
libtpu: 0.0.40
codegen_flags: <defaults>
</compile_context>

<pallas_src>
import jax
import jax.numpy as jnp
from jax.experimental import pallas as pl
from jax.experimental.pallas import tpu as pltpu

EPS = 1e-5  # nn.LayerNorm default eps used by FP32LayerNorm


def _round_up(n, m):
    return ((n + m - 1) // m) * m


def _layer_norm_f32(x32, gamma, beta):
    # fp32 layernorm over the last axis (biased variance, like F.layer_norm)
    mean = jnp.mean(x32, axis=-1, keepdims=True)
    c = x32 - mean
    var = jnp.mean(c * c, axis=-1, keepdims=True)
    inv = jax.lax.rsqrt(var + EPS)
    return c * inv * gamma + beta


def _gelu_exact(x):
    # PyTorch F.gelu(approximate="none") == 0.5*x*(1+erf(x/sqrt(2)))
    # (tanh-approx GELU would move the transcendental to the EUP slot; keep
    #  erf for exact parity with torch unless profiling shows VALU-bound.)
    return 0.5 * x * (1.0 + jax.lax.erf(x * 0.7071067811865476))


def image_embed_kernel(x_ref, g1_ref, b1_ref, w1_ref, bw1_ref,
                       w2_ref, bw2_ref, g2_ref, b2_ref, o_ref):
    # norm1 (FP32LayerNorm): compute in fp32
    h = _layer_norm_f32(x_ref[...].astype(jnp.float32), g1_ref[...], b1_ref[...])

    # FeedForward(mult=1, activation_fn='gelu'): Linear -> GELU -> Linear.
    # bf16 operands on the MXU, fp32 accumulation; single cast into MXU dtype.
    h = jnp.dot(h.astype(w1_ref.dtype), w1_ref[...],
                preferred_element_type=jnp.float32) + bw1_ref[...]
    h = _gelu_exact(h)
    h = jnp.dot(h.astype(w2_ref.dtype), w2_ref[...],
                preferred_element_type=jnp.float32) + bw2_ref[...]

    # norm2 (FP32LayerNorm)
    h = _layer_norm_f32(h, g2_ref[...], b2_ref[...])
    o_ref[...] = h.astype(o_ref.dtype)


def skyreels_v2_image_embedding(x, params, pos_embed=None, tile_m=256):
    """x: (B, S, C_in).  Returns the module output, matching the torch forward."""
    B, S, C_in = x.shape
    C_out = params["w2"].shape[1]

    # pos-embed add as a plain (fused, mem-bound) XLA op in the wrapper; keeps
    # the kernel free of a pos stream and removes the tile_m <= pos_len cap.
    if pos_embed is not None:
        L = pos_embed.shape[1]
        assert (B * S) % L == 0, "B*S must reshape into (-1, pos_embed_seq_len, C)"
        x3d = x.reshape(-1, L, C_in) + pos_embed.astype(x.dtype)
    else:
        x3d = x

    Bp, Sp = x3d.shape[0], x3d.shape[1]
    xf = x3d.reshape(-1, C_in)
    N = xf.shape[0]

    # Big token tiles (default 256 rows) to feed the 128/256-row MXU and
    # amortize per-grid-step overhead; clamp down for tiny inputs.
    tile_m_eff = max(8, min(tile_m, _round_up(N, 8)))
    tile_m_eff = (tile_m_eff // 8) * 8

    n_pad = pl.cdiv(N, tile_m_eff) * tile_m_eff
    if n_pad != N:
        xf = jnp.pad(xf, ((0, n_pad - N), (0, 0)))

    grid = (n_pad // tile_m_eff,)
    full = lambda i: (0, 0)  # noqa: E731  (resident parameter blocks)

    # Explicit scoped-VMEM budget: weights (x2 buffers) + double-buffered
    # x/out tiles + headroom, capped at v7x's 64 MiB physical VMEM.
    w_bytes = (params["w1"].size * params["w1"].dtype.itemsize
               + params["w2"].size * params["w2"].dtype.itemsize)
    io_bytes = 2 * tile_m_eff * (C_in + C_out) * x.dtype.itemsize
    vmem_limit = int(min(64 * 1024 * 1024,
                         2 * w_bytes + io_bytes + 32 * 1024 * 1024))

    out = pl.pallas_call(
        image_embed_kernel,
        out_shape=jax.ShapeDtypeStruct((n_pad, C_out), x.dtype),
        grid_spec=pltpu.PrefetchScalarGridSpec(
            num_scalar_prefetch=0,
            grid=grid,
            in_specs=[
                pl.BlockSpec((tile_m_eff, C_in), lambda i: (i, 0)),   # x tile
                pl.BlockSpec((1, C_in), full),                        # norm1 gamma
                pl.BlockSpec((1, C_in), full),                        # norm1 beta
                pl.BlockSpec((C_in, C_in), full),                     # ff W1 (bf16)
                pl.BlockSpec((1, C_in), full),                        # ff b1 (f32)
                pl.BlockSpec((C_in, C_out), full),                    # ff W2 (bf16)
                pl.BlockSpec((1, C_out), full),                       # ff b2 (f32)
                pl.BlockSpec((1, C_out), full),                       # norm2 gamma
                pl.BlockSpec((1, C_out), full),                       # norm2 beta
            ],
            out_specs=pl.BlockSpec((tile_m_eff, C_out), lambda i: (i, 0)),
        ),
        compiler_params=pltpu.CompilerParams(
            dimension_semantics=("parallel",),
            vmem_limit_bytes=vmem_limit,
        ),
    )(
        xf,
        params["g1"], params["b1"],
        params["w1"], params["bw1"],
        params["w2"], params["bw2"],
        params["g2"], params["b2"],
    )

    return out[:N].reshape(Bp, Sp, C_out)


def reference_forward(x, params, pos_embed=None):
    # Pure-JAX reference with the same numerics as the kernel (fp32 layernorms,
    # bf16 matmul operands with fp32 accumulation, exact-erf GELU).
    if pos_embed is not None:
        B, S, C = x.shape
        x = x.reshape(-1, pos_embed.shape[1], C) + pos_embed.astype(x.dtype)

    def ln(h, g, b):
        m = jnp.mean(h, axis=-1, keepdims=True)
        v = jnp.mean((h - m) ** 2, axis=-1, keepdims=True)
        return (h - m) * jax.lax.rsqrt(v + EPS) * g + b

    h = ln(x.astype(jnp.float32), params["g1"], params["b1"])
    h = jnp.dot(h.astype(params["w1"].dtype), params["w1"],
                preferred_element_type=jnp.float32) + params["bw1"]
    h = 0.5 * h * (1.0 + jax.lax.erf(h * 0.7071067811865476))
    h = jnp.dot(h.astype(params["w2"].dtype), params["w2"],
                preferred_element_type=jnp.float32) + params["bw2"]
    h = ln(h, params["g2"], params["b2"])
    return h.astype(x.dtype)


def make_params(key, in_features, out_features):
    ks = jax.random.split(key, 8)
    inner = in_features  # FeedForward(mult=1)
    f32, bf16 = jnp.float32, jnp.bfloat16
    return {
        # FP32LayerNorm(in_features): weight/bias (fp32)
        "g1": 1.0 + 0.1 * jax.random.normal(ks[0], (1, in_features), f32),
        "b1": 0.1 * jax.random.normal(ks[1], (1, in_features), f32),
        # FeedForward: Linear(in, inner) -> GELU -> Linear(inner, out)
        # stored pre-transposed (in, out) so the kernel does x @ W; bf16 for the MXU
        "w1": (0.05 * jax.random.normal(ks[2], (in_features, inner), f32)).astype(bf16),
        "bw1": 0.05 * jax.random.normal(ks[3], (1, inner), f32),
        "w2": (0.05 * jax.random.normal(ks[4], (inner, out_features), f32)).astype(bf16),
        "bw2": 0.05 * jax.random.normal(ks[5], (1, out_features), f32),
        # FP32LayerNorm(out_features)
        "g2": 1.0 + 0.1 * jax.random.normal(ks[6], (1, out_features), f32),
        "b2": 0.1 * jax.random.normal(ks[7], (1, out_features), f32),
    }


if __name__ == "__main__":
    key = jax.random.PRNGKey(0)
    k_x, k_p, k_pos, k_x2 = jax.random.split(key, 4)

    # lane-dense demo dims (multiples of 128), large enough for grid >= 2
    batch, seq, in_features, out_features = 2, 256, 128, 256
    pos_embed_seq_len = 2 * seq  # forward's view(-1, 2*seq_len, C)

    params = make_params(k_p, in_features, out_features)
    # module __init__ uses zeros; small random values exercise the add path
    pos_embed = 0.02 * jax.random.normal(k_pos, (1, pos_embed_seq_len, in_features),
                                         jnp.float32)
    x = jax.random.normal(k_x, (batch, seq, in_features), jnp.float32)

    # path 1: with pos_embed (view(-1, 2*seq, C) + pos)
    out = skyreels_v2_image_embedding(x, params, pos_embed=pos_embed, tile_m=256)
    out = jax.block_until_ready(out)
    ref = reference_forward(x, params, pos_embed=pos_embed)
    assert out.shape == ref.shape, (out.shape, ref.shape)
    assert jnp.allclose(out, ref, atol=5e-3, rtol=5e-3), \
        float(jnp.max(jnp.abs(out - ref)))

    # path 2: pos_embed=None (small, odd token count -> exercises clamp/pad)
    x2 = jax.random.normal(k_x2, (2, 8, in_features), jnp.float32)
    out2 = jax.block_until_ready(
        skyreels_v2_image_embedding(x2, params, pos_embed=None, tile_m=256))
    ref2 = reference_forward(x2, params, pos_embed=None)
    assert out2.shape == ref2.shape, (out2.shape, ref2.shape)
    assert jnp.allclose(out2, ref2, atol=5e-3, rtol=5e-3), \
        float(jnp.max(jnp.abs(out2 - ref2)))

    print("KERNEL_OK")
</pallas_src>

<mosaic_0001>
module attributes {stable_mosaic.version = 11 : i64} {
  func.func @image_embed_kernel(%arg0: i32, %arg1: memref<256x128xf32, #tpu.memory_space<vmem>>, %arg2: memref<1x128xf32, #tpu.memory_space<vmem>>, %arg3: memref<1x128xf32, #tpu.memory_space<vmem>>, %arg4: memref<128x128xbf16, #tpu.memory_space<vmem>>, %arg5: memref<1x128xf32, #tpu.memory_space<vmem>>, %arg6: memref<128x256xbf16, #tpu.memory_space<vmem>>, %arg7: memref<1x256xf32, #tpu.memory_space<vmem>>, %arg8: memref<1x256xf32, #tpu.memory_space<vmem>>, %arg9: memref<1x256xf32, #tpu.memory_space<vmem>>, %arg10: memref<256x256xf32, #tpu.memory_space<vmem>>) attributes {dimension_semantics = [#tpu.dimension_semantics<parallel>], iteration_bounds = array<i64: 2>, scalar_prefetch = 0 : i64, scratch_operands = 0 : i64, tpu.core_type = #tpu.core_type<tc>, window_params = [{transform_indices = @transform_0, window_bounds = array<i64: 256, 128>}, {pipeline_mode = #tpu.pipeline_mode<synchronous>, transform_indices = @transform_1, window_bounds = array<i64: 1, 128>}, {pipeline_mode = #tpu.pipeline_mode<synchronous>, transform_indices = @transform_2, window_bounds = array<i64: 1, 128>}, {pipeline_mode = #tpu.pipeline_mode<synchronous>, transform_indices = @transform_3, window_bounds = array<i64: 128, 128>}, {pipeline_mode = #tpu.pipeline_mode<synchronous>, transform_indices = @transform_4, window_bounds = array<i64: 1, 128>}, {pipeline_mode = #tpu.pipeline_mode<synchronous>, transform_indices = @transform_5, window_bounds = array<i64: 128, 256>}, {pipeline_mode = #tpu.pipeline_mode<synchronous>, transform_indices = @transform_6, window_bounds = array<i64: 1, 256>}, {pipeline_mode = #tpu.pipeline_mode<synchronous>, transform_indices = @transform_7, window_bounds = array<i64: 1, 256>}, {pipeline_mode = #tpu.pipeline_mode<synchronous>, transform_indices = @transform_8, window_bounds = array<i64: 1, 256>}, {transform_indices = @transform_9, window_bounds = array<i64: 256, 256>}]} {
    %c0 = arith.constant 0 : index
    %c0_0 = arith.constant 0 : index
    %0 = vector.load %arg1[%c0, %c0_0] : memref<256x128xf32, #tpu.memory_space<vmem>>, vector<256x128xf32>
    %c0_1 = arith.constant 0 : index
    %c0_2 = arith.constant 0 : index
    %1 = vector.load %arg2[%c0_1, %c0_2] : memref<1x128xf32, #tpu.memory_space<vmem>>, vector<1x128xf32>
    %c0_3 = arith.constant 0 : index
    %c0_4 = arith.constant 0 : index
    %2 = vector.load %arg3[%c0_3, %c0_4] : memref<1x128xf32, #tpu.memory_space<vmem>>, vector<1x128xf32>
    %cst = arith.constant dense<0.000000e+00> : vector<256xf32>
    %3 = vector.multi_reduction <add>, %0, %cst [1] : vector<256x128xf32> to vector<256xf32>
    %4 = vector.shape_cast %3 : vector<256xf32> to vector<256x1xf32>
    %cst_5 = arith.constant 1.280000e+02 : f32
    %5 = vector.broadcast %cst_5 : f32 to vector<256x1xf32>
    %6 = arith.divf %4, %5 : vector<256x1xf32>
    %7 = vector.broadcast %6 : vector<256x1xf32> to vector<256x128xf32>
    %8 = arith.subf %0, %7 : vector<256x128xf32>
    %9 = arith.mulf %8, %8 : vector<256x128xf32>
    %cst_6 = arith.constant dense<0.000000e+00> : vector<256xf32>
    %10 = vector.multi_reduction <add>, %9, %cst_6 [1] : vector<256x128xf32> to vector<256xf32>
    %11 = vector.shape_cast %10 : vector<256xf32> to vector<256x1xf32>
    %cst_7 = arith.constant 1.280000e+02 : f32
    %12 = vector.broadcast %cst_7 : f32 to vector<256x1xf32>
    %13 = arith.divf %11, %12 : vector<256x1xf32>
    %cst_8 = arith.constant 9.99999974E-6 : f32
    %14 = vector.broadcast %cst_8 : f32 to vector<256x1xf32>
    %15 = arith.addf %13, %14 : vector<256x1xf32>
    %16 = math.rsqrt %15 : vector<256x1xf32>
    %17 = vector.broadcast %16 : vector<256x1xf32> to vector<256x128xf32>
    %18 = arith.mulf %8, %17 : vector<256x128xf32>
    %19 = vector.broadcast %1 : vector<1x128xf32> to vector<256x128xf32>
    %20 = arith.mulf %18, %19 : vector<256x128xf32>
    %21 = vector.broadcast %2 : vector<1x128xf32> to vector<256x128xf32>
    %22 = arith.addf %20, %21 : vector<256x128xf32>
    %23 = arith.truncf %22 : vector<256x128xf32> to vector<256x128xbf16>
    %c0_9 = arith.constant 0 : index
    %c0_10 = arith.constant 0 : index
    %24 = vector.load %arg4[%c0_9, %c0_10] : memref<128x128xbf16, #tpu.memory_space<vmem>>, vector<128x128xbf16>
    %cst_11 = arith.constant dense<0.000000e+00> : vector<256x128xf32>
    %25 = tpu.matmul %23, %24, %cst_11 {dimension_numbers = #tpu.dot_dimension_numbers<[1], [0], [0], [1], [0, 0, 1, 1], [], []>} : vector<256x128xbf16>, vector<128x128xbf16>, vector<256x128xf32> -> vector<256x128xf32>
    %c0_12 = arith.constant 0 : index
    %c0_13 = arith.constant 0 : index
    %26 = vector.load %arg5[%c0_12, %c0_13] : memref<1x128xf32, #tpu.memory_space<vmem>>, vector<1x128xf32>
    %27 = vector.broadcast %26 : vector<1x128xf32> to vector<256x128xf32>
    %28 = arith.addf %25, %27 : vector<256x128xf32>
    %cst_14 = arith.constant 5.000000e-01 : f32
    %29 = vector.broadcast %cst_14 : f32 to vector<256x128xf32>
    %30 = arith.mulf %29, %28 : vector<256x128xf32>
    %cst_15 = arith.constant 0.707106769 : f32
    %31 = vector.broadcast %cst_15 : f32 to vector<256x128xf32>
    %32 = arith.mulf %28, %31 : vector<256x128xf32>
    %33 = math.erf %32 : vector<256x128xf32>
    %cst_16 = arith.constant 1.000000e+00 : f32
    %34 = vector.broadcast %cst_16 : f32 to vector<256x128xf32>
    %35 = arith.addf %34, %33 : vector<256x128xf32>
    %36 = arith.mulf %30, %35 : vector<256x128xf32>
    %37 = arith.truncf %36 : vector<256x128xf32> to vector<256x128xbf16>
    %c0_17 = arith.constant 0 : index
    %c0_18 = arith.constant 0 : index
    %38 = vector.load %arg6[%c0_17, %c0_18] : memref<128x256xbf16, #tpu.memory_space<vmem>>, vector<128x256xbf16>
    %cst_19 = arith.constant dense<0.000000e+00> : vector<256x256xf32>
    %39 = tpu.matmul %37, %38, %cst_19 {dimension_numbers = #tpu.dot_dimension_numbers<[1], [0], [0], [1], [0, 0, 1, 1], [], []>} : vector<256x128xbf16>, vector<128x256xbf16>, vector<256x256xf32> -> vector<256x256xf32>
    %c0_20 = arith.constant 0 : index
    %c0_21 = arith.constant 0 : index
    %40 = vector.load %arg7[%c0_20, %c0_21] : memref<1x256xf32, #tpu.memory_space<vmem>>, vector<1x256xf32>
    %41 = vector.broadcast %40 : vector<1x256xf32> to vector<256x256xf32>
    %42 = arith.addf %39, %41 : vector<256x256xf32>
    %c0_22 = arith.constant 0 : index
    %c0_23 = arith.constant 0 : index
    %43 = vector.load %arg8[%c0_22, %c0_23] : memref<1x256xf32, #tpu.memory_space<vmem>>, vector<1x256xf32>
    %c0_24 = arith.constant 0 : index
    %c0_25 = arith.constant 0 : index
    %44 = vector.load %arg9[%c0_24, %c0_25] : memref<1x256xf32, #tpu.memory_space<vmem>>, vector<1x256xf32>
    %cst_26 = arith.constant dense<0.000000e+00> : vector<256xf32>
    %45 = vector.multi_reduction <add>, %42, %cst_26 [1] : vector<256x256xf32> to vector<256xf32>
    %46 = vector.shape_cast %45 : vector<256xf32> to vector<256x1xf32>
    %cst_27 = arith.constant 2.560000e+02 : f32
    %47 = vector.broadcast %cst_27 : f32 to vector<256x1xf32>
    %48 = arith.divf %46, %47 : vector<256x1xf32>
    %49 = vector.broadcast %48 : vector<256x1xf32> to vector<256x256xf32>
    %50 = arith.subf %42, %49 : vector<256x256xf32>
    %51 = arith.mulf %50, %50 : vector<256x256xf32>
    %cst_28 = arith.constant dense<0.000000e+00> : vector<256xf32>
    %52 = vector.multi_reduction <add>, %51, %cst_28 [1] : vector<256x256xf32> to vector<256xf32>
    %53 = vector.shape_cast %52 : vector<256xf32> to vector<256x1xf32>
    %cst_29 = arith.constant 2.560000e+02 : f32
    %54 = vector.broadcast %cst_29 : f32 to vector<256x1xf32>
    %55 = arith.divf %53, %54 : vector<256x1xf32>
    %cst_30 = arith.constant 9.99999974E-6 : f32
    %56 = vector.broadcast %cst_30 : f32 to vector<256x1xf32>
    %57 = arith.addf %55, %56 : vector<256x1xf32>
    %58 = math.rsqrt %57 : vector<256x1xf32>
    %59 = vector.broadcast %58 : vector<256x1xf32> to vector<256x256xf32>
    %60 = arith.mulf %50, %59 : vector<256x256xf32>
    %61 = vector.broadcast %43 : vector<1x256xf32> to vector<256x256xf32>
    %62 = arith.mulf %60, %61 : vector<256x256xf32>
    %63 = vector.broadcast %44 : vector<1x256xf32> to vector<256x256xf32>
    %64 = arith.addf %62, %63 : vector<256x256xf32>
    %c0_31 = arith.constant 0 : index
    %c0_32 = arith.constant 0 : index
    %65 = vector.load %arg10[%c0_31, %c0_32] : memref<256x256xf32, #tpu.memory_space<vmem>>, vector<256x256xf32>
    tpu.vector_store %arg10[%c0_31, %c0_32], %64 {strides = array<i32>} : memref<256x256xf32, #tpu.memory_space<vmem>>, vector<256x256xf32>,
    return
  }
  func.func @transform_0(%arg0: i32) -> (i32, i32) {
    %c0_i32 = arith.constant 0 : i32
    %c0_i32_0 = arith.constant 0 : i32
    return %arg0, %c0_i32 : i32, i32
  }
  func.func @transform_1(%arg0: i32) -> (i32, i32) {
    %c0_i32 = arith.constant 0 : i32
    %c0_i32_0 = arith.constant 0 : i32
    %c0_i32_1 = arith.constant 0 : i32
    return %c0_i32, %c0_i32_0 : i32, i32
  }
  func.func @transform_2(%arg0: i32) -> (i32, i32) {
    %c0_i32 = arith.constant 0 : i32
    %c0_i32_0 = arith.constant 0 : i32
    %c0_i32_1 = arith.constant 0 : i32
    return %c0_i32, %c0_i32_0 : i32, i32
  }
  func.func @transform_3(%arg0: i32) -> (i32, i32) {
    %c0_i32 = arith.constant 0 : i32
    %c0_i32_0 = arith.constant 0 : i32
    %c0_i32_1 = arith.constant 0 : i32
    return %c0_i32, %c0_i32_0 : i32, i32
  }
  func.func @transform_4(%arg0: i32) -> (i32, i32) {
    %c0_i32 = arith.constant 0 : i32
    %c0_i32_0 = arith.constant 0 : i32
    %c0_i32_1 = arith.constant 0 : i32
    return %c0_i32, %c0_i32_0 : i32, i32
  }
  func.func @transform_5(%arg0: i32) -> (i32, i32) {
    %c0_i32 = arith.constant 0 : i32
    %c0_i32_0 = arith.constant 0 : i32
    %c0_i32_1 = arith.constant 0 : i32
    return %c0_i32, %c0_i32_0 : i32, i32
  }
  func.func @transform_6(%arg0: i32) -> (i32, i32) {
    %c0_i32 = arith.constant 0 : i32
    %c0_i32_0 = arith.constant 0 : i32
    %c0_i32_1 = arith.constant 0 : i32
    return %c0_i32, %c0_i32_0 : i32, i32
  }
  func.func @transform_7(%arg0: i32) -> (i32, i32) {
    %c0_i32 = arith.constant 0 : i32
    %c0_i32_0 = arith.constant 0 : i32
    %c0_i32_1 = arith.constant 0 : i32
    return %c0_i32, %c0_i32_0 : i32, i32
  }
  func.func @transform_8(%arg0: i32) -> (i32, i32) {
    %c0_i32 = arith.constant 0 : i32
    %c0_i32_0 = arith.constant 0 : i32
    %c0_i32_1 = arith.constant 0 : i32
    return %c0_i32, %c0_i32_0 : i32, i32
  }
  func.func @transform_9(%arg0: i32) -> (i32, i32) {
    %c0_i32 = arith.constant 0 : i32
    %c0_i32_0 = arith.constant 0 : i32
    return %arg0, %c0_i32 : i32, i32
  }
}

</mosaic_0001>

<bundles_post_ra>
// kernel: tpu_custom_call.1
= control target key start
LH: loop header
LB: loop body
LE: loop exit
PB: predicated region body
PF: predicated region fallthrough
CT: control target
= control target key end

     0   :  { %s8564_s0 = inlined_call_operand.hbm [shape: f32[512,128], index: 0, kind: input, shape index: {}]   ;;  %s8565_s1 = inlined_call_operand.hbm [shape: f32[1,128], index: 1, kind: input, shape index: {}]   ;;  %s8566_s2 = inlined_call_operand.hbm [shape: f32[1,128], index: 2, kind: input, shape index: {}]   ;;  %s8567_s3 = inlined_call_operand.hbm [shape: bf16[128,128], index: 3, kind: input, shape index: {}]   ;;  %s8568_s4 = inlined_call_operand.hbm [shape: f32[1,128], index: 4, kind: input, shape index: {}]   ;;  %s8569_s5 = inlined_call_operand.hbm [shape: bf16[128,256], index: 5, kind: input, shape index: {}]   ;;  %s8570_s6 = inlined_call_operand.vmem [shape: f32[1,256], index: 6, kind: input, shape index: {}]   ;;  %s8571_s7 = inlined_call_operand.vmem [shape: f32[1,256], index: 7, kind: input, shape index: {}]   ;;  %s8572_s8 = inlined_call_operand.vmem [shape: f32[1,256], index: 8, kind: input, shape index: {}]   ;;  %s8573_s9 = inlined_call_operand.hbm [shape: f32[512,256], index: 9, kind: output, shape index: {}]  }
   0x1   :  { %8640 = sst [smem:[#allocation61_spill]] %s8565_s1 }
   0x2   :  { %8641 = sst [smem:[#allocation62_spill]] %s8566_s2 }
   0x3   :  { %8642 = sst [smem:[#allocation63_spill]] %s8567_s3 }
   0x4   :  { %14 = vsyncpa [#allocation3], 0 }
   0x5   :  { %16 = vsyncpa [#allocation3 + $0x1], 0 }
   0x6   :  { %17 = vsyncpa [#allocation6], 0 }
   0x7   :  { %18 = vsyncpa [#allocation9], 0 }
   0x8   :  { %19 = vsyncpa [#allocation12], 0 }
   0x9   :  { %20 = vsyncpa [#allocation4], 0 }
   0xa   :  { %22 = vsyncpa [#allocation4 + $0x1], 0  ;;  %s5051_s30 = smov 0   ;;  %s5053_s10 = smov 0  }
   0xb   :  { %s5055_s11 = smov 0   ;;  %s5057_s12 = smov 0  }
   0xc LB: > { %s8643_s1 = sld [smem:[#allocation61_spill]]  ;;  %s5075_s16 = sadd.s32 4294967295, %s4986_s12   ;;  %s4986_s12 = sphi %s5057_s12, %s8862_s12   ;;  %s4982_s11 = sphi %s5055_s11, %s8861_s11   ;;  %s4978_s10 = sphi %s5053_s10, %s8860_s10   ;;  %s4974_s30 = sphi %s5051_s30, %s8859_s30  }
   0xd   : > { %p4210_p0 = scmp.ge.s32.totalorder %s4986_s12, 1  ;;  %p49_p1 = scmp.eq.s32.totalorder %s5075_s16, 0 }
   0xe   : > { %p253_p2 = scmp.lt.s32.totalorder %s4986_s12, 3  ;;  %s4988_s18 = smov [#allocation5]  }
   0xf   : > { %s267_s19 = sshll.u32 %s4988_s18, 4  ;;  %s8645_s3 = sld [smem:[#allocation63_spill]]  ;;  %s268_s19 = int_to_ptr.vmem [resolvable:$true] %s267_s19 }
  0x10   : > { %p5080_p3 = pnand %p4210_p0, %p253_p2  ;;  %s4989_s24 = smov [#allocation8]  }
  0x11   : > { %s290_s25 = sshll.u32 %s4989_s24, 4  ;;  %s4990_s26 = smov 64   ;;  %s291_s25 = int_to_ptr.vmem [resolvable:$true] %s290_s25 }
  0x12   : > { %s265_s15 = sshll.u32 %s8643_s1, 4  ;;  %p4437_p5 = pneg %p5080_p3  ;;  %s266_s15 = int_to_ptr.hbm [resolvable:$true] %s265_s15 }
  0x13   : > { %s4991_s27 = smov 4   ;;  %s8647_s2 = sld [smem:[#allocation62_spill]] }
  0x14   : > { %p5092_p6 = pnand %p4437_p5, %p49_p1  ;;  %s4992_s14 = smov [#allocation7]  }
  0x15   : > { %s288_s22 = sshll.u32 %s8645_s3, 4  ;;  %s279_s18 = sshll.u32 %s4992_s14, 4  ;;  %s289_s22 = int_to_ptr.hbm [resolvable:$true] %s288_s22  ;;  %s280_s18 = int_to_ptr.vmem [resolvable:$true] %s279_s18 }
  0x16   : > { %4440 = dma.hbm_to_vmem [thread:$0]  (!%p5092_p6), %s266_s15, 16, %s268_s19, [#allocation6]  }
  0x17   : > { %4446 = dma.hbm_to_vmem [thread:$0]  (!%p5092_p6), %s289_s22, 1024, %s291_s25, [#allocation9], %s4990_s26, %s4990_s26, %s4991_s27  }
  0x18   : > { %s303_s24 = sshll.u32 %s8568_s4, 4  ;;  %s4993_s15 = smov [#allocation10]   ;;  %s304_s24 = int_to_ptr.hbm [resolvable:$true] %s303_s24 }
  0x19   : > { %s277_s13 = sshll.u32 %s8647_s2, 4  ;;  %s305_s19 = sshll.u32 %s4993_s15, 4  ;;  %s278_s13 = int_to_ptr.hbm [resolvable:$true] %s277_s13  ;;  %s306_s19 = int_to_ptr.vmem [resolvable:$true] %s305_s19 }
  0x1a   : > { %4443 = dma.hbm_to_vmem [thread:$0]  (!%p5092_p6), %s278_s13, 16, %s280_s18, [#allocation6]  }
  0x1b   : > { %s314_s26 = sshll.u32 %s8569_s5, 4  ;;  %s4994_s27 = smov [#allocation11]   ;;  %s315_s26 = int_to_ptr.hbm [resolvable:$true] %s314_s26 }
  0x1c   : > { %4449 = dma.hbm_to_vmem [thread:$0]  (!%p5092_p6), %s304_s24, 16, %s306_s19, [#allocation9]  }
  0x1d   : > { %s316_s28 = sshll.u32 %s4994_s27, 4  ;;  %s8574_s29 = smov 128   ;;  %s317_s28 = int_to_ptr.vmem [resolvable:$true] %s316_s28 }
  0x1e   : > { %s8575_s13 = smov 8   ;;  %s4209_s14 = sadd.s32 4294967294, %s4986_s12  }
  0x1f   : > { %4452 = dma.hbm_to_vmem [thread:$0]  (!%p5092_p6), %s315_s26, 2048, %s317_s28, [#allocation12], %s8574_s29, %s8574_s29, %s8575_s13  }
  0x20   : > { %s5120_s18 = sadd.s32 1, %s4986_s12   ;;  %s35_s20 = sadd.s32 1, %s4982_s11 }
  0x21   : > { %s32_s21 = ssub.s32 %s4986_s12, %s5120_s18  ;;  %p42_p7 = scmp.ne.s32.totalorder %s4982_s11, %s4978_s10 }
  0x22   : > { %p33_p8 = scmp.eq.s32.totalorder %s32_s21, 0  ;;  %p43_p9 = scmp.eq.s32.totalorder %s4986_s12, 0 }
  0x23   : > { %p48_p10 = scmp.ne.s32.totalorder %s4978_s10, %s4974_s30  ;;  %p240_p11 = scmp.eq.s32.totalorder %s5075_s16, 1 }
  0x24   : > { %s5132_s24 = scalar_select %p33_p8, %s4982_s11, %s35_s20  }
  0x25   : > { %p5136_p12 = por %p49_p1, %p48_p10  ;;  %p5140_p13 = por %p240_p11, %p42_p7 }
  0x26   : > { %p246_p0 = scmp.eq.s32.totalorder %s4209_s14, 1  ;;  %p44_p2 = por %p43_p9, %p42_p7 }
  0x27   : > { %s339_s19 = sand.u32 1, %s4982_s11   ;;  %p4466_p6 = scmp.lt.s32.totalorder %s4986_s12, 2 }
  0x28   : > { %p5145_p5 = por %p246_p0, %p48_p10  ;;  %s4217_s25 = sshll.u32 %s339_s19, 8 }
  0x29   : > { %s4362_s26 = sshll.u32 %s4986_s12, 8  ;;  %s343_s29 = scalar_lea.vmem [#allocation2], %s4217_s25 }
  0x2a   : > { %s348_s20 = scalar_lea.hbm %s8564_s0, %s4362_s26  ;;  %s351_s13 = sshll.u32 %s343_s29, 4  ;;  %s352_s13 = int_to_ptr.vmem [resolvable:$true] %s351_s13 }
  0x2b   : > { %s349_s21 = sshll.u32 %s348_s20, 4  ;;  %p5154_p8 = pnand %p4466_p6, %p44_p2  ;;  %s350_s21 = int_to_ptr.hbm [resolvable:$true] %s349_s21 }
  0x2c   : > { %s340_s1 = scalar_lea.sflag [#allocation3], %s339_s19  ;;  %s4878_s2 = sshra.s32 %s350_s21, 4  ;;  %s4879_s2 = int_to_ptr.hbm [resolvable:$true] %s4878_s2 }
  0x2d   : > { %s4880_s3 = scalar_lea.hbm %s4879_s2, 256  ;;  %p4882_p9 = pneg %p5154_p8 }
  0x2e   : > { %p4881_p7 = scmp.ne.s32.totalorder %s4879_s2, %s4880_s3  ;;  %s4885_s29 = scalar_lea.hbm %s8564_s0, 512 }
  0x2f   : > { %p4886_p0 = scmp.lt.s32.totalorder %s4879_s2, %s8564_s0  ;;  %p4887_p2 = scmp.lt.s32.totalorder %s4885_s29, %s4880_s3 }
  0x30   : > { %p4883_p10 = pnand %p4882_p9, %p4881_p7 }
  0x31   : > { %p4888_p6 = por %p4887_p2, %p4886_p0 }
  0x32   : > { %p4884_p11 = pneg %p4883_p10 }
  0x34   : > { %p4889_p4 = pnand %p4888_p6, %p4884_p11 }
  0x36   : > { %4892 = shalt.err (!%p4889_p4)
}
  0x37   : > { %s8652_s19 = smov 8   ;;  %s8653_s20 = smov 128  }
  0x38   : > { %4456 = dma.hbm_to_vmem [thread:$0]  (!%p5154_p8), %s350_s21, 4096, %s352_s13, %s340_s1, %s8653_s20, %s8653_s20, %s8652_s19  }
  0x39   : > { %363 = sbr.rel (%p5080_p3) target bundleno = 1460 (0x5b4), region = 56 }
  0x3e   : > { %s5174_s26 = sand.u32 1, %s4978_s10  }
  0x3f   : > { %s4221_s2 = sshll.u32 %s5174_s26, 8  ;;  %s366_s3 = scalar_lea.sflag [#allocation3], %s5174_s26 }
  0x40   : > { %s5178_s27 = scalar_lea.vmem [#allocation2], %s4221_s2 }
  0x41   : > { %4953 = dma.done.wait (%p5136_p12), %s366_s3, 4096  }
  0x42   : > { %4955 = vsyncadd (%p5136_p12), %s366_s3, 4294963200 }
  0x43   : > { %4957 = dma.done.wait (%p49_p1), [#allocation6], 32  }
  0x44   : > { %4959 = vsyncadd (%p49_p1), [#allocation6], 4294967264 }
  0x45   : > { %4961 = dma.done.wait (%p49_p1), [#allocation9], 1040  }
  0x46   : > { %4963 = vsyncadd (%p49_p1), [#allocation9], 4294966256 }
  0x47   : > { %4965 = dma.done.wait (%p49_p1), [#allocation12], 2048  }
  0x48   : > { %4967 = vsyncadd (%p49_p1), [#allocation12], 4294965248  ;;  %v5197_v0 = vld [vmem:[%s5178_s27 + $0x20] sm:$0xff]  ;;  %v434_v2 = vld [vmem:[%s5178_s27 + $0x10] sm:$0xff]  ;;  %v4997_v14 = vmov 128.0   ;;  %s4227_s29 = sshll.u32 %s5174_s26, 9 }
  0x49   : > { %v432_v1 = vld [vmem:[%s5178_s27] sm:$0xff]  ;;  %474 = vadd.xlane.f32.xlu2 %v5197_v0  ;;  %470 = vadd.xlane.f32.xlu1 %v434_v2  ;;  %v5203_v3 = vld [vmem:[%s5178_s27 + $0x28] sm:$0xff]  ;;  %v435_v5 = vld [vmem:[%s5178_s27 + $0x18] sm:$0xff]  ;;  %4521 = vrcp.f32 %v4997_v14  ;;  %s7803_s25 = scalar_lea.vmem [#allocation13], %s4227_s29  ;;  %s4388_s28 = sshll.u32 %s5075_s16, 9 }
  0x4a   : > { %466 = vadd.xlane.f32.xlu0 %v432_v1  ;;  %v433_v4 = vld [vmem:[%s5178_s27 + $0x8] sm:$0xff]  ;;  %v5209_v6 = vld [vmem:[%s5178_s27 + $0x30] sm:$0xff]  ;;  %v5212_v7 = vld [vmem:[%s5178_s27 + $0x38] sm:$0xff]  ;;  %s4084_s2 = scalar_lea.hbm %s8573_s9, %s4388_s28  ;;  %s4085_s16 = sshll.u32 %s7803_s25, 4  ;;  %s4086_s16 = int_to_ptr.vmem [resolvable:$true] %s4085_s16 }
  0x4b   : > { %v457_v8 = vld [vmem:[%s5178_s27 + $0xc8] sm:$0xff]  ;;  %v440_v9 = vld [vmem:[%s5178_s27 + $0x40] sm:$0xff]  ;;  %v5219_v10 = vld [vmem:[%s5178_s27 + $0xd8] sm:$0xff]  ;;  %s4087_s3 = sshll.u32 %s4084_s2, 4  ;;  %s4928_s21 = scalar_lea.hbm %s8573_s9, 1024  ;;  %s4088_s3 = int_to_ptr.hbm [resolvable:$true] %s4087_s3 }
  0x4c   : > { %v5223_v11 = vld [vmem:[%s5178_s27 + $0x50] sm:$0xff]  ;;  %v5227_v12 = vld [vmem:[%s5178_s27 + $0xe8] sm:$0xff]  ;;  %v5231_v13 = vld [vmem:[%s5178_s27 + $0x60] sm:$0xff]  ;;  %s4922_s1 = sshra.s32 %s4088_s3, 4  ;;  %s4923_s1 = int_to_ptr.hbm [resolvable:$true] %s4922_s1 }
  0x4d   : > { %v5246_v32 = vld [vmem:[%s5178_s27 + $0x48] sm:$0xff]  ;;  %v5256_v38 = vld [vmem:[%s5178_s27 + $0xc0] sm:$0xff]  ;;  %v5267_v45 = vld [vmem:[%s5178_s27 + $0x58] sm:$0xff]  ;;  %s4924_s17 = scalar_lea.hbm %s4923_s1, 512  ;;  %p4929_p12 = scmp.lt.s32.totalorder %s4923_s1, %s8573_s9 }
  0x4e   : > { %v5286_v55 = vld [vmem:[%s5178_s27 + $0xd0] sm:$0xff]  ;;  %v5296_v59 = vld [vmem:[%s5178_s27 + $0x68] sm:$0xff]  ;;  %v5301_v61 = vld [vmem:[%s5178_s27 + $0x78] sm:$0xff]  ;;  %p4925_p1 = scmp.ne.s32.totalorder %s4923_s1, %s4924_s17  ;;  %p4930_p8 = scmp.lt.s32.totalorder %s4928_s21, %s4924_s17 }
  0x4f   : > { %v4522_v15 = vpop.eup %4521  ;;  %v5329_v14 = vld [vmem:[%s5178_s27 + $0xf0] sm:$0xff] }
  0x50   : > { %v531_v16 = vmul.f32 128.0, %v4522_v15  ;;  %vm535_vm0 = vweird.f32 %v4522_v15  ;;  %p4926_p3 = pnand %p4925_p1, %p5140_p13  ;;  %p4931_p7 = por %p4930_p8, %p4929_p12 }
  0x51   : > { %476 = vadd.xlane.f32.xlu2 %v5203_v3  ;;  %472 = vadd.xlane.f32.xlu1 %v435_v5 }
  0x52   : > { %468 = vadd.xlane.f32.xlu0 %v433_v4  ;;  %v532_v17 = vsub.f32 1.0, %v531_v16  ;;  %p4927_p4 = pneg %p4926_p3 }
  0x54   : > { %v533_v18 = vmul.f32 %v4522_v15, %v532_v17  ;;  %p4932_p9 = pnand %p4931_p7, %p4927_p4 }
  0x56   : > { %v534_v19 = vadd.f32 %v4522_v15, %v533_v18  ;;  %v5341_v18 = vld [vmem:[%s5178_s27 + $0xf8] sm:$0xff] }
  0x58   : > { %v5234_v20 = vsel %vm535_vm0, %v4522_v15, %v534_v19  ;;  %v5332_v15 = vld [vmem:[%s5178_s27 + $0x88] sm:$0xff] }
  0x59   : > { %478 = vadd.xlane.f32.xlu2 %v5209_v6 }
  0x5a   : > { %480 = vadd.xlane.f32.xlu0 %v5212_v7 }
  0x61   : > { %516 = vadd.xlane.f32.xlu2 %v457_v8 }
  0x69   : > { %482 = vadd.xlane.f32.xlu2 %v440_v9 }
  0x71   : > { %520 = vadd.xlane.f32.xlu2 %v5219_v10 }
  0x79   : > { %486 = vadd.xlane.f32.xlu2 %v5223_v11 }
  0x81   : > { %524 = vadd.xlane.f32.xlu2 %v5227_v12 }
  0x89   : > { %490 = vadd.xlane.f32.xlu2 %v5231_v13 }
  0xbc   : > { %v475_v21 = vpop.xlane.xlu2 %474  ;;  %v471_v26 = vpop.xlane.xlu1 %470 }
  0xbd   : > { %v467_v22 = vpop.xlane.xlu0 %466  ;;  %v539_v31 = vmul.f32 %v5234_v20, %v471_v26  ;;  %v541_v43 = vmul.f32 %v5234_v20, %v475_v21  ;;  %v4370_v21 = vld [vmem:[#allocation8 + $0x38] sm:$0xff]  ;;  %v4365_v26 = vld [vmem:[#allocation8 + $0x10] sm:$0xff] }
  0xbe   : > { %v537_v23 = vmul.f32 %v5234_v20, %v467_v22  ;;  %1267 = vmatpush.bf16.msra.mxu0 %v4370_v21  ;;  %4389 = vmatpush.bf16.msra.mxu3 %v4370_v21  ;;  %v4369_v22 = vld [vmem:[#allocation8 + $0x30] sm:$0xff] }
  0xbf   : > { %v5251_v34 = vsub.f32 %v434_v2, %v539_v31  ;;  %v5274_v48 = vsub.f32 %v5197_v0, %v541_v43 }
  0xc0   : > { %v5237_v24 = vsub.f32 %v432_v1, %v537_v23  ;;  %v4368_v23 = vld [vmem:[#allocation8 + $0x28] sm:$0xff] }
  0xc1   : > { %v603_v37 = vmul.f32 %v5251_v34, %v5251_v34  ;;  %v605_v52 = vmul.f32 %v5274_v48, %v5274_v48 }
  0xc2   : > { %v601_v25 = vmul.f32 %v5237_v24, %v5237_v24  ;;  %1268 = vmatpush.bf16.msra.mxu0 %v4369_v22  ;;  %4390 = vmatpush.bf16.msra.mxu3 %v4369_v22 }
  0xc4   : > { %633 = vadd.xlane.f32.xlu0 %v601_v25  ;;  %v477_v27 = vpop.xlane.xlu2 %476  ;;  %v473_v36 = vpop.xlane.xlu1 %472  ;;  %v4367_v25 = vld [vmem:[#allocation8 + $0x20] sm:$0xff] }
  0xc5   : > { %v469_v28 = vpop.xlane.xlu0 %468  ;;  %v540_v39 = vmul.f32 %v5234_v20, %v473_v36  ;;  %v542_v53 = vmul.f32 %v5234_v20, %v477_v27  ;;  %v4364_v27 = vld [vmem:[#allocation8 + $0x8] sm:$0xff] }
  0xc6   : > { %v538_v29 = vmul.f32 %v5234_v20, %v469_v28  ;;  %1269 = vmatpush.bf16.msra.mxu0 %v4368_v23  ;;  %4391 = vmatpush.bf16.msra.mxu3 %v4368_v23 }
  0xc7   : > { %v5260_v41 = vsub.f32 %v435_v5, %v540_v39  ;;  %v5289_v56 = vsub.f32 %v5203_v3, %v542_v53  ;;  %v5316_v5 = vld [vmem:[%s5178_s27 + $0xe0] sm:$0xff] }
  0xc8   : > { %v5242_v30 = vsub.f32 %v433_v4, %v538_v29 }
  0xc9   : > { %v604_v46 = vmul.f32 %v5260_v41, %v5260_v41  ;;  %v606_v60 = vmul.f32 %v5289_v56, %v5289_v56 }
  0xca   : > { %v602_v33 = vmul.f32 %v5242_v30, %v5242_v30  ;;  %1270 = vmatpush.bf16.msra.mxu0 %v4367_v25  ;;  %4392 = vmatpush.bf16.msra.mxu3 %v4367_v25 }
  0xcc   : > { %484 = vadd.xlane.f32.xlu0 %v5246_v32  ;;  %635 = vadd.xlane.f32.xlu1 %v602_v33  ;;  %v479_v35 = vpop.xlane.xlu2 %478  ;;  %v4363_v33 = vld [vmem:[#allocation8] sm:$0xff] }
  0xcd   : > { %v543_v58 = vmul.f32 %v5234_v20, %v479_v35  ;;  %v481_v0 = vpop.xlane.xlu0 %480 }
  0xce   : > { %v544_v4 = vmul.f32 %v5234_v20, %v481_v0 }
  0xcf   : > { %v5304_v62 = vsub.f32 %v5209_v6, %v543_v58 }
  0xd1   : > { %v607_v2 = vmul.f32 %v5304_v62, %v5304_v62 }
  0xd4   : > { %637 = vadd.xlane.f32.xlu0 %v603_v37  ;;  %514 = vadd.xlane.f32.xlu1 %v5256_v38  ;;  %v517_v40 = vpop.xlane.xlu2 %516 }
  0xd5   : > { %v562_v42 = vmul.f32 %v5234_v20, %v517_v40 }
  0xd7   : > { %v5264_v44 = vsub.f32 %v457_v8, %v562_v42  ;;  %v5322_v8 = vsub.f32 %v5212_v7, %v544_v4 }
  0xd9   : > { %v626_v47 = vmul.f32 %v5264_v44, %v5264_v44 }
  0xdb   : > { %683 = vadd.xlane.f32.xlu2 %v626_v47 }
  0xdc   : > { %488 = vadd.xlane.f32.xlu0 %v5267_v45  ;;  %639 = vadd.xlane.f32.xlu1 %v604_v46  ;;  %v483_v49 = vpop.xlane.xlu2 %482 }
  0xdd   : > { %v545_v50 = vmul.f32 %v5234_v20, %v483_v49 }
  0xdf   : > { %v5278_v51 = vsub.f32 %v440_v9, %v545_v50 }
  0xe1   : > { %v609_v54 = vmul.f32 %v5278_v51, %v5278_v51 }
  0xe3   : > { %649 = vadd.xlane.f32.xlu2 %v609_v54 }
  0xe4   : > { %641 = vadd.xlane.f32.xlu0 %v605_v52  ;;  %518 = vadd.xlane.f32.xlu1 %v5286_v55  ;;  %v5292_v57 = vpop.xlane.xlu2 %520 }
  0xe5   : > { %v564_v22 = vmul.f32 %v5234_v20, %v5292_v57 }
  0xeb   : > { %496 = vadd.xlane.f32.xlu2 %v5301_v61 }
  0xec   : > { %492 = vadd.xlane.f32.xlu0 %v5296_v59  ;;  %643 = vadd.xlane.f32.xlu1 %v606_v60  ;;  %v487_v63 = vpop.xlane.xlu2 %486 }
  0xed   : > { %v547_v1 = vmul.f32 %v5234_v20, %v487_v63 }
  0xef   : > { %v5312_v3 = vsub.f32 %v5223_v11, %v547_v1  ;;  %v608_v11 = vmul.f32 %v5322_v8, %v5322_v8 }
  0xf1   : > { %v611_v6 = vmul.f32 %v5312_v3, %v5312_v3 }
  0xf3   : > { %653 = vadd.xlane.f32.xlu2 %v611_v6 }
  0xf4   : > { %645 = vadd.xlane.f32.xlu0 %v607_v2  ;;  %522 = vadd.xlane.f32.xlu1 %v5316_v5  ;;  %v5324_v9 = vpop.xlane.xlu2 %524 }
  0xfb   : > { %500 = vadd.xlane.f32.xlu2 %v5332_v15 }
  0xfc   : > { %526 = vadd.xlane.f32.xlu0 %v5329_v14  ;;  %647 = vadd.xlane.f32.xlu1 %v608_v11  ;;  %v491_v16 = vpop.xlane.xlu2 %490 }
  0xfd   : > { %v549_v17 = vmul.f32 %v5234_v20, %v491_v16 }
  0xff   : > { %v5338_v7 = vsub.f32 %v5231_v13, %v549_v17  ;;  %v4366_v13 = vld [vmem:[#allocation8 + $0x18] sm:$0xff] }
 0x100   : > { %1271 = vmatpush.bf16.msra.mxu0 %v4366_v13  ;;  %4393 = vmatpush.bf16.msra.mxu3 %v4366_v13 }
 0x101   : > { %v613_v19 = vmul.f32 %v5338_v7, %v5338_v7 }
 0x103   : > { %657 = vadd.xlane.f32.xlu2 %v613_v19 }
 0x104   : > { %528 = vadd.xlane.f32.xlu1 %v5341_v18  ;;  %1272 = vmatpush.bf16.msra.mxu0 %v4365_v26 }
 0x105   : > { %4394 = vmatpush.bf16.msra.mxu3 %v4365_v26 }
 0x108   : > { %1273 = vmatpush.bf16.msra.mxu0 %v4364_v27 }
 0x109   : > { %4395 = vmatpush.bf16.msra.mxu3 %v4364_v27 }
 0x10c   : > { %1274 = vmatpush.bf16.msra.mxu0 %v4363_v33 }
 0x10d   : > { %4396 = vmatpush.bf16.msra.mxu3 %v4363_v33  ;;  %v5378_v33 = vld [vmem:[#allocation5] ss:$0 sm:$0xff] }
 0x137   : > { %v634_v28 = vpop.xlane.xlu0 %633 }
 0x138   : > { %v697_v29 = vmul.f32 %v634_v28, %v5234_v20 }
 0x13a   : > { %v729_v31 = vadd.f32 1e-05, %v697_v29  ;;  %v5375_v29 = vld [vmem:[%s5178_s27 + $0x70] sm:$0xff] }
 0x13c   : > { %4523 = vrsqrt.f32 %v729_v31  ;;  %vm767_vm2 = vweird.f32 %v729_v31 }
 0x13f   : > { %v636_v35 = vpop.xlane.xlu1 %635  ;;  %v485_v36 = vpop.xlane.xlu0 %484 }
 0x140   : > { %v698_v37 = vmul.f32 %v636_v35, %v5234_v20  ;;  %v546_v39 = vmul.f32 %v5234_v20, %v485_v36  ;;  %v5381_v35 = vsub.f32 %v5219_v10, %v564_v22 }
 0x142   : > { %v4524_v40 = vpop.eup %4523  ;;  %v730_v42 = vadd.f32 1e-05, %v698_v37  ;;  %v5350_v43 = vsub.f32 %v5246_v32, %v546_v39 }
 0x143   : > { %v762_v46 = vmul.f32 %v4524_v40, %v729_v31  ;;  %vm768_vm1 = vweird.f32 %v4524_v40 }
 0x144   : > { %4525 = vrsqrt.f32 %v730_v42  ;;  %v610_v47 = vmul.f32 %v5350_v43, %v5350_v43  ;;  %vm5361_vm3 = vmor %vm767_vm2, %vm768_vm1  ;;  %vm777_vm5 = vweird.f32 %v730_v42 }
 0x145   : > { %v763_v49 = vmul.f32 %v4524_v40, %v762_v46  ;;  %v5386_v46 = vld [vmem:[#allocation7] ss:$0 sm:$0xff] }
 0x146   : > { %651 = vadd.xlane.f32.xlu0 %v610_v47 }
 0x147   : > { %v764_v50 = vmul.f32 0.5, %v763_v49  ;;  %v515_v52 = vpop.xlane.xlu1 %514  ;;  %v638_v53 = vpop.xlane.xlu0 %637 }
 0x148   : > { %v561_v54 = vmul.f32 %v5234_v20, %v515_v52  ;;  %v699_v58 = vmul.f32 %v638_v53, %v5234_v20  ;;  %v628_v52 = vmul.f32 %v5381_v35, %v5381_v35 }
 0x149   : > { %v765_v60 = vsub.f32 1.5, %v764_v50 }
 0x14a   : > { %v4526_v63 = vpop.eup %4525  ;;  %v5357_v32 = vsub.f32 %v5256_v38, %v561_v54  ;;  %v731_v0 = vadd.f32 1e-05, %v699_v58  ;;  %v5366_v38 = vld [vmem:[%s5178_s27 + $0x98] sm:$0xff] }
 0x14b   : > { %v772_v1 = vmul.f32 %v4526_v63, %v730_v42  ;;  %v766_v2 = vmul.f32 %v4524_v40, %v765_v60  ;;  %504 = vadd.xlane.f32.xlu2 %v5366_v38  ;;  %vm778_vm4 = vweird.f32 %v4526_v63 }
 0x14c   : > { %4527 = vrsqrt.f32 %v731_v0  ;;  %v625_v4 = vmul.f32 %v5357_v32, %v5357_v32  ;;  %vm779_vm6 = vmor %vm777_vm5, %vm778_vm4  ;;  %vm787_vm7 = vweird.f32 %v731_v0 }
 0x14d   : > { %v773_v6 = vmul.f32 %v4526_v63, %v772_v1  ;;  %v770_v21 = vsel %vm5361_vm3, %v4524_v40, %v766_v2 }
 0x14e   : > { %681 = vadd.xlane.f32.xlu1 %v625_v4  ;;  %v1081_v31 = vmul.f32 %v770_v21, %v5237_v24  ;;  %v5401_v2 = vpop.xlane.xlu2 %683 }
 0x14f   : > { %v774_v16 = vmul.f32 0.5, %v773_v6  ;;  %v489_v17 = vpop.xlane.xlu0 %488  ;;  %v640_v19 = vpop.xlane.xlu1 %639 }
 0x150   : > { %v700_v25 = vmul.f32 %v640_v19, %v5234_v20  ;;  %v1116_v42 = vmul.f32 %v5378_v33, %v1081_v31  ;;  %v548_v58 = vmul.f32 %v5234_v20, %v489_v17  ;;  %v5419_v31 = vld [vmem:[%s5178_s27 + $0x80] sm:$0xff] }
 0x151   : > { %v775_v23 = vsub.f32 1.5, %v774_v16 }
 0x152   : > { %v4528_v13 = vpop.eup %4527  ;;  %v732_v28 = vadd.f32 1e-05, %v700_v25 }
 0x153   : > { %v776_v26 = vmul.f32 %v4526_v63, %v775_v23  ;;  %v782_v27 = vmul.f32 %v4528_v13, %v731_v0  ;;  %vm788_vm8 = vweird.f32 %v4528_v13  ;;  %v566_v23 = vmul.f32 %v5234_v20, %v5324_v9 }
 0x154   : > { %4529 = vrsqrt.f32 %v732_v28  ;;  %vm5403_vm9 = vmor %vm787_vm7, %vm788_vm8  ;;  %vm797_vm10 = vweird.f32 %v732_v28 }
 0x155   : > { %v783_v57 = vmul.f32 %v4528_v13, %v782_v27  ;;  %v780_v36 = vsel %vm779_vm6, %v4526_v63, %v776_v26  ;;  %v1151_v63 = vadd.f32 %v5386_v46, %v1116_v42 }
 0x156   : > { %494 = vadd.xlane.f32.xlu1 %v5375_v29  ;;  %v1082_v37 = vmul.f32 %v780_v36, %v5242_v30  ;;  %v5428_v9 = vpop.xlane.xlu2 %649 }
 0x157   : > { %v784_v39 = vmul.f32 0.5, %v783_v57  ;;  %v642_v40 = vpop.xlane.xlu0 %641  ;;  %v519_v24 = vpop.xlane.xlu1 %518 }
 0x158   : > { %v701_v47 = vmul.f32 %v642_v40, %v5234_v20  ;;  %v1117_v49 = vmul.f32 %v5378_v33, %v1082_v37  ;;  %v563_v50 = vmul.f32 %v5234_v20, %v519_v24 }
 0x159   : > { %v785_v10 = vsub.f32 1.5, %v784_v39 }
 0x15a   : > { %v5393_v30 = vadd.f32 1e-05, %v701_v47  ;;  %v1152_v53 = vadd.f32 %v5386_v46, %v1117_v49  ;;  %v4530_v54 = vpop.eup %4529  ;;  %v5398_v60 = vsub.f32 %v5286_v55, %v563_v50  ;;  %v5411_v55 = vsub.f32 %v5267_v45, %v548_v58 }
 0x15b   : > { %v786_v1 = vmul.f32 %v4528_v13, %v785_v10  ;;  %v792_v4 = vmul.f32 %v4530_v54, %v732_v28  ;;  %vm798_vm11 = vweird.f32 %v4530_v54 }
 0x15c   : > { %4531 = vrsqrt.f32 %v5393_v30  ;;  %v1183_v0 = vpack.c.bf16 %v1152_v53, %v1151_v63  ;;  %v627_v16 = vmul.f32 %v5398_v60, %v5398_v60  ;;  %vm799_vm12 = vmor %vm797_vm10, %vm798_vm11  ;;  %v612_v37 = vmul.f32 %v5411_v55, %v5411_v55 }
 0x15d   : > { %v793_v11 = vmul.f32 %v4530_v54, %v792_v4  ;;  %v790_v22 = vsel %vm5403_vm9, %v4528_v13, %v786_v1  ;;  %v5426_v13 = vsub.f32 %v5227_v12, %v566_v23  ;;  %vm807_vm13 = vweird.f32 %v5393_v30 }
 0x15e   : > { %687 = vadd.xlane.f32.xlu1 %v628_v52  ;;  %1275 = vmatmul.bf16.vlgmr.msra.gmra.mxu0 %v1183_v0  ;;  %v1083_v57 = vmul.f32 %v790_v22, %v5251_v34 }
 0x15f   : > { %v493_v17 = vpop.xlane.xlu0 %492  ;;  %v794_v19 = vmul.f32 0.5, %v793_v11  ;;  %685 = vadd.xlane.f32.xlu0 %v627_v16  ;;  %v644_v21 = vpop.xlane.xlu1 %643  ;;  %v630_v50 = vmul.f32 %v5426_v13, %v5426_v13 }
 0x160   : > { %v702_v25 = vmul.f32 %v644_v21, %v5234_v20  ;;  %v1118_v34 = vmul.f32 %v5378_v33, %v1083_v57  ;;  %v550_v58 = vmul.f32 %v5234_v20, %v493_v17  ;;  %v497_v17 = vpop.xlane.xlu2 %496 }
 0x161   : > { %v795_v26 = vsub.f32 1.5, %v794_v19 }
 0x162   : > { %v4532_v27 = vpop.eup %4531  ;;  %v734_v45 = vadd.f32 1e-05, %v702_v25  ;;  %v1153_v1 = vadd.f32 %v5386_v46, %v1118_v34 }
 0x163   : > { %v796_v28 = vmul.f32 %v4530_v54, %v795_v26  ;;  %v802_v36 = vmul.f32 %v4532_v27, %v5393_v30  ;;  %vm808_vm14 = vweird.f32 %v4532_v27 }
 0x164   : > { %4533 = vrsqrt.f32 %v734_v45  ;;  %vm5445_vm15 = vmor %vm807_vm13, %vm808_vm14  ;;  %vm817_vm0 = vweird.f32 %v734_v45 }
 0x165   : > { %v803_v39 = vmul.f32 %v4532_v27, %v802_v36  ;;  %v800_v40 = vsel %vm799_vm12, %v4530_v54, %v796_v28 }
 0x166   : > { %498 = vadd.xlane.f32.xlu1 %v5419_v31  ;;  %v1084_v24 = vmul.f32 %v800_v40, %v5260_v41 }
 0x167   : > { %v646_v42 = vpop.xlane.xlu0 %645  ;;  %v804_v47 = vmul.f32 0.5, %v803_v39  ;;  %655 = vadd.xlane.f32.xlu0 %v612_v37  ;;  %v523_v49 = vpop.xlane.xlu1 %522  ;;  %v5458_v39 = vld [vmem:[%s5178_s27 + $0x90] sm:$0xff] }
 0x168   : > { %v703_v10 = vmul.f32 %v646_v42, %v5234_v20  ;;  %v565_v12 = vmul.f32 %v5234_v20, %v523_v49  ;;  %v1119_v52 = vmul.f32 %v5378_v33, %v1084_v24  ;;  %v5465_v34 = vpop.xlane.xlu2 %653 }
 0x169   : > { %v805_v53 = vsub.f32 1.5, %v804_v47 }
 0x16a   : > { %v735_v54 = vadd.f32 1e-05, %v703_v10  ;;  %v4534_v41 = vpop.eup %4533  ;;  %v5441_v63 = vsub.f32 %v5316_v5, %v565_v12  ;;  %v1154_v4 = vadd.f32 %v5386_v46, %v1119_v52  ;;  %v5452_v5 = vsub.f32 %v5296_v59, %v550_v58 }
 0x16b   : > { %v806_v6 = vmul.f32 %v4532_v27, %v805_v53  ;;  %v812_v0 = vmul.f32 %v4534_v41, %v734_v45  ;;  %vm818_vm1 = vweird.f32 %v4534_v41 }
 0x16c   : > { %4535 = vrsqrt.f32 %v735_v54  ;;  %v1184_v30 = vpack.c.bf16 %v1154_v4, %v1153_v1  ;;  %v629_v16 = vmul.f32 %v5441_v63, %v5441_v63  ;;  %vm819_vm2 = vmor %vm817_vm0, %vm818_vm1  ;;  %v614_v45 = vmul.f32 %v5452_v5, %v5452_v5 }
 0x16d   : > { %v813_v19 = vmul.f32 %v4534_v41, %v812_v0  ;;  %v810_v23 = vsel %vm5445_vm15, %v4532_v27, %v806_v6  ;;  %vm827_vm3 = vweird.f32 %v735_v54  ;;  %v552_v4 = vmul.f32 %v5234_v20, %v497_v17 }
 0x16e   : > { %691 = vadd.xlane.f32.xlu1 %v630_v50  ;;  %1280 = vmatmul.bf16.gmra.mxu0 %v1184_v30  ;;  %v1085_v59 = vmul.f32 %v810_v23, %v5274_v48 }
 0x16f   : > { %v814_v21 = vmul.f32 0.5, %v813_v19  ;;  %689 = vadd.xlane.f32.xlu0 %v629_v16  ;;  %v648_v22 = vpop.xlane.xlu1 %647  ;;  %v527_v26 = vpop.xlane.xlu0 %526  ;;  %v5489_v16 = vsub.f32 %v5301_v61, %v552_v4 }
 0x170   : > { %v704_v25 = vmul.f32 %v648_v22, %v5234_v20  ;;  %v567_v42 = vmul.f32 %v5234_v20, %v527_v26  ;;  %v1120_v10 = vmul.f32 %v5378_v33, %v1085_v59 }
 0x171   : > { %v815_v28 = vsub.f32 1.5, %v814_v21  ;;  %v501_v21 = vpop.xlane.xlu2 %500  ;;  %v616_v61 = vmul.f32 %v5489_v16, %v5489_v16 }
 0x172   : > { %v4536_v57 = vpop.eup %4535  ;;  %v736_v37 = vadd.f32 1e-05, %v704_v25  ;;  %v5470_v12 = vsub.f32 %v5329_v14, %v567_v42  ;;  %v554_v25 = vmul.f32 %v5234_v20, %v501_v21 }
 0x173   : > { %v822_v36 = vmul.f32 %v4536_v57, %v735_v54  ;;  %v816_v40 = vmul.f32 %v4534_v41, %v815_v28  ;;  %vm828_vm4 = vweird.f32 %v4536_v57  ;;  %v5496_v28 = vld [vmem:[%s5178_s27 + $0xa0] sm:$0xff] }
 0x174   : > { %4537 = vrsqrt.f32 %v736_v37  ;;  %v631_v0 = vmul.f32 %v5470_v12, %v5470_v12  ;;  %vm5482_vm5 = vmor %vm827_vm3, %vm828_vm4  ;;  %vm837_vm6 = vweird.f32 %v736_v37  ;;  %v5504_v59 = vsub.f32 %v5332_v15, %v554_v25 }
 0x175   : > { %v823_v24 = vmul.f32 %v4536_v57, %v822_v36  ;;  %v820_v27 = vsel %vm819_vm2, %v4534_v41, %v816_v40  ;;  %v722_v15 = vmul.f32 %v5401_v2, %v5234_v20 }
 0x176   : > { %502 = vadd.xlane.f32.xlu1 %v5458_v39  ;;  %v1086_v49 = vmul.f32 %v820_v27, %v5289_v56  ;;  %v1155_v56 = vadd.f32 %v5386_v46, %v1120_v10  ;;  %8662 = vst [vmem:[#allocation19_spill] sm:$0xff] %v5504_v59  ;;  %v618_v42 = vmul.f32 %v5504_v59, %v5504_v59 }
 0x177   : > { %v824_v47 = vmul.f32 0.5, %v823_v24  ;;  %659 = vadd.xlane.f32.xlu0 %v614_v45  ;;  %v529_v48 = vpop.xlane.xlu1 %528 }
 0x178   : > { %v568_v52 = vmul.f32 %v5234_v20, %v529_v48  ;;  %v1121_v53 = vmul.f32 %v5378_v33, %v1086_v49 }
 0x179   : > { %v825_v50 = vsub.f32 1.5, %v824_v47  ;;  %v754_v47 = vadd.f32 1e-05, %v722_v15  ;;  %v658_v15 = vpop.xlane.xlu2 %657 }
 0x17a   : > { %v4538_v41 = vpop.eup %4537  ;;  %v5475_v58 = vsub.f32 %v5341_v18, %v568_v52  ;;  %v1156_v1 = vadd.f32 %v5386_v46, %v1121_v53 }
 0x17b   : > { %v826_v6 = vmul.f32 %v4536_v57, %v825_v50  ;;  %v832_v14 = vmul.f32 %v4538_v41, %v736_v37  ;;  %vm838_vm7 = vweird.f32 %v4538_v41  ;;  %vm1017_vm14 = vweird.f32 %v754_v47 }
 0x17c   : > { %v632_v54 = vmul.f32 %v5475_v58, %v5475_v58  ;;  %v1185_v18 = vpack.c.bf16 %v1156_v1, %v1155_v56  ;;  %vm839_vm8 = vmor %vm837_vm6, %vm838_vm7 }
 0x17d   : > { %v833_v30 = vmul.f32 %v4538_v41, %v832_v14  ;;  %v830_v17 = vsel %vm5482_vm5, %v4536_v57, %v826_v6 }
 0x17e   : > { %695 = vadd.xlane.f32.xlu1 %v632_v54  ;;  %1285 = vmatmul.bf16.gmra.mxu0 %v1185_v18  ;;  %v1087_v23 = vmul.f32 %v830_v17, %v5304_v62 }
 0x17f   : > { %v834_v19 = vmul.f32 0.5, %v833_v30  ;;  %693 = vadd.xlane.f32.xlu0 %v631_v0 }
 0x180   : > { %v1122_v57 = vmul.f32 %v5378_v33, %v1087_v23 }
 0x181   : > { %v835_v22 = vsub.f32 1.5, %v834_v19 }
 0x182   : > { %v1157_v40 = vadd.f32 %v5386_v46, %v1122_v57 }
 0x183   : > { %v836_v26 = vmul.f32 %v4538_v41, %v835_v22  ;;  %v707_v22 = vmul.f32 %v5465_v34, %v5234_v20 }
 0x185   : > { %v840_v36 = vsel %vm839_vm8, %v4538_v41, %v836_v26  ;;  %v5534_v34 = vadd.f32 1e-05, %v707_v22 }
 0x186   : > { %506 = vadd.xlane.f32.xlu1 %v5496_v28  ;;  %v1088_v37 = vmul.f32 %v840_v36, %v5322_v8  ;;  %v705_v8 = vmul.f32 %v5428_v9, %v5234_v20 }
 0x187   : > { %663 = vadd.xlane.f32.xlu0 %v616_v61 }
 0x188   : > { %v1123_v62 = vmul.f32 %v5378_v33, %v1088_v37  ;;  %v737_v27 = vadd.f32 1e-05, %v705_v8 }
 0x18a   : > { %v1158_v45 = vadd.f32 %v5386_v46, %v1123_v62  ;;  %4539 = vrsqrt.f32 %v737_v27  ;;  %vm847_vm9 = vweird.f32 %v737_v27 }
 0x18b   : > { %4541 = vrsqrt.f32 %v754_v47 }
 0x18c   : > { %v1186_v24 = vpack.c.bf16 %v1158_v45, %v1157_v40 }
 0x18e   : > { %1290 = vmatmul.bf16.gmra.mxu0 %v1186_v24  ;;  %667 = vadd.xlane.f32.xlu1 %v618_v42 }
 0x190   : > { %v4540_v49 = vpop.eup %4539 }
 0x191   : > { %v842_v10 = vmul.f32 %v4540_v49, %v737_v27  ;;  %v4542_v50 = vpop.eup %4541  ;;  %vm848_vm10 = vweird.f32 %v4540_v49 }
 0x192   : > { %v1012_v41 = vmul.f32 %v4542_v50, %v754_v47  ;;  %vm5517_vm11 = vmor %vm847_vm9, %vm848_vm10  ;;  %vm1018_vm15 = vweird.f32 %v4542_v50  ;;  %vm867_vm9 = vweird.f32 %v5534_v34 }
 0x193   : > { %v843_v48 = vmul.f32 %v4540_v49, %v842_v10  ;;  %vm5530_vm1 = vmor %vm1017_vm14, %vm1018_vm15 }
 0x194   : > { %v1013_v4 = vmul.f32 %v4542_v50, %v1012_v41 }
 0x195   : > { %v844_v56 = vmul.f32 0.5, %v843_v48 }
 0x196   : > { %v1014_v0 = vmul.f32 0.5, %v1013_v4 }
 0x197   : > { %v845_v9 = vsub.f32 1.5, %v844_v56 }
 0x198   : > { %v1015_v17 = vsub.f32 1.5, %v1014_v0 }
 0x199   : > { %v846_v11 = vmul.f32 %v4540_v49, %v845_v9  ;;  %v709_v9 = vmul.f32 %v658_v15, %v5234_v20 }
 0x19a   : > { %v1016_v37 = vmul.f32 %v4542_v50, %v1015_v17 }
 0x19b   : > { %v850_v21 = vsel %vm5517_vm11, %v4540_v49, %v846_v11 }
 0x19c   : > { %v1089_v62 = vmul.f32 %v850_v21, %v5278_v51  ;;  %v1020_v51 = vsel %vm5530_vm1, %v4542_v50, %v1016_v37  ;;  %v5574_v37 = vld [vmem:[#allocation10] ss:$0 sm:$0xff] }
 0x19d   : > { %v1106_v56 = vmul.f32 %v1020_v51, %v5264_v44 }
 0x19e   : > { %v1124_v47 = vmul.f32 %v5378_v33, %v1089_v62 }
 0x1a0   : > { %v1159_v50 = vadd.f32 %v5386_v46, %v1124_v47 }
 0x1b9   : > { %v652_v52 = vpop.xlane.xlu0 %651 }
 0x1ba   : > { %v706_v53 = vmul.f32 %v652_v52, %v5234_v20 }
 0x1bc   : > { %v738_v1 = vadd.f32 1e-05, %v706_v53 }
 0x1be   : > { %4543 = vrsqrt.f32 %v738_v1  ;;  %vm857_vm12 = vweird.f32 %v738_v1 }
 0x1c1   : > { %v682_v6 = vpop.xlane.xlu1 %681 }
 0x1c2   : > { %v721_v2 = vmul.f32 %v682_v6, %v5234_v20 }
 0x1c4   : > { %v4544_v14 = vpop.eup %4543  ;;  %v753_v54 = vadd.f32 1e-05, %v721_v2  ;;  %v453_v2 = vld [vmem:[%s5178_s27 + $0xa8] sm:$0xff] }
 0x1c5   : > { %v852_v30 = vmul.f32 %v4544_v14, %v738_v1  ;;  %vm858_vm13 = vweird.f32 %v4544_v14 }
 0x1c6   : > { %4545 = vrsqrt.f32 %v753_v54  ;;  %vm859_vm0 = vmor %vm857_vm12, %vm858_vm13  ;;  %vm1007_vm3 = vweird.f32 %v753_v54 }
 0x1c7   : > { %v853_v19 = vmul.f32 %v4544_v14, %v852_v30  ;;  %4547 = vrsqrt.f32 %v5534_v34  ;;  %v1141_v30 = vmul.f32 %v5378_v33, %v1106_v56 }
 0x1c9   : > { %v854_v23 = vmul.f32 0.5, %v853_v19  ;;  %v495_v25 = vpop.xlane.xlu1 %494  ;;  %v505_v19 = vpop.xlane.xlu2 %504 }
 0x1ca   : > { %v551_v26 = vmul.f32 %v5234_v20, %v495_v25 }
 0x1cb   : > { %v855_v61 = vsub.f32 1.5, %v854_v23 }
 0x1cc   : > { %v4546_v36 = vpop.eup %4545  ;;  %v5527_v57 = vsub.f32 %v5375_v29, %v551_v26  ;;  %v556_v26 = vmul.f32 %v5234_v20, %v505_v19 }
 0x1cd   : > { %v856_v45 = vmul.f32 %v4544_v14, %v855_v61  ;;  %v1002_v42 = vmul.f32 %v4546_v36, %v753_v54  ;;  %vm1008_vm2 = vweird.f32 %v4546_v36  ;;  %v5556_v44 = vpop.eup %4547  ;;  %v5561_v54 = vadd.f32 1e-05, %v709_v9 }
 0x1ce   : > { %v615_v24 = vmul.f32 %v5527_v57, %v5527_v57  ;;  %vm1009_vm4 = vmor %vm1007_vm3, %vm1008_vm2  ;;  %v862_v21 = vmul.f32 %v5556_v44, %v5534_v34  ;;  %vm868_vm10 = vweird.f32 %v5556_v44 }
 0x1cf   : > { %v1003_v8 = vmul.f32 %v4546_v36, %v1002_v42  ;;  %v860_v27 = vsel %vm859_vm0, %v4544_v14, %v856_v45  ;;  %v1176_v45 = vadd.f32 %v5386_v46, %v1141_v30  ;;  %vm5668_vm13 = vmor %vm867_vm9, %vm868_vm10  ;;  %vm887_vm14 = vweird.f32 %v5561_v54 }
 0x1d0   : > { %661 = vadd.xlane.f32.xlu2 %v615_v24  ;;  %v1090_v29 = vmul.f32 %v860_v27, %v5350_v43  ;;  %v454_v24 = vld [vmem:[%s5178_s27 + $0xb0] sm:$0xff] }
 0x1d1   : > { %v1004_v49 = vmul.f32 0.5, %v1003_v8  ;;  %v688_v10 = vpop.xlane.xlu1 %687 }
 0x1d2   : > { %v724_v48 = vmul.f32 %v688_v10, %v5234_v20  ;;  %v1125_v52 = vmul.f32 %v5378_v33, %v1090_v29  ;;  %v686_v41 = vpop.xlane.xlu0 %685 }
 0x1d3   : > { %v1005_v53 = vsub.f32 1.5, %v1004_v49  ;;  %v723_v1 = vmul.f32 %v686_v41, %v5234_v20  ;;  %v5593_v49 = vsub.f32 %v5366_v38, %v556_v26 }
 0x1d4   : > { %v5546_v43 = vadd.f32 1e-05, %v724_v48  ;;  %v1160_v4 = vadd.f32 %v5386_v46, %v1125_v52 }
 0x1d5   : > { %v1006_v6 = vmul.f32 %v4546_v36, %v1005_v53  ;;  %v5554_v14 = vadd.f32 1e-05, %v723_v1  ;;  %8668 = vst [vmem:[#allocation21_spill] sm:$0xff] %v5593_v49  ;;  %v620_v9 = vmul.f32 %v5593_v49, %v5593_v49 }
 0x1d6   : > { %4549 = vrsqrt.f32 %v5546_v43  ;;  %v1187_v0 = vpack.c.bf16 %v1160_v4, %v1159_v50  ;;  %vm1037_vm11 = vweird.f32 %v5546_v43 }
 0x1d7   : > { %v1010_v11 = vsel %vm1009_vm4, %v4546_v36, %v1006_v6  ;;  %4551 = vrsqrt.f32 %v5554_v14  ;;  %vm1027_vm5 = vweird.f32 %v5554_v14 }
 0x1d8   : > { %508 = vadd.xlane.f32.xlu2 %v453_v2  ;;  %1295 = vmatmul.bf16.gmra.mxu0 %v1187_v0  ;;  %v1105_v18 = vmul.f32 %v1010_v11, %v5357_v32  ;;  %4553 = vrsqrt.f32 %v5561_v54 }
 0x1d9   : > { %v499_v17 = vpop.xlane.xlu1 %498 }
 0x1da   : > { %v553_v22 = vmul.f32 %v5234_v20, %v499_v17  ;;  %v1140_v23 = vmul.f32 %v5378_v33, %v1105_v18  ;;  %v656_v25 = vpop.xlane.xlu0 %655 }
 0x1db   : > { %v708_v36 = vmul.f32 %v656_v25, %v5234_v20  ;;  %v1276_v62 = vpop.f32.mrf.mxu0 }
 0x1dc   : > { %v5568_v61 = vpop.eup %4549  ;;  %v5571_v32 = vsub.f32 %v5419_v31, %v553_v22  ;;  %v1175_v40 = vadd.f32 %v5386_v46, %v1140_v23  ;;  %v863_v31 = vmul.f32 %v5556_v44, %v862_v21  ;;  %v5597_v10 = vadd.f32 %v5574_v37, %v1276_v62  ;;  %v455_v21 = vld [vmem:[%s5178_s27 + $0xb8] sm:$0xff] }
 0x1dd   : > { %v1032_v42 = vmul.f32 %v5568_v61, %v5546_v43  ;;  %v5582_v8 = vpop.eup %4551  ;;  %v5585_v27 = vadd.f32 1e-05, %v708_v36  ;;  %vm1038_vm7 = vweird.f32 %v5568_v61  ;;  %v4350_v22 = vld [vmem:[#allocation11 + $0x70] sm:$0xf]  ;;  %v4386_v62 = vld [vmem:[#allocation11 + $0x74] sm:$0xf0] }
 0x1de   : > { %8667 = vst [vmem:[#allocation20_spill] sm:$0xff] %v5571_v32  ;;  %v1195_v15 = vpack.c.bf16 %v1176_v45, %v1175_v40  ;;  %v617_v29 = vmul.f32 %v5571_v32, %v5571_v32  ;;  %v1022_v51 = vmul.f32 %v5582_v8, %v5554_v14  ;;  %v864_v41 = vmul.f32 0.5, %v863_v31  ;;  %v5601_v1 = vpop.eup %4553  ;;  %vm5641_vm12 = vmor %vm1037_vm11, %vm1038_vm7  ;;  %v4342_v43 = vld [vmem:[#allocation11 + $0x60] sm:$0xf] }
 0x1df   : > { %v1033_v47 = vmul.f32 %v5568_v61, %v1032_v42  ;;  %4555 = vrsqrt.f32 %v5585_v27  ;;  %vm1028_vm6 = vweird.f32 %v5582_v8  ;;  %v5608_v6 = vmul.f32 0.70710677, %v5597_v10  ;;  %v4385_v42 = vld [vmem:[#allocation11 + $0x74] sm:$0xf] }
 0x1e0   : > { %1335 = vmatmul.bf16.vlgmr.msra.gmra.mxu3 %v1195_v15  ;;  %510 = vadd.xlane.f32.xlu2 %v454_v24  ;;  %v1023_v52 = vmul.f32 %v5582_v8, %v1022_v51  ;;  %v882_v19 = vmul.f32 %v5601_v1, %v5561_v54  ;;  %vm5625_vm8 = vmor %vm1027_vm5, %vm1028_vm6  ;;  %v865_v40 = vsub.f32 1.5, %v864_v41  ;;  %v4352_v24 = vld [vmem:[#allocation11 + $0x78] sm:$0xf0]  ;;  %v4351_v31 = vor.u32 %v4386_v62, %v4350_v22 }
 0x1e1   : > { %v1034_v48 = vmul.f32 0.5, %v1033_v47  ;;  %665 = vadd.xlane.f32.xlu0 %v617_v29  ;;  %v692_v53 = vpop.xlane.xlu1 %691  ;;  %v1420_v45 = vmul.f32 %v5608_v6, %v5608_v6  ;;  %vm888_vm15 = vweird.f32 %v5601_v1  ;;  %vm877_vm0 = vweird.f32 %v5585_v27 }
 0x1e2   : > { %v726_v56 = vmul.f32 %v692_v53, %v5234_v20  ;;  %v1024_v50 = vmul.f32 0.5, %v1023_v52  ;;  %v690_v4 = vpop.xlane.xlu0 %689  ;;  %v883_v15 = vmul.f32 %v5601_v1, %v882_v19  ;;  %v4384_v52 = vld [vmem:[#allocation11 + $0x64] sm:$0xf0]  ;;  %2882 = vmatpush.bf16.msra.mxu1 %v4351_v31  ;;  %4397 = vmatpush.bf16.msrb.mxu3 %v4351_v31  ;;  %vm5737_vm3 = vmor %vm887_vm14, %vm888_vm15 }
 0x1e3   : > { %v1035_v38 = vsub.f32 1.5, %v1034_v48  ;;  %v725_v0 = vmul.f32 %v690_v4, %v5234_v20  ;;  %v1278_v11 = vpop.f32.mrf.mxu0  ;;  %v5656_v4 = vmin.f32 %v1420_v45, 16.0 }
 0x1e4   : > { %v5610_v2 = vadd.f32 1e-05, %v726_v56  ;;  %v1025_v18 = vsub.f32 1.5, %v1024_v50  ;;  %v5653_v56 = vor.u32 %v4385_v42, %v4352_v24  ;;  %v866_v50 = vmul.f32 %v5556_v44, %v865_v40 }
 0x1e5   : > { %v5613_v30 = vpop.eup %4555  ;;  %v5618_v17 = vadd.f32 1e-05, %v725_v0  ;;  %v1036_v23 = vmul.f32 %v5568_v61, %v1035_v38  ;;  %v4343_v38 = vor.u32 %v4384_v52, %v4342_v43  ;;  %v5673_v19 = vadd.f32 %v5574_v37, %v1278_v11 }
 0x1e6   : > { %v1026_v25 = vmul.f32 %v5582_v8, %v1025_v18  ;;  %v872_v36 = vmul.f32 %v5613_v30, %v5585_v27  ;;  %4557 = vrsqrt.f32 %v5610_v2  ;;  %2971 = vmatpush.bf16.msra.mxu2 %v5653_v56  ;;  %v884_v26 = vmul.f32 0.5, %v883_v15 }
 0x1e7   : > { %4559 = vrsqrt.f32 %v5618_v17  ;;  %v1040_v41 = vsel %vm5641_vm12, %v5568_v61, %v1036_v23  ;;  %2883 = vmatpush.bf16.msra.mxu1 %v4343_v38  ;;  %4398 = vmatpush.bf16.msrb.mxu3 %v4343_v38  ;;  %v1422_v11 = vmul.f32 2.1237322e-06, %v5656_v4  ;;  %v5695_v62 = vmul.f32 0.70710677, %v5673_v19 }
 0x1e8   : > { %671 = vadd.xlane.f32.xlu2 %v620_v9  ;;  %v873_v47 = vmul.f32 %v5613_v30, %v872_v36  ;;  %v1030_v48 = vsel %vm5625_vm8, %v5582_v8, %v1026_v25  ;;  %v1108_v34 = vmul.f32 %v1040_v41, %v5381_v35  ;;  %vm878_vm1 = vweird.f32 %v5613_v30 }
 0x1e9   : > { %512 = vadd.xlane.f32.xlu0 %v455_v21  ;;  %v503_v14 = vpop.xlane.xlu1 %502  ;;  %v1107_v21 = vmul.f32 %v1030_v48, %v5398_v60  ;;  %v870_v60 = vsel %vm5668_vm13, %v5556_v44, %v866_v50  ;;  %v885_v44 = vsub.f32 1.5, %v884_v26  ;;  %v1423_v29 = vadd.f32 0.00028619796, %v1422_v11  ;;  %vm5724_vm2 = vmor %vm877_vm0, %vm878_vm1 }
 0x1ea   : > { %v555_v51 = vmul.f32 %v5234_v20, %v503_v14  ;;  %v660_v53 = vpop.xlane.xlu0 %659  ;;  %v874_v22 = vmul.f32 0.5, %v873_v47  ;;  %v1143_v42 = vmul.f32 %v5378_v33, %v1108_v34  ;;  %v1091_v15 = vmul.f32 %v870_v60, %v5312_v3  ;;  %v4344_v34 = vld [vmem:[#allocation11 + $0x68] sm:$0xf0] }
 0x1eb   : > { %v710_v8 = vmul.f32 %v660_v53, %v5234_v20  ;;  %v1281_v0 = vpop.f32.mrf.mxu0  ;;  %v1142_v45 = vmul.f32 %v5378_v33, %v1107_v21  ;;  %v1460_v53 = vmul.f32 %v5695_v62, %v5695_v62  ;;  %v886_v21 = vmul.f32 %v5601_v1, %v885_v44 }
 0x1ec   : > { %v5659_v9 = vsub.f32 %v5458_v39, %v555_v51  ;;  %v5662_v18 = vpop.eup %4557  ;;  %v875_v40 = vsub.f32 1.5, %v874_v22  ;;  %v1178_v51 = vadd.f32 %v5386_v46, %v1143_v42  ;;  %v5716_v50 = vadd.f32 %v5574_v37, %v1281_v0 }
 0x1ed   : > { %v5677_v39 = vpop.eup %4559  ;;  %v5679_v23 = vadd.f32 1e-05, %v710_v8  ;;  %v1052_v36 = vmul.f32 %v5662_v18, %v5610_v2  ;;  %v1177_v47 = vadd.f32 %v5386_v46, %v1142_v45  ;;  %v1424_v26 = vmul.f32 %v1423_v29, %v5656_v4 }
 0x1ee   : > { %8673 = vst [vmem:[#allocation22_spill] sm:$0xff] %v5659_v9  ;;  %v619_v25 = vmul.f32 %v5659_v9, %v5659_v9  ;;  %v1042_v35 = vmul.f32 %v5677_v39, %v5618_v17  ;;  %v876_v3 = vmul.f32 %v5613_v30, %v875_v40  ;;  %v1126_v11 = vmul.f32 %v5378_v33, %v1091_v15 }
 0x1ef   : > { %4561 = vrsqrt.f32 %v5679_v23  ;;  %v1053_v43 = vmul.f32 %v5662_v18, %v1052_v36  ;;  %v1196_v8 = vpack.c.bf16 %v1178_v51, %v1177_v47  ;;  %v5746_v45 = vmul.f32 0.70710677, %v5716_v50 }
 0x1f0   : > { %669 = vadd.xlane.f32.xlu1 %v619_v25  ;;  %v1043_v52 = vmul.f32 %v5677_v39, %v1042_v35  ;;  %v4383_v25 = vld [vmem:[#allocation11 + $0x64] sm:$0xf]  ;;  %v5741_v35 = vmin.f32 %v1460_v53, 16.0  ;;  %v880_v54 = vsel %vm5724_vm2, %v5613_v30, %v876_v3  ;;  %v1161_v15 = vadd.f32 %v5386_v46, %v1126_v11 }
 0x1f1   : > { %v696_v24 = vpop.xlane.xlu1 %695  ;;  %1340 = vmatmul.bf16.gmra.mxu3 %v1196_v8  ;;  %v1054_v60 = vmul.f32 0.5, %v1053_v43  ;;  %v5754_v44 = vor.u32 %v4383_v25, %v4344_v34  ;;  %v890_v47 = vsel %vm5737_vm3, %v5601_v1, %v886_v21  ;;  %v1425_v51 = vadd.f32 0.0036580483, %v1424_v26 }
 0x1f2   : > { %v728_v14 = vmul.f32 %v696_v24, %v5234_v20  ;;  %v694_v31 = vpop.xlane.xlu0 %693  ;;  %v1044_v36 = vmul.f32 0.5, %v1043_v52  ;;  %vm1057_vm4 = vweird.f32 %v5610_v2  ;;  %vm1047_vm5 = vweird.f32 %v5618_v17 }
 0x1f3   : > { %v1283_v48 = vpop.f32.mrf.mxu0  ;;  %v727_v61 = vmul.f32 %v694_v31, %v5234_v20  ;;  %v1092_v31 = vmul.f32 %v880_v54, %v5411_v55  ;;  %2972 = vmatpush.bf16.msra.mxu2 %v5754_v44  ;;  %v1055_v53 = vsub.f32 1.5, %v1054_v60  ;;  %v1500_v55 = vmul.f32 %v5746_v45, %v5746_v45 }
 0x1f4   : > { %v5710_v41 = vadd.f32 1e-05, %v728_v14  ;;  %v5749_v42 = vadd.f32 %v5574_v37, %v1283_v48  ;;  %v1045_v30 = vsub.f32 1.5, %v1044_v36  ;;  %v1462_v48 = vmul.f32 2.1237322e-06, %v5741_v35 }
 0x1f5   : > { %v5712_v38 = vpop.eup %4561  ;;  %v5743_v40 = vadd.f32 1e-05, %v727_v61  ;;  %v1127_v8 = vmul.f32 %v5378_v33, %v1092_v31  ;;  %vm1048_vm6 = vweird.f32 %v5677_v39  ;;  %v1093_v1 = vmul.f32 %v890_v47, %v5338_v7 }
 0x1f6   : > { %v892_v0 = vmul.f32 %v5712_v38, %v5679_v23  ;;  %4563 = vrsqrt.f32 %v5710_v41  ;;  %v5771_v3 = vmul.f32 0.70710677, %v5749_v42  ;;  %vm1058_vm7 = vweird.f32 %v5662_v18  ;;  %vm5790_vm8 = vmor %vm1047_vm5, %vm1048_vm6 }
 0x1f7   : > { %4565 = vrsqrt.f32 %v5743_v40  ;;  %v1162_v22 = vadd.f32 %v5386_v46, %v1127_v8  ;;  %v1426_v34 = vmul.f32 %v1425_v51, %v5656_v4  ;;  %v1046_v26 = vmul.f32 %v5677_v39, %v1045_v30  ;;  %vm5802_vm9 = vmor %vm1057_vm4, %vm1058_vm7 }
 0x1f8   : > { %v893_v14 = vmul.f32 %v5712_v38, %v892_v0  ;;  %v1463_v0 = vadd.f32 0.00028619796, %v1462_v48  ;;  %v1056_v7 = vmul.f32 %v5662_v18, %v1055_v53  ;;  %v5794_v27 = vmin.f32 %v1500_v55, 16.0 }
 0x1f9   : > { %v507_v24 = vpop.xlane.xlu1 %506  ;;  %v1540_v36 = vmul.f32 %v5771_v3, %v5771_v3  ;;  %v1427_v48 = vadd.f32 0.05243302, %v1426_v34  ;;  %vm897_vm10 = vweird.f32 %v5679_v23  ;;  %vm898_vm11 = vweird.f32 %v5712_v38 }
 0x1fa   : > { %v557_v43 = vmul.f32 %v5234_v20, %v507_v24  ;;  %v894_v61 = vmul.f32 0.5, %v893_v14  ;;  %v1128_v24 = vmul.f32 %v5378_v33, %v1093_v1  ;;  %v1464_v53 = vmul.f32 %v1463_v0, %v5741_v35  ;;  %v4382_v1 = vld [vmem:[#allocation11 + $0x54] sm:$0xf0]  ;;  %vm5845_vm12 = vmor %vm897_vm10, %vm898_vm11 }
 0x1fb   : > { %v1286_v29 = vpop.f32.mrf.mxu0  ;;  %v1502_v55 = vmul.f32 2.1237322e-06, %v5794_v27  ;;  %v5820_v8 = vmin.f32 %v1540_v36, 16.0  ;;  %v4336_v36 = vld [vmem:[#allocation11 + $0x58] sm:$0xf0]  ;;  %vm1077_vm13 = vweird.f32 %v5710_v41  ;;  %vm1067_vm14 = vweird.f32 %v5743_v40 }
 0x1fc   : > { %v5766_v52 = vpop.eup %4563  ;;  %v5787_v17 = vsub.f32 %v5496_v28, %v557_v43  ;;  %v1188_v28 = vpack.c.bf16 %v1162_v22, %v1161_v15  ;;  %v895_v14 = vsub.f32 1.5, %v894_v61  ;;  %v5810_v51 = vadd.f32 %v5574_v37, %v1286_v29  ;;  %v4334_v43 = vld [vmem:[#allocation11 + $0x50] sm:$0xf] }
 0x1fd   : > { %v1072_v21 = vmul.f32 %v5766_v52, %v5710_v41  ;;  %v5782_v25 = vpop.eup %4565  ;;  %v1050_v15 = vsel %vm5790_vm8, %v5677_v39, %v1046_v26  ;;  %v1060_v29 = vsel %vm5802_vm9, %v5662_v18, %v1056_v7  ;;  %v5833_v0 = vadd.f32 %v5386_v46, %v1128_v24 }
 0x1fe   : > { %8680 = vst [vmem:[#allocation23_spill] sm:$0xff] %v5787_v17  ;;  %v1062_v60 = vmul.f32 %v5782_v25, %v5743_v40  ;;  %1300 = vmatmul.bf16.gmra.mxu0 %v1188_v28  ;;  %v621_v2 = vmul.f32 %v5787_v17, %v5787_v17  ;;  %v1110_v39 = vmul.f32 %v1060_v29, %v5426_v13  ;;  %v5830_v26 = vmul.f32 0.70710677, %v5810_v51  ;;  %v5886_v28 = vld [vmem:[#allocation5] ss:$0 sm:$0xff] }
 0x1ff   : > { %v1073_v31 = vmul.f32 %v5766_v52, %v1072_v21  ;;  %v1109_v21 = vmul.f32 %v1050_v15, %v5441_v63  ;;  %v896_v22 = vmul.f32 %v5712_v38, %v895_v14  ;;  %v4381_v63 = vld [vmem:[#allocation11 + $0x54] sm:$0xf]  ;;  %v1428_v13 = vmul.f32 %v1427_v48, %v5656_v4  ;;  %v4380_v48 = vld [vmem:[#allocation11 + $0x44] sm:$0xf0]  ;;  %v4379_v15 = vld [vmem:[#allocation11 + $0x44] sm:$0xf] }
 0x200   : > { %v1063_v47 = vmul.f32 %v5782_v25, %v1062_v60  ;;  %673 = vadd.xlane.f32.xlu0 %v621_v2  ;;  %v1145_v7 = vmul.f32 %v5378_v33, %v1110_v39  ;;  %v4335_v60 = vor.u32 %v4382_v1, %v4334_v43  ;;  %v1465_v54 = vadd.f32 0.0036580483, %v1464_v53  ;;  %v4328_v43 = vld [vmem:[#allocation11 + $0x48] sm:$0xf0] }
 0x201   : > { %v1074_v34 = vmul.f32 0.5, %v1073_v31  ;;  %v1144_v18 = vmul.f32 %v5378_v33, %v1109_v21  ;;  %v1503_v24 = vadd.f32 0.00028619796, %v1502_v55  ;;  %v1542_v33 = vmul.f32 2.1237322e-06, %v5820_v8 }
 0x202   : > { %v1064_v61 = vmul.f32 0.5, %v1063_v47  ;;  %v1180_v47 = vadd.f32 %v5386_v46, %v1145_v7  ;;  %2884 = vmatpush.bf16.msra.mxu1 %v4335_v60  ;;  %4399 = vmatpush.bf16.msrb.mxu3 %v4335_v60  ;;  %vm1068_vm15 = vweird.f32 %v5782_v25  ;;  %v1580_v23 = vmul.f32 %v5830_v26, %v5830_v26 }
 0x203   : > { %v1288_v30 = vpop.f32.mrf.mxu0  ;;  %v1179_v31 = vadd.f32 %v5386_v46, %v1144_v18  ;;  %v1075_v2 = vsub.f32 1.5, %v1074_v34  ;;  %v5860_v29 = vor.u32 %v4381_v63, %v4336_v36  ;;  %v900_v46 = vsel %vm5845_vm12, %v5712_v38, %v896_v22  ;;  %v4318_v34 = vld [vmem:[#allocation11 + $0x30] sm:$0xf]  ;;  %v4378_v18 = vld [vmem:[#allocation11 + $0x34] sm:$0xf0]  ;;  %vm5880_vm1 = vmor %vm1067_vm14, %vm1068_vm15 }
 0x204   : > { %v5838_v11 = vadd.f32 %v5574_v37, %v1288_v30  ;;  %v1065_v14 = vsub.f32 1.5, %v1064_v61  ;;  %v4326_v30 = vld [vmem:[#allocation11 + $0x40] sm:$0xf]  ;;  %v1504_v61 = vmul.f32 %v1503_v24, %v5794_v27  ;;  %vm1078_vm0 = vweird.f32 %v5766_v52 }
 0x205   : > { %v1197_v53 = vpack.c.bf16 %v1180_v47, %v1179_v31  ;;  %v1543_v21 = vadd.f32 0.00028619796, %v1542_v33  ;;  %v1094_v39 = vmul.f32 %v900_v46, %v5452_v5  ;;  %2973 = vmatpush.bf16.msra.mxu2 %v5860_v29  ;;  %v4327_v60 = vor.u32 %v4380_v48, %v4326_v30  ;;  %v4377_v33 = vld [vmem:[#allocation11 + $0x34] sm:$0xf]  ;;  %vm5897_vm2 = vmor %vm1077_vm13, %vm1078_vm0  ;;  %v4376_v46 = vld [vmem:[#allocation11 + $0x24] sm:$0xf0] }
 0x206   : > { %v5858_v55 = vmul.f32 0.70710677, %v5838_v11  ;;  %v1066_v7 = vmul.f32 %v5782_v25, %v1065_v14  ;;  %v5870_v63 = vor.u32 %v4379_v15, %v4328_v43  ;;  %v5873_v38 = vmul.f32 0.5, %v5597_v10  ;;  %v4320_v14 = vld [vmem:[#allocation11 + $0x38] sm:$0xf0]  ;;  %v664_v15 = vpop.xlane.xlu0 %663 }
 0x207   : > { %1345 = vmatmul.bf16.gmra.mxu3 %v1197_v53  ;;  %v1076_v22 = vmul.f32 %v5766_v52, %v1075_v2  ;;  %v5884_v36 = vmin.f32 %v1580_v23, 16.0  ;;  %v1129_v24 = vmul.f32 %v5886_v28, %v1094_v39  ;;  %v5890_v10 = vmul.f32 0.5, %v5673_v19  ;;  %2885 = vmatpush.bf16.msra.mxu1 %v4327_v60  ;;  %v5907_v2 = vld [vmem:[#allocation7] ss:$0 sm:$0xff]  ;;  %v4375_v39 = vld [vmem:[#allocation11 + $0x24] sm:$0xf] }
 0x208   : > { %v1466_v31 = vmul.f32 %v1465_v54, %v5741_v35  ;;  %v1620_v47 = vmul.f32 %v5858_v55, %v5858_v55  ;;  %v4319_v30 = vor.u32 %v4378_v18, %v4318_v34  ;;  %4400 = vmatpush.bf16.msrb.mxu3 %v4327_v60  ;;  %v5904_v48 = vmul.f32 0.5, %v5716_v50  ;;  %v4310_v50 = vld [vmem:[#allocation11 + $0x20] sm:$0xf]  ;;  %v4312_v34 = vld [vmem:[#allocation11 + $0x28] sm:$0xf0] }
 0x209   : > { %v1505_v19 = vadd.f32 0.0036580483, %v1504_v61  ;;  %v1544_v54 = vmul.f32 %v1543_v21, %v5820_v8  ;;  %v1164_v41 = vadd.f32 %v5907_v2, %v1129_v24  ;;  %v5910_v23 = vadd.f32 0.18741608, %v1428_v13  ;;  %2974 = vmatpush.bf16.msra.mxu2 %v5870_v63 }
 0x20a   : > { %v5913_v43 = vor.u32 %v4377_v33, %v4320_v14  ;;  %v1070_v53 = vsel %vm5880_vm1, %v5782_v25, %v1066_v7  ;;  %v1582_v61 = vmul.f32 2.1237322e-06, %v5884_v36  ;;  %v1080_v13 = vsel %vm5897_vm2, %v5766_v52, %v1076_v22  ;;  %v4302_v14 = vld [vmem:[#allocation11 + $0x10] sm:$0xf]  ;;  %v4374_v52 = vld [vmem:[#allocation11 + $0x14] sm:$0xf0] }
 0x20b   : > { %v1291_v1 = vpop.f32.mrf.mxu0  ;;  %v1189_v21 = vpack.c.bf16 %v1164_v41, %v5833_v0  ;;  %v1467_v18 = vadd.f32 0.05243302, %v1466_v31  ;;  %v5923_v60 = vmin.f32 %v1620_v47, 16.0  ;;  %2886 = vmatpush.bf16.msra.mxu1 %v4319_v30  ;;  %v1111_v24 = vmul.f32 %v1070_v53, %v5470_v12  ;;  %v4373_v47 = vld [vmem:[#allocation11 + $0x14] sm:$0xf] }
 0x20c   : > { %v1112_v25 = vmul.f32 %v1080_v13, %v5475_v58  ;;  %4401 = vmatpush.bf16.msrb.mxu3 %v4319_v30  ;;  %v1506_v7 = vmul.f32 %v1505_v19, %v5794_v27  ;;  %v1545_v5 = vadd.f32 0.0036580483, %v1544_v54  ;;  %v712_v0 = vmul.f32 %v664_v15, %v5234_v20  ;;  %v4304_v19 = vld [vmem:[#allocation11 + $0x18] sm:$0xf0]  ;;  %v4372_v13 = vld [vmem:[#allocation11 + $0x4] sm:$0xf0] }
 0x20d   : > { %v4311_v33 = vor.u32 %v4376_v46, %v4310_v50  ;;  %v5930_v22 = vadd.f32 %v5574_v37, %v1291_v1  ;;  %2975 = vmatpush.bf16.msra.mxu2 %v5913_v43  ;;  %v1146_v31 = vmul.f32 %v5886_v28, %v1111_v24  ;;  %v5935_v58 = vor.u32 %v4375_v39, %v4312_v34 }
 0x20e   : > { %1305 = vmatmul.bf16.gmra.mxu0 %v1189_v21  ;;  %v1147_v12 = vmul.f32 %v5886_v28, %v1112_v25  ;;  %v1583_v30 = vadd.f32 0.00028619796, %v1582_v61  ;;  %v1433_v54 = vmul.f32 3.8918573e-05, %v5656_v4  ;;  %v1622_v41 = vmul.f32 2.1237322e-06, %v5923_v60 }
 0x20f   : > { %v1181_v15 = vadd.f32 %v5907_v2, %v1146_v31  ;;  %2887 = vmatpush.bf16.msra.mxu1 %v4311_v33  ;;  %v4303_v53 = vor.u32 %v4374_v52, %v4302_v14  ;;  %v1546_v50 = vmul.f32 %v1545_v5, %v5820_v8  ;;  %v5942_v46 = vadd.f32 1e-05, %v712_v0  ;;  %v4294_v61 = vld [vmem:[#allocation11] sm:$0xf]  ;;  %v4371_v0 = vld [vmem:[#allocation11 + $0x4] sm:$0xf] }
 0x210   : > { %v1182_v1 = vadd.f32 %v5907_v2, %v1147_v12  ;;  %4402 = vmatpush.bf16.msrb.mxu3 %v4311_v33  ;;  %v1507_v39 = vadd.f32 0.05243302, %v1506_v7  ;;  %v5948_v34 = vmul.f32 0.70710677, %v5930_v22  ;;  %v5951_v25 = vor.u32 %v4373_v47, %v4304_v19  ;;  %v4296_v14 = vld [vmem:[#allocation11 + $0x8] sm:$0xf0] }
 0x211   : > { %2976 = vmatpush.bf16.msra.mxu2 %v5935_v58  ;;  %v1468_v33 = vmul.f32 %v1467_v18, %v5741_v35  ;;  %v1584_v5 = vmul.f32 %v1583_v30, %v5884_v36  ;;  %v1434_v52 = vadd.f32 0.001143296, %v1433_v54  ;;  %v4295_v31 = vor.u32 %v4372_v13, %v4294_v61 }
 0x212   : > { %v1198_v24 = vpack.c.bf16 %v1182_v1, %v1181_v15  ;;  %v1473_v7 = vmul.f32 3.8918573e-05, %v5741_v35  ;;  %v1513_v12 = vmul.f32 3.8918573e-05, %v5794_v27  ;;  %4567 = vrsqrt.f32 %v5942_v46 }
 0x213   : > { %v1293_v40 = vpop.f32.mrf.mxu0  ;;  %2888 = vmatpush.bf16.msra.mxu1 %v4303_v53  ;;  %v1435_v18 = vmul.f32 %v1434_v52, %v5656_v4  ;;  %v1660_v30 = vmul.f32 %v5948_v34, %v5948_v34  ;;  %v5965_v19 = vor.u32 %v4371_v0, %v4296_v14  ;;  %v5969_v15 = vmul.f32 %v5910_v23, %v5656_v4 }
 0x214   : > { %v5945_v21 = vadd.f32 %v5574_v37, %v1293_v40  ;;  %v1623_v37 = vadd.f32 0.00028619796, %v1622_v41  ;;  %4403 = vmatpush.bf16.msrb.mxu3 %v4303_v53  ;;  %v1547_v40 = vadd.f32 0.05243302, %v1546_v50  ;;  %v1474_v54 = vadd.f32 0.001143296, %v1473_v7 }
 0x215   : > { %2977 = vmatpush.bf16.msra.mxu2 %v5951_v25  ;;  %v1514_v41 = vadd.f32 0.001143296, %v1513_v12  ;;  %v1469_v1 = vadd.f32 0.18741608, %v1468_v33  ;;  %v1508_v53 = vmul.f32 %v1507_v39, %v5794_v27  ;;  %v1585_v50 = vadd.f32 0.0036580483, %v1584_v5 }
 0x216   : > { %v5959_v47 = vmul.f32 0.70710677, %v5945_v21  ;;  %v1624_v61 = vmul.f32 %v1623_v37, %v5923_v60  ;;  %v1436_v13 = vadd.f32 0.014752088, %v1435_v18  ;;  %v1548_v0 = vmul.f32 %v1547_v40, %v5820_v8 }
 0x217   : > { %1350 = vmatmul.bf16.gmra.mxu3 %v1198_v24  ;;  %2889 = vmatpush.bf16.msra.mxu1 %v4295_v31  ;;  %v1475_v24 = vmul.f32 %v1474_v54, %v5741_v35  ;;  %v1515_v52 = vmul.f32 %v1514_v41, %v5794_v27  ;;  %v1553_v23 = vmul.f32 3.8918573e-05, %v5820_v8  ;;  %v1593_v33 = vmul.f32 3.8918573e-05, %v5884_v36 }
 0x218   : > { %4404 = vmatpush.bf16.msrb.mxu3 %v4295_v31  ;;  %v1700_v14 = vmul.f32 %v5959_v47, %v5959_v47  ;;  %v5981_v39 = vmin.f32 %v1660_v30, 16.0  ;;  %v1437_v5 = vmul.f32 %v1436_v13, %v5656_v4  ;;  %v5985_v31 = vpop.eup %4567  ;;  %v1509_v12 = vadd.f32 0.18741608, %v1508_v53 }
 0x219   : > { %2978 = vmatpush.bf16.msra.mxu2 %v5965_v19  ;;  %v1476_v37 = vadd.f32 0.014752088, %v1475_v24  ;;  %v1516_v7 = vadd.f32 0.014752088, %v1515_v52  ;;  %v1586_v40 = vmul.f32 %v1585_v50, %v5884_v36  ;;  %v1554_v18 = vadd.f32 0.001143296, %v1553_v23 }
 0x21a   : > { %v1594_v54 = vadd.f32 0.001143296, %v1593_v33  ;;  %v1625_v41 = vadd.f32 0.0036580483, %v1624_v61  ;;  %v1438_v17 = vadd.f32 0.112945676, %v1437_v5  ;;  %v1470_v30 = vmul.f32 %v1469_v1, %v5741_v35 }
 0x21b   : > { %v1477_v49 = vmul.f32 %v1476_v37, %v5741_v35  ;;  %v5991_v9 = vmin.f32 %v1700_v14, 16.0  ;;  %v1555_v13 = vmul.f32 %v1554_v18, %v5820_v8  ;;  %v1549_v53 = vadd.f32 0.18741608, %v1548_v0 }
 0x21c   : > { %4405 = vmatpush.bf16.msra.mxu3 %v5653_v56  ;;  %v1517_v56 = vmul.f32 %v1516_v7, %v5794_v27  ;;  %v1595_v24 = vmul.f32 %v1594_v54, %v5884_v36  ;;  %v912_v50 = vmul.f32 %v5985_v31, %v5942_v46  ;;  %v1662_v61 = vmul.f32 2.1237322e-06, %v5981_v39 }
 0x21d   : > { %v1439_v52 = vmul.f32 %v1438_v17, %v5656_v4  ;;  %v1510_v23 = vmul.f32 %v1509_v12, %v5794_v27  ;;  %v1478_v33 = vadd.f32 0.112945676, %v1477_v49  ;;  %v1556_v14 = vadd.f32 0.014752088, %v1555_v13 }
 0x21e   : > { %v1518_v1 = vadd.f32 0.112945676, %v1517_v56  ;;  %v1587_v5 = vadd.f32 0.05243302, %v1586_v40  ;;  %v1626_v37 = vmul.f32 %v1625_v41, %v5923_v60  ;;  %v1596_v18 = vadd.f32 0.014752088, %v1595_v24 }
 0x21f   : > { %v1440_v7 = vadd.f32 0.4994258, %v1439_v52  ;;  %v1479_v0 = vmul.f32 %v1478_v33, %v5741_v35  ;;  %v1557_v32 = vmul.f32 %v1556_v14, %v5820_v8  ;;  %v913_v17 = vmul.f32 %v5985_v31, %v912_v50 }
 0x220   : > { %4406 = vmatpush.bf16.msra.mxu3 %v5754_v44  ;;  %v1702_v44 = vmul.f32 2.1237322e-06, %v5991_v9  ;;  %v1519_v54 = vmul.f32 %v1518_v1, %v5794_v27  ;;  %v1663_v49 = vadd.f32 0.00028619796, %v1662_v61  ;;  %v1597_v40 = vmul.f32 %v1596_v18, %v5884_v36 }
 0x221   : > { %v1441_v12 = vmul.f32 %v1440_v7, %v5656_v4  ;;  %v1550_v41 = vmul.f32 %v1549_v53, %v5820_v8  ;;  %v1480_v56 = vadd.f32 0.4994258, %v1479_v0  ;;  %v1558_v24 = vadd.f32 0.112945676, %v1557_v32 }
 0x222   : > { %v1520_v13 = vadd.f32 0.4994258, %v1519_v54  ;;  %v1588_v52 = vmul.f32 %v1587_v5, %v5884_v36  ;;  %v1627_v33 = vadd.f32 0.05243302, %v1626_v37  ;;  %v1598_v14 = vadd.f32 0.112945676, %v1597_v40 }
 0x223   : > { %v6012_v1 = vadd.f32 1.0, %v1441_v12  ;;  %v1703_v59 = vadd.f32 0.00028619796, %v1702_v44  ;;  %v1559_v4 = vmul.f32 %v1558_v24, %v5820_v8  ;;  %v1431_v53 = vadd.f32 1.1283791, %v5969_v15 }
 0x224   : > { %4407 = vmatpush.bf16.msra.mxu3 %v5860_v29  ;;  %v1481_v29 = vmul.f32 %v1480_v56, %v5741_v35  ;;  %v1521_v50 = vmul.f32 %v1520_v13, %v5794_v27  ;;  %v1471_v61 = vadd.f32 1.1283791, %v1470_v30  ;;  %v1511_v7 = vadd.f32 1.1283791, %v1510_v23 }
 0x225   : > { %4569 = vrcp.f32 %v6012_v1  ;;  %v1551_v32 = vadd.f32 1.1283791, %v1550_v41  ;;  %v6020_v5 = vmul.f32 0.5, %v913_v17  ;;  %v1589_v35 = vadd.f32 0.18741608, %v1588_v52 }
 0x226   : > { %v6022_v37 = vadd.f32 1.0, %v1481_v29  ;;  %v6024_v18 = vadd.f32 1.0, %v1521_v50  ;;  %v1560_v44 = vadd.f32 0.4994258, %v1559_v4  ;;  %v1599_v27 = vmul.f32 %v1598_v14, %v5884_v36 }
 0x227   : > { %v1633_v0 = vmul.f32 3.8918573e-05, %v5923_v60  ;;  %v1664_v15 = vmul.f32 %v1663_v49, %v5981_v39  ;;  %v1704_v30 = vmul.f32 %v1703_v59, %v5991_v9  ;;  %v1432_v23 = vmul.f32 %v1431_v53, %v5608_v6 }
 0x228   : > { %4408 = vmatpush.bf16.msra.mxu3 %v5870_v63  ;;  %v1628_v63 = vmul.f32 %v1627_v33, %v5923_v60  ;;  %4571 = vrcp.f32 %v6022_v37  ;;  %v6035_v54 = vmul.f32 %v1471_v61, %v5695_v62  ;;  %v6038_v17 = vmul.f32 %v1511_v7, %v5746_v45 }
 0x229   : > { %4573 = vrcp.f32 %v6024_v18  ;;  %v915_v12 = vsub.f32 1.5, %v6020_v5  ;;  %v1452_v49 = vand.u32 2147483647, %v6012_v1  ;;  %v1454_v59 = vand.u32 2147483648, %v6012_v1 }
 0x22a   : > { %v1561_v40 = vmul.f32 %v1560_v44, %v5820_v8  ;;  %v6049_v6 = vmul.f32 %v1589_v35, %v5884_v36  ;;  %v1600_v62 = vadd.f32 0.4994258, %v1599_v27  ;;  %v1634_v45 = vadd.f32 0.001143296, %v1633_v0 }
 0x22b   : > { %v4570_v41 = vpop.eup %4569  ;;  %v6051_v56 = vadd.f32 0.18741608, %v1628_v63  ;;  %v6053_v13 = vadd.f32 0.0036580483, %v1664_v15  ;;  %v6055_v24 = vadd.f32 0.0036580483, %v1704_v30  ;;  %vm1448_vm3 = vweird.f32 %v6012_v1 }
 0x22c   : > { %4409 = vmatpush.bf16.msra.mxu3 %v5913_v43  ;;  %v6046_v43 = vmul.f32 %v1551_v32, %v5771_v3  ;;  %v1444_v52 = vmul.f32 %v4570_v41, %v6012_v1  ;;  %v6060_v8 = vadd.f32 1.0, %v1561_v40  ;;  %v1601_v3 = vmul.f32 %v1600_v62, %v5884_v36 }
 0x22d   : > { %v1635_v33 = vmul.f32 %v1634_v45, %v5923_v60  ;;  %vm6064_vm4 = vcmp.eq.f32.partialorder %v1452_v49, 8.507059e+37  ;;  %v1455_v4 = vor.u32 1.1754944e-38, %v1454_v59  ;;  %v1673_v53 = vmul.f32 3.8918573e-05, %v5981_v39 }
 0x22e   : > { %v4572_v14 = vpop.eup %4571  ;;  %v1445_v29 = vsub.f32 1.0, %v1444_v52  ;;  %vm1488_vm5 = vweird.f32 %v6022_v37  ;;  %v1492_v7 = vand.u32 2147483647, %v6022_v37  ;;  %4575 = vrcp.f32 %v6060_v8 }
 0x22f   : > { %v6069_v61 = vpop.eup %4573  ;;  %vm1449_vm6 = vweird.f32 %v4570_v41  ;;  %v1494_v32 = vand.u32 2147483648, %v6022_v37  ;;  %v1532_v27 = vand.u32 2147483647, %v6024_v18  ;;  %v6080_v0 = vadd.f32 1.0, %v1601_v3 }
 0x230   : > { %4410 = vmatpush.bf16.msra.mxu3 %v5935_v58  ;;  %v1484_v58 = vmul.f32 %v4572_v14, %v6022_v37  ;;  %v1446_v36 = vmul.f32 %v4570_v41, %v1445_v29  ;;  %v1524_v35 = vmul.f32 %v6069_v61, %v6024_v18  ;;  %v1636_v63 = vadd.f32 0.014752088, %v1635_v33  ;;  %vm1450_vm7 = vmor %vm1448_vm3, %vm1449_vm6 }
 0x231   : > { %v1534_v49 = vand.u32 2147483648, %v6024_v18  ;;  %v1674_v59 = vadd.f32 0.001143296, %v1673_v53  ;;  %vm1489_vm8 = vweird.f32 %v4572_v14  ;;  %vm1528_vm9 = vweird.f32 %v6024_v18 }
 0x232   : > { %v1485_v44 = vsub.f32 1.0, %v1484_v58  ;;  %v1447_v15 = vadd.f32 %v4570_v41, %v1446_v36  ;;  %v1525_v30 = vsub.f32 1.0, %v1524_v35  ;;  %4577 = vrcp.f32 %v6080_v0  ;;  %vm1490_vm12 = vmor %vm1488_vm5, %vm1489_vm8 }
 0x233   : > { %vm6087_vm10 = vcmp.eq.f32.partialorder %v1492_v7, 8.507059e+37  ;;  %v1495_v45 = vor.u32 1.1754944e-38, %v1494_v32  ;;  %vm6095_vm11 = vcmp.eq.f32.partialorder %v1532_v27, 8.507059e+37  ;;  %v1675_v53 = vmul.f32 %v1674_v59, %v5981_v39 }
 0x234   : > { %4411 = vmatpush.bf16.msra.mxu3 %v5951_v25  ;;  %v1486_v40 = vmul.f32 %v4572_v14, %v1485_v44  ;;  %v1451_v25 = vsel %vm1450_vm7, %v4570_v41, %v1447_v15  ;;  %v1526_v52 = vmul.f32 %v6069_v61, %v1525_v30  ;;  %v4576_v3 = vpop.eup %4575  ;;  %v1637_v41 = vmul.f32 %v1636_v63, %v5923_v60 }
 0x235   : > { %v1456_v1 = vsel %vm6064_vm4, %v1455_v4, %v1451_v25  ;;  %v1535_v7 = vor.u32 1.1754944e-38, %v1534_v49  ;;  %v1713_v50 = vmul.f32 3.8918573e-05, %v5991_v9  ;;  %vm1529_vm13 = vweird.f32 %v6069_v61 }
 0x236   : > { %v1487_v33 = vadd.f32 %v4572_v14, %v1486_v40  ;;  %v1457_v58 = vmul.f32 %v1456_v1, %v1432_v23  ;;  %v1527_v36 = vadd.f32 %v6069_v61, %v1526_v52  ;;  %v1638_v32 = vadd.f32 0.112945676, %v1637_v41  ;;  %vm6118_vm14 = vmor %vm1528_vm9, %vm1529_vm13 }
 0x237   : > { %v1574_v27 = vand.u32 2147483648, %v6060_v8  ;;  %v1572_v15 = vand.u32 2147483647, %v6060_v8  ;;  %v1676_v30 = vadd.f32 0.014752088, %v1675_v53  ;;  %vm1569_vm15 = vweird.f32 %v4576_v3 }
 0x238   : > { %4412 = vmatpush.bf16.msra.mxu3 %v5965_v19  ;;  %v1564_v19 = vmul.f32 %v4576_v3, %v6060_v8  ;;  %v1491_v4 = vsel %vm1490_vm12, %v4572_v14, %v1487_v33  ;;  %v4260_v35 = vclamps-f32 %v1457_v58, 1.0  ;;  %v6111_v37 = vpop.eup %4577  ;;  %v1639_v14 = vmul.f32 %v1638_v32, %v5923_v60 }
 0x239   : > { %v1496_v44 = vsel %vm6087_vm10, %v1495_v45, %v1491_v4  ;;  %v1604_v25 = vmul.f32 %v6111_v37, %v6080_v0  ;;  %v1677_v52 = vmul.f32 %v1676_v30, %v5981_v39  ;;  %vm1568_vm0 = vweird.f32 %v6060_v8 }
 0x23a   : > { %v1565_v23 = vsub.f32 1.0, %v1564_v19  ;;  %v1497_v63 = vmul.f32 %v1496_v44, %v6035_v54  ;;  %v2700_v49 = vadd.f32 1.0, %v4260_v35  ;;  %v1531_v54 = vsel %vm6118_vm14, %v6069_v61, %v1527_v36  ;;  %vm1570_vm1 = vmor %vm1568_vm0, %vm1569_vm15  ;;  %v668_v36 = vpop.xlane.xlu1 %667 }
 0x23b   : > { %v1640_v45 = vadd.f32 0.4994258, %v1639_v14  ;;  %v1575_v18 = vor.u32 1.1754944e-38, %v1574_v27  ;;  %v1605_v33 = vsub.f32 1.0, %v1604_v25  ;;  %v1678_v58 = vadd.f32 0.112945676, %v1677_v52 }
 0x23c   : > { %v1566_v40 = vmul.f32 %v4576_v3, %v1565_v23  ;;  %v4261_v62 = vclamps-f32 %v1497_v63, 1.0  ;;  %v1714_v19 = vadd.f32 0.001143296, %v1713_v50  ;;  %v2732_v4 = vmul.f32 %v2700_v49, %v5873_v38 }
 0x23d   : > { %v1641_v53 = vmul.f32 %v1640_v45, %v5923_v60  ;;  %v1536_v32 = vsel %vm6095_vm11, %v1535_v7, %v1531_v54  ;;  %vm1573_vm2 = vcmp.eq.f32.partialorder %v1572_v15, 8.507059e+37  ;;  %v1679_v23 = vmul.f32 %v1678_v58, %v5981_v39 }
 0x23e   : > { %v1567_v1 = vadd.f32 %v4576_v3, %v1566_v40  ;;  %v2701_v41 = vadd.f32 1.0, %v4261_v62  ;;  %v1666_v27 = vmul.f32 %v6053_v13, %v5981_v39  ;;  %v1606_v38 = vmul.f32 %v6111_v37, %v1605_v33 }
 0x23f   : > { %v6134_v8 = vadd.f32 1.0, %v1641_v53  ;;  %v1715_v29 = vmul.f32 %v1714_v19, %v5991_v9  ;;  %v1537_v63 = vmul.f32 %v1536_v32, %v6038_v17  ;;  %v1706_v13 = vmul.f32 %v6055_v24, %v5991_v9 }
 0x240   : > { %v1571_v61 = vsel %vm1570_vm1, %v4576_v3, %v1567_v1  ;;  %v2733_v35 = vmul.f32 %v2701_v41, %v5890_v10  ;;  %v1359_v3 = vmul.f32 0.5, %v5749_v42  ;;  %v6148_v10 = vmul.f32 %v5985_v31, %v915_v12 }
 0x241   : > { %v1576_v44 = vsel %vm1573_vm2, %v1575_v18, %v1571_v61  ;;  %4579 = vrcp.f32 %v6134_v8  ;;  %v1680_v15 = vadd.f32 0.4994258, %v1679_v23  ;;  %vm917_vm3 = vweird.f32 %v5942_v46 }
 0x242   : > { %v1577_v50 = vmul.f32 %v1576_v44, %v6046_v43  ;;  %v2764_v7 = vpack.c.bf16 %v2733_v35, %v2732_v4  ;;  %v714_v43 = vmul.f32 %v668_v36, %v5234_v20  ;;  %vm918_vm4 = vweird.f32 %v5985_v31 }
 0x243   : > { %v1591_v42 = vadd.f32 1.1283791, %v6049_v6  ;;  %v1630_v17 = vmul.f32 %v6051_v56, %v5923_v60  ;;  %v662_v12 = vpop.xlane.xlu2 %661  ;;  %v1716_v14 = vadd.f32 0.014752088, %v1715_v29  ;;  %v1667_v30 = vadd.f32 0.05243302, %v1666_v27  ;;  %vm6196_vm10 = vmor %vm917_vm3, %vm918_vm4 }
 0x244   : > { %2890 = vmatmul.bf16.vlgmr.msra.gmra.mxu1 %v2764_v7  ;;  %2979 = vmatmul.bf16.vlgmr.msra.gmra.mxu2 %v2764_v7  ;;  %v4263_v5 = vclamps-f32 %v1577_v50, 1.0  ;;  %v1607_v24 = vadd.f32 %v6111_v37, %v1606_v38  ;;  %vm1609_vm5 = vweird.f32 %v6111_v37  ;;  %v711_v49 = vmul.f32 %v662_v12, %v5234_v20 }
 0x245   : > { %v4262_v59 = vclamps-f32 %v1537_v63, 1.0  ;;  %v1614_v40 = vand.u32 2147483648, %v6080_v0  ;;  %v1681_v6 = vmul.f32 %v1680_v15, %v5981_v39  ;;  %v1717_v25 = vmul.f32 %v1716_v14, %v5991_v9 }
 0x246   : > { %v1707_v60 = vadd.f32 0.05243302, %v1706_v13  ;;  %vm1608_vm6 = vweird.f32 %v6080_v0  ;;  %v1612_v56 = vand.u32 2147483647, %v6080_v0  ;;  %v6166_v62 = vadd.f32 1e-05, %v711_v49 }
 0x247   : > { %v4580_v54 = vpop.eup %4579  ;;  %v6168_v45 = vadd.f32 1e-05, %v714_v43  ;;  %v2703_v52 = vadd.f32 1.0, %v4263_v5  ;;  %vm6170_vm7 = vmor %vm1608_vm6, %vm1609_vm5  ;;  %v6174_v18 = vadd.f32 1.0, %v1681_v6  ;;  %v1718_v33 = vadd.f32 0.112945676, %v1717_v25 }
 0x248   : > { %v1592_v41 = vmul.f32 %v1591_v42, %v5830_v26  ;;  %v1631_v53 = vadd.f32 1.1283791, %v1630_v17  ;;  %v1611_v0 = vsel %vm6170_vm7, %v6111_v37, %v1607_v24  ;;  %v1644_v58 = vmul.f32 %v4580_v54, %v6134_v8 }
 0x249   : > { %v1668_v19 = vmul.f32 %v1667_v30, %v5981_v39  ;;  %v2702_v4 = vadd.f32 1.0, %v4262_v59  ;;  %v1615_v32 = vor.u32 1.1754944e-38, %v1614_v40  ;;  %4581 = vrsqrt.f32 %v6166_v62  ;;  %v4719_v30 = vld [vmem:[%s5178_s27 + $0xa8] sm:$0xff] }
 0x24a   : > { %v1708_v61 = vmul.f32 %v1707_v60, %v5991_v9  ;;  %vm1613_vm8 = vcmp.eq.f32.partialorder %v1612_v56, 8.507059e+37  ;;  %v1645_v36 = vsub.f32 1.0, %v1644_v58  ;;  %4583 = vrcp.f32 %v6174_v18 }
 0x24b   : > { %v2735_v26 = vmul.f32 %v2703_v52, %v1359_v3  ;;  %v1616_v35 = vsel %vm1613_vm8, %v1615_v32, %v1611_v0  ;;  %v1654_v44 = vand.u32 2147483648, %v6134_v8  ;;  %v509_v23 = vpop.xlane.xlu2 %508  ;;  %v1719_v37 = vmul.f32 %v1718_v33, %v5991_v9 }
 0x24c   : > { %v1646_v27 = vmul.f32 %v4580_v54, %v1645_v36  ;;  %vm1649_vm9 = vweird.f32 %v4580_v54  ;;  %v1652_v50 = vand.u32 2147483647, %v6134_v8  ;;  %v558_v38 = vmul.f32 %v5234_v20, %v509_v23 }
 0x24d   : > { %v1632_v29 = vmul.f32 %v1631_v53, %v5858_v55  ;;  %4585 = vrsqrt.f32 %v6168_v45  ;;  %v2734_v7 = vmul.f32 %v2702_v4, %v5904_v48  ;;  %v1720_v63 = vadd.f32 0.4994258, %v1719_v37 }
 0x24e   : > { %v1669_v13 = vadd.f32 0.18741608, %v1668_v19  ;;  %v1617_v43 = vmul.f32 %v1616_v35, %v1592_v41  ;;  %v1647_v15 = vadd.f32 %v4580_v54, %v1646_v27  ;;  %vm1648_vm11 = vweird.f32 %v6134_v8 }
 0x24f   : > { %v6201_v55 = vpop.eup %4581  ;;  %v1709_v42 = vadd.f32 0.18741608, %v1708_v61  ;;  %v2765_v17 = vpack.c.bf16 %v2735_v26, %v2734_v7  ;;  %vm1650_vm12 = vmor %vm1648_vm11, %vm1649_vm9  ;;  %v1655_v48 = vor.u32 1.1754944e-38, %v1654_v44  ;;  %v1721_v5 = vmul.f32 %v1720_v63, %v5991_v9  ;;  %v4720_v26 = vld [vmem:[%s5178_s27 + $0xb0] sm:$0xff] }
 0x250   : > { %v6205_v46 = vpop.eup %4583  ;;  %v1651_v12 = vsel %vm1650_vm12, %v4580_v54, %v1647_v15  ;;  %vm1653_vm13 = vcmp.eq.f32.partialorder %v1652_v50, 8.507059e+37  ;;  %v902_v14 = vmul.f32 %v6201_v55, %v6166_v62  ;;  %v6210_v24 = vsub.f32 %v4719_v30, %v558_v38 }
 0x251   : > { %v1360_v8 = vmul.f32 0.5, %v5810_v51  ;;  %v1656_v49 = vsel %vm1653_vm13, %v1655_v48, %v1651_v12  ;;  %v1684_v59 = vmul.f32 %v6205_v46, %v6174_v18  ;;  %v6215_v40 = vadd.f32 1.0, %v1721_v5 }
 0x252   : > { %8703 = vst [vmem:[#allocation24_spill] sm:$0xff] %v6210_v24  ;;  %v4264_v6 = vclamps-f32 %v1617_v43, 1.0  ;;  %v1657_v25 = vmul.f32 %v1656_v49, %v1632_v29  ;;  %v903_v60 = vmul.f32 %v6201_v55, %v902_v14  ;;  %v920_v56 = vsel %vm6196_vm10, %v5985_v31, %v6148_v10 }
 0x253   : > { %v6222_v54 = vpop.eup %4585  ;;  %v1361_v52 = vmul.f32 0.5, %v5838_v11  ;;  %v1670_v51 = vmul.f32 %v1669_v13, %v5981_v39  ;;  %v1685_v1 = vsub.f32 1.0, %v1684_v59  ;;  %4587 = vrcp.f32 %v6215_v40  ;;  %v511_v33 = vpop.xlane.xlu2 %510  ;;  %v4721_v59 = vld [vmem:[%s5178_s27 + $0xb8] sm:$0xff]  ;;  %s4072_s27 = scalar_lea.sflag [#allocation4], %s5174_s26 }
 0x254   : > { %2895 = vmatmul.bf16.gmra.mxu1 %v2765_v17  ;;  %2984 = vmatmul.bf16.gmra.mxu2 %v2765_v17  ;;  %v666_v41 = vpop.xlane.xlu0 %665  ;;  %v1710_v53 = vmul.f32 %v1709_v42, %v5991_v9  ;;  %v4265_v0 = vclamps-f32 %v1657_v25, 1.0  ;;  %v904_v58 = vmul.f32 0.5, %v903_v60  ;;  %v622_v31 = vmul.f32 %v6210_v24, %v6210_v24 }
 0x255   : > { %v1686_v10 = vmul.f32 %v6205_v46, %v1685_v1  ;;  %v559_v11 = vmul.f32 %v5234_v20, %v511_v33  ;;  %v713_v39 = vmul.f32 %v666_v41, %v5234_v20  ;;  %v1096_v19 = vmul.f32 %v920_v56, %v5489_v16 }
 0x256   : > { %v2704_v4 = vadd.f32 1.0, %v4264_v6  ;;  %v905_v32 = vsub.f32 1.5, %v904_v58  ;;  %vm1689_vm14 = vweird.f32 %v6205_v46  ;;  %v1694_v9 = vand.u32 2147483648, %v6174_v18  ;;  %675 = vadd.xlane.f32.xlu1 %v622_v31 }
 0x257   : > { %v2705_v61 = vadd.f32 1.0, %v4265_v0  ;;  %vm908_vm15 = vweird.f32 %v6201_v55  ;;  %v1687_v36 = vadd.f32 %v6205_v46, %v1686_v10  ;;  %v6239_v35 = vsub.f32 %v4720_v26, %v559_v11 }
 0x258   : > { %v932_v44 = vmul.f32 %v6222_v54, %v6168_v45  ;;  %v906_v16 = vmul.f32 %v6201_v55, %v905_v32  ;;  %vm1688_vm0 = vweird.f32 %v6174_v18  ;;  %v1692_v23 = vand.u32 2147483647, %v6174_v18 }
 0x259   : > { %8704 = vst [vmem:[#allocation25_spill] sm:$0xff] %v6239_v35  ;;  %v4588_v37 = vpop.eup %4587  ;;  %v1671_v27 = vadd.f32 1.1283791, %v1670_v51  ;;  %vm907_vm1 = vweird.f32 %v6166_v62  ;;  %vm6249_vm2 = vmor %vm1688_vm0, %vm1689_vm14  ;;  %v6253_v38 = vadd.f32 1e-05, %v713_v39  ;;  %v623_v29 = vmul.f32 %v6239_v35, %v6239_v35 }
 0x25a   : > { %v1711_v7 = vadd.f32 1.1283791, %v1710_v53  ;;  %vm909_vm3 = vmor %vm907_vm1, %vm908_vm15  ;;  %v1691_v18 = vsel %vm6249_vm2, %v6205_v46, %v1687_v36  ;;  %v1724_v62 = vmul.f32 %v4588_v37, %v6215_v40  ;;  %v1131_v63 = vmul.f32 %v5886_v28, %v1096_v19 }
 0x25b   : > { %v2736_v3 = vmul.f32 %v2704_v4, %v1360_v8  ;;  %v2737_v13 = vmul.f32 %v2705_v61, %v1361_v52  ;;  %v1695_v43 = vor.u32 1.1754944e-38, %v1694_v9  ;;  %677 = vadd.xlane.f32.xlu2 %v623_v29  ;;  %v910_v42 = vsel %vm909_vm3, %v6201_v55, %v906_v16  ;;  %v1296_v8 = vpop.f32.mrf.mxu0  ;;  %v672_v10 = vpop.xlane.xlu2 %671 }
 0x25c   : > { %v513_v15 = vpop.xlane.xlu0 %512  ;;  %vm1693_vm4 = vcmp.eq.f32.partialorder %v1692_v23, 8.507059e+37  ;;  %v1725_v17 = vsub.f32 1.0, %v1724_v62  ;;  %v1095_v5 = vmul.f32 %v910_v42, %v5527_v57  ;;  %v1732_v14 = vand.u32 2147483647, %v6215_v40  ;;  %v6275_v57 = vld [vmem:[#allocation10] ss:$0 sm:$0xff] }
 0x25d   : > { %v560_v48 = vmul.f32 %v5234_v20, %v513_v15  ;;  %v1696_v46 = vsel %vm1693_vm4, %v1695_v43, %v1691_v18  ;;  %v1734_v30 = vand.u32 2147483648, %v6215_v40  ;;  %4589 = vrsqrt.f32 %v6253_v38 }
 0x25e   : > { %v1726_v49 = vmul.f32 %v4588_v37, %v1725_v17  ;;  %vm1729_vm5 = vweird.f32 %v4588_v37  ;;  %v1130_v55 = vmul.f32 %v5886_v28, %v1095_v5  ;;  %v1672_v25 = vmul.f32 %v1671_v27, %v5948_v34 }
 0x25f   : > { %v6271_v6 = vsub.f32 %v4721_v59, %v560_v48  ;;  %v2766_v60 = vpack.c.bf16 %v2737_v13, %v2736_v3  ;;  %v933_v52 = vmul.f32 %v6222_v54, %v932_v44  ;;  %vm1728_vm6 = vweird.f32 %v6215_v40 }
 0x260   : > { %v1727_v51 = vadd.f32 %v4588_v37, %v1726_v49  ;;  %v6283_v1 = vadd.f32 %v6275_v57, %v1296_v8  ;;  %v1712_v33 = vmul.f32 %v1711_v7, %v5959_v47  ;;  %v1697_v41 = vmul.f32 %v1696_v46, %v1672_v25  ;;  %vm1730_vm7 = vmor %vm1728_vm6, %vm1729_vm5 }
 0x261   : > { %8707 = vst [vmem:[#allocation26_spill] sm:$0xff] %v6271_v6  ;;  %v1735_v28 = vor.u32 1.1754944e-38, %v1734_v30  ;;  %v1166_v34 = vadd.f32 %v5907_v2, %v1131_v63  ;;  %vm1733_vm8 = vcmp.eq.f32.partialorder %v1732_v14, 8.507059e+37  ;;  %v1165_v0 = vadd.f32 %v5907_v2, %v1130_v55 }
 0x262   : > { %v1731_v53 = vsel %vm1730_vm7, %v4588_v37, %v1727_v51  ;;  %v624_v58 = vmul.f32 %v6271_v6, %v6271_v6  ;;  %v6296_v39 = vmul.f32 0.70710677, %v6283_v1  ;;  %v4266_v4 = vclamps-f32 %v1697_v41, 1.0  ;;  %v8710_v41 = vld [vmem:[#allocation19_spill] sm:$0xff] }
 0x263   : > { %v1336_v12 = vpop.f32.mrf.mxu3  ;;  %v6290_v31 = vpop.eup %4589  ;;  %v1736_v40 = vsel %vm1733_vm8, %v1735_v28, %v1731_v53  ;;  %v1190_v19 = vpack.c.bf16 %v1166_v34, %v1165_v0  ;;  %v934_v32 = vmul.f32 0.5, %v933_v52  ;;  %v716_v36 = vmul.f32 %v672_v10, %v5234_v20 }
 0x264   : > { %v6278_v56 = vadd.f32 %v6275_v57, %v1336_v12  ;;  %2900 = vmatmul.bf16.gmra.mxu1 %v2766_v60  ;;  %2989 = vmatmul.bf16.gmra.mxu2 %v2766_v60  ;;  %v1737_v11 = vmul.f32 %v1736_v40, %v1712_v33  ;;  %v922_v61 = vmul.f32 %v6290_v31, %v6253_v38  ;;  %v1298_v16 = vpop.f32.mrf.mxu0  ;;  %v1363_v37 = vmul.f32 0.5, %v5945_v21  ;;  %v670_v60 = vpop.xlane.xlu1 %669 }
 0x265   : > { %679 = vadd.xlane.f32.xlu0 %v624_v58  ;;  %1310 = vmatmul.bf16.gmra.mxu0 %v1190_v19  ;;  %v1740_v44 = vmul.f32 %v6296_v39, %v6296_v39  ;;  %v2706_v27 = vadd.f32 1.0, %v4266_v4  ;;  %v935_v50 = vsub.f32 1.5, %v934_v32  ;;  %v6309_v7 = vadd.f32 1e-05, %v716_v36 }
 0x266   : > { %v6293_v47 = vmul.f32 0.70710677, %v6278_v56  ;;  %v4267_v9 = vclamps-f32 %v1737_v11, 1.0  ;;  %v923_v29 = vmul.f32 %v6290_v31, %v922_v61  ;;  %v1362_v62 = vmul.f32 0.5, %v5930_v22 }
 0x267   : > { %v6314_v3 = vadd.f32 %v6275_v57, %v1298_v16  ;;  %vm937_vm9 = vweird.f32 %v6168_v45  ;;  %vm938_vm10 = vweird.f32 %v6222_v54  ;;  %v6318_v13 = vmin.f32 %v1740_v44, 16.0  ;;  %v8711_v44 = vld [vmem:[#allocation20_spill] sm:$0xff] }
 0x268   : > { %v2380_v2 = vmul.f32 %v6293_v47, %v6293_v47  ;;  %v2707_v26 = vadd.f32 1.0, %v4267_v9  ;;  %v2738_v43 = vmul.f32 %v2706_v27, %v1362_v62  ;;  %v936_v15 = vmul.f32 %v6222_v54, %v935_v50  ;;  %vm6323_vm11 = vmor %vm937_vm9, %vm938_vm10  ;;  %v6363_v9 = vld [vmem:[#allocation5] ss:$0 sm:$0xff]  ;;  %v6377_v62 = vld [vmem:[#allocation7] ss:$0 sm:$0xff] }
 0x269   : > { %v924_v42 = vmul.f32 0.5, %v923_v29  ;;  %4591 = vrsqrt.f32 %v6309_v7  ;;  %v6328_v45 = vmul.f32 0.70710677, %v6314_v3  ;;  %v1742_v5 = vmul.f32 2.1237322e-06, %v6318_v13 }
 0x26a   : > { %v6305_v23 = vmin.f32 %v2380_v2, 16.0  ;;  %v2739_v63 = vmul.f32 %v2707_v26, %v1363_v37  ;;  %v940_v8 = vsel %vm6323_vm11, %v6222_v54, %v936_v15  ;;  %v715_v51 = vmul.f32 %v670_v60, %v5234_v20 }
 0x26b   : > { %v925_v14 = vsub.f32 1.5, %v924_v42  ;;  %v1780_v49 = vmul.f32 %v6328_v45, %v6328_v45  ;;  %v1743_v55 = vadd.f32 0.00028619796, %v1742_v5  ;;  %v1338_v33 = vpop.f32.mrf.mxu3  ;;  %v1098_v28 = vmul.f32 %v940_v8, %v8710_v41 }
 0x26c   : > { %v2393_v18 = vmul.f32 3.8918573e-05, %v6305_v23  ;;  %v2767_v48 = vpack.c.bf16 %v2739_v63, %v2738_v43  ;;  %v2382_v46 = vmul.f32 2.1237322e-06, %v6305_v23  ;;  %vm928_vm12 = vweird.f32 %v6290_v31 }
 0x26d   : > { %v926_v34 = vmul.f32 %v6290_v31, %v925_v14  ;;  %v6346_v53 = vadd.f32 %v6275_v57, %v1338_v33  ;;  %v6350_v58 = vmin.f32 %v1780_v49, 16.0  ;;  %v6352_v40 = vadd.f32 1e-05, %v715_v51 }
 0x26e   : > { %v2394_v21 = vadd.f32 0.001143296, %v2393_v18  ;;  %v2383_v52 = vadd.f32 0.00028619796, %v2382_v46  ;;  %vm927_vm13 = vweird.f32 %v6253_v38  ;;  %v1744_v10 = vmul.f32 %v1743_v55, %v6318_v13 }
 0x26f   : > { %v6338_v59 = vpop.eup %4591  ;;  %vm929_vm14 = vmor %vm927_vm13, %vm928_vm12  ;;  %4593 = vrsqrt.f32 %v6352_v40  ;;  %v6359_v4 = vmul.f32 0.70710677, %v6346_v53  ;;  %v1133_v61 = vmul.f32 %v6363_v9, %v1098_v28  ;;  %v1782_v36 = vmul.f32 2.1237322e-06, %v6350_v58 }
 0x270   : > { %v2395_v17 = vmul.f32 %v2394_v21, %v6305_v23  ;;  %v952_v0 = vmul.f32 %v6338_v59, %v6309_v7  ;;  %v2384_v19 = vmul.f32 %v2383_v52, %v6305_v23  ;;  %v930_v32 = vsel %vm929_vm14, %v6290_v31, %v926_v34 }
 0x271   : > { %v2420_v26 = vmul.f32 %v6359_v4, %v6359_v4  ;;  %v1097_v16 = vmul.f32 %v930_v32, %v8711_v44  ;;  %v1745_v37 = vadd.f32 0.0036580483, %v1744_v10  ;;  %v1753_v27 = vmul.f32 3.8918573e-05, %v6318_v13 }
 0x272   : > { %v2396_v12 = vadd.f32 0.014752088, %v2395_v17  ;;  %v953_v38 = vmul.f32 %v6338_v59, %v952_v0  ;;  %v2385_v50 = vadd.f32 0.0036580483, %v2384_v19  ;;  %v1168_v63 = vadd.f32 %v6377_v62, %v1133_v61 }
 0x273   : > { %v6374_v31 = vmin.f32 %v2420_v26, 16.0  ;;  %v1132_v18 = vmul.f32 %v6363_v9, %v1097_v16  ;;  %v1783_v15 = vadd.f32 0.00028619796, %v1782_v36  ;;  %v1746_v22 = vmul.f32 %v1745_v37, %v6318_v13 }
 0x274   : > { %v2397_v30 = vmul.f32 %v2396_v12, %v6305_v23  ;;  %2905 = vmatmul.bf16.gmra.mxu1 %v2767_v48  ;;  %2994 = vmatmul.bf16.gmra.mxu2 %v2767_v48  ;;  %v954_v43 = vmul.f32 0.5, %v953_v38  ;;  %v1754_v12 = vadd.f32 0.001143296, %v1753_v27  ;;  %v2386_v46 = vmul.f32 %v2385_v50, %v6305_v23  ;;  %v1341_v51 = vpop.f32.mrf.mxu3 }
 0x275   : > { %v6380_v21 = vpop.eup %4593  ;;  %v2433_v42 = vmul.f32 3.8918573e-05, %v6374_v31  ;;  %v1167_v17 = vadd.f32 %v6377_v62, %v1132_v18  ;;  %v2422_v5 = vmul.f32 2.1237322e-06, %v6374_v31  ;;  %v1784_v55 = vmul.f32 %v1783_v15, %v6350_v58 }
 0x276   : > { %v2398_v25 = vadd.f32 0.112945676, %v2397_v30  ;;  %v942_v48 = vmul.f32 %v6380_v21, %v6352_v40  ;;  %v955_v49 = vsub.f32 1.5, %v954_v43  ;;  %vm957_vm15 = vweird.f32 %v6309_v7 }
 0x277   : > { %v2434_v14 = vadd.f32 0.001143296, %v2433_v42  ;;  %v1191_v30 = vpack.c.bf16 %v1168_v63, %v1167_v17  ;;  %vm958_vm0 = vweird.f32 %v6338_v59  ;;  %v2423_v52 = vadd.f32 0.00028619796, %v2422_v5 }
 0x278   : > { %v2399_v54 = vmul.f32 %v2398_v25, %v6305_v23  ;;  %v943_v8 = vmul.f32 %v6380_v21, %v942_v48  ;;  %v1747_v33 = vadd.f32 0.05243302, %v1746_v22  ;;  %v2387_v41 = vadd.f32 0.05243302, %v2386_v46  ;;  %vm6412_vm3 = vmor %vm957_vm15, %vm958_vm0 }
 0x279   : > { %v2435_v25 = vmul.f32 %v2434_v14, %v6374_v31  ;;  %1315 = vmatmul.bf16.gmra.mxu0 %v1191_v30  ;;  %v1755_v34 = vmul.f32 %v1754_v12, %v6318_v13  ;;  %vm947_vm1 = vweird.f32 %v6352_v40  ;;  %vm948_vm2 = vweird.f32 %v6380_v21 }
 0x27a   : > { %v2400_v11 = vadd.f32 0.4994258, %v2399_v54  ;;  %v944_v60 = vmul.f32 0.5, %v943_v8  ;;  %v6399_v0 = vadd.f32 %v6275_v57, %v1341_v51  ;;  %v956_v19 = vmul.f32 %v6338_v59, %v955_v49  ;;  %vm6422_vm4 = vmor %vm947_vm1, %vm948_vm2 }
 0x27b   : > { %v2436_v28 = vadd.f32 0.014752088, %v2435_v25  ;;  %v1301_v10 = vpop.f32.mrf.mxu0  ;;  %v2424_v36 = vmul.f32 %v2423_v52, %v6374_v31  ;;  %v2388_v44 = vmul.f32 %v2387_v41, %v6305_v23  ;;  %v1756_v27 = vadd.f32 0.014752088, %v1755_v34 }
 0x27c   : > { %v2401_v2 = vmul.f32 %v2400_v11, %v6305_v23  ;;  %v945_v54 = vsub.f32 1.5, %v944_v60  ;;  %v6406_v61 = vadd.f32 %v6275_v57, %v1301_v10  ;;  %v6419_v26 = vmul.f32 0.70710677, %v6399_v0  ;;  %v1343_v5 = vpop.f32.mrf.mxu3 }
 0x27d   : > { %v2437_v32 = vmul.f32 %v2436_v28, %v6374_v31  ;;  %v1748_v63 = vmul.f32 %v1747_v33, %v6318_v13  ;;  %v960_v42 = vsel %vm6412_vm3, %v6338_v59, %v956_v19  ;;  %v2425_v17 = vadd.f32 0.0036580483, %v2424_v36  ;;  %v8716_v33 = vld [vmem:[#allocation22_spill] sm:$0xff]  ;;  %v8717_v28 = vld [vmem:[#allocation21_spill] sm:$0xff] }
 0x27e   : > { %v6372_v29 = vadd.f32 1.0, %v2401_v2  ;;  %v1785_v2 = vadd.f32 0.0036580483, %v1784_v55  ;;  %v946_v38 = vmul.f32 %v6380_v21, %v945_v54  ;;  %v2460_v50 = vmul.f32 %v6419_v26, %v6419_v26 }
 0x27f   : > { %v2438_v37 = vadd.f32 0.112945676, %v2437_v32  ;;  %v6431_v18 = vmul.f32 0.70710677, %v6406_v61  ;;  %v2389_v46 = vadd.f32 0.18741608, %v2388_v44  ;;  %v6447_v30 = vadd.f32 %v6275_v57, %v1343_v5 }
 0x280   : > { %4595 = vrcp.f32 %v6372_v29  ;;  %v1786_v43 = vmul.f32 %v1785_v2, %v6350_v58  ;;  %v6439_v22 = vmin.f32 %v2460_v50, 16.0  ;;  %v950_v12 = vsel %vm6422_vm4, %v6380_v21, %v946_v38  ;;  %v674_v21 = vpop.xlane.xlu0 %673 }
 0x281   : > { %v2439_v15 = vmul.f32 %v2438_v37, %v6374_v31  ;;  %v1820_v48 = vmul.f32 %v6431_v18, %v6431_v18  ;;  %v1757_v8 = vmul.f32 %v1756_v27, %v6318_v13  ;;  %v6451_v59 = vmul.f32 0.5, %v6283_v1 }
 0x282   : > { %v2462_v55 = vmul.f32 2.1237322e-06, %v6439_v22  ;;  %v1749_v52 = vadd.f32 0.18741608, %v1748_v63  ;;  %v1099_v41 = vmul.f32 %v950_v12, %v8716_v33  ;;  %v1100_v34 = vmul.f32 %v960_v42, %v8717_v28 }
 0x283   : > { %v2440_v14 = vadd.f32 0.4994258, %v2439_v15  ;;  %v6454_v25 = vmin.f32 %v1820_v48, 16.0  ;;  %v1303_v60 = vpop.f32.mrf.mxu0  ;;  %v2426_v54 = vmul.f32 %v2425_v17, %v6374_v31  ;;  %v6462_v19 = vmul.f32 0.70710677, %v6447_v30 }
 0x284   : > { %v2463_v10 = vadd.f32 0.00028619796, %v2462_v55  ;;  %v1787_v2 = vadd.f32 0.05243302, %v1786_v43  ;;  %v2390_v32 = vmul.f32 %v2389_v46, %v6305_v23  ;;  %v1758_v38 = vadd.f32 0.112945676, %v1757_v8 }
 0x285   : > { %v2441_v51 = vmul.f32 %v2440_v14, %v6374_v31  ;;  %v1822_v1 = vmul.f32 2.1237322e-06, %v6454_v25  ;;  %v6468_v36 = vmul.f32 0.5, %v6278_v56  ;;  %v717_v16 = vmul.f32 %v674_v21, %v5234_v20 }
 0x286   : > { %v6401_v11 = vpop.eup %4595  ;;  %v2500_v37 = vmul.f32 %v6462_v19, %v6462_v19  ;;  %v6476_v27 = vadd.f32 %v6275_v57, %v1303_v60  ;;  %v1134_v23 = vmul.f32 %v6363_v9, %v1099_v41  ;;  %v6481_v50 = vmul.f32 %v1749_v52, %v6318_v13 }
 0x287   : > { %v2404_v7 = vmul.f32 %v6401_v11, %v6372_v29  ;;  %v6465_v40 = vadd.f32 1.0, %v2441_v51  ;;  %v2427_v56 = vadd.f32 0.05243302, %v2426_v54  ;;  %v2464_v63 = vmul.f32 %v2463_v10, %v6439_v22 }
 0x288   : > { %v1823_v43 = vadd.f32 0.00028619796, %v1822_v1  ;;  %v1788_v42 = vmul.f32 %v1787_v2, %v6350_v58  ;;  %v2391_v17 = vadd.f32 1.1283791, %v2390_v32  ;;  %v6485_v48 = vmin.f32 %v2500_v37, 16.0 }
 0x289   : > { %v2405_v49 = vsub.f32 1.0, %v2404_v7  ;;  %4597 = vrcp.f32 %v6465_v40  ;;  %v1135_v7 = vmul.f32 %v6363_v9, %v1100_v34  ;;  %v1759_v5 = vmul.f32 %v1758_v38, %v6318_v13 }
 0x28a   : > { %v1346_v15 = vpop.f32.mrf.mxu3  ;;  %vm2409_vm5 = vweird.f32 %v6401_v11  ;;  %v2414_v9 = vand.u32 2147483648, %v6372_v29  ;;  %v6491_v46 = vadd.f32 1e-05, %v717_v16  ;;  %v2502_v8 = vmul.f32 2.1237322e-06, %v6485_v48 }
 0x28b   : > { %v2406_v44 = vmul.f32 %v6401_v11, %v2405_v49  ;;  %v1306_v14 = vpop.f32.mrf.mxu0  ;;  %v6495_v49 = vmul.f32 0.70710677, %v6476_v27  ;;  %v1169_v55 = vadd.f32 %v6377_v62, %v1134_v23  ;;  %v1170_v60 = vadd.f32 %v6377_v62, %v1135_v7 }
 0x28c   : > { %v2428_v52 = vmul.f32 %v2427_v56, %v6374_v31  ;;  %v2465_v51 = vadd.f32 0.0036580483, %v2464_v63  ;;  %v1824_v21 = vmul.f32 %v1823_v43, %v6454_v25  ;;  %v6502_v33 = vadd.f32 %v6275_v57, %v1346_v15 }
 0x28d   : > { %v2407_v12 = vadd.f32 %v6401_v11, %v2406_v44  ;;  %v2503_v28 = vadd.f32 0.00028619796, %v2502_v8  ;;  %v1860_v34 = vmul.f32 %v6495_v49, %v6495_v49  ;;  %v1192_v54 = vpack.c.bf16 %v1170_v60, %v1169_v55 }
 0x28e   : > { %v6509_v10 = vadd.f32 %v6275_v57, %v1306_v14  ;;  %v2392_v62 = vmul.f32 %v2391_v17, %v6293_v47  ;;  %vm2408_vm6 = vweird.f32 %v6372_v29  ;;  %v2412_v1 = vand.u32 2147483647, %v6372_v29 }
 0x28f   : > { %v6504_v41 = vpop.eup %4597  ;;  %v2415_v32 = vor.u32 1.1754944e-38, %v2414_v9  ;;  %4599 = vrsqrt.f32 %v6491_v46  ;;  %v2504_v38 = vmul.f32 %v2503_v28, %v6485_v48  ;;  %v6518_v44 = vmin.f32 %v1860_v34, 16.0  ;;  %1320 = vmatmul.bf16.gmra.mxu0 %v1192_v54  ;;  %vm6522_vm7 = vmor %vm2408_vm6, %vm2409_vm5 }
 0x290   : > { %v2444_v2 = vmul.f32 %v6504_v41, %v6465_v40  ;;  %v2429_v47 = vadd.f32 0.18741608, %v2428_v52  ;;  %v2466_v29 = vmul.f32 %v2465_v51, %v6439_v22  ;;  %v6528_v23 = vmul.f32 0.70710677, %v6502_v33 }
 0x291   : > { %v2411_v56 = vsel %vm6522_vm7, %v6401_v11, %v2407_v12  ;;  %v1825_v63 = vadd.f32 0.0036580483, %v1824_v21  ;;  %v1862_v43 = vmul.f32 2.1237322e-06, %v6518_v44  ;;  %v6535_v15 = vmul.f32 0.70710677, %v6509_v10 }
 0x292   : > { %v2445_v37 = vsub.f32 1.0, %v2444_v2  ;;  %v1348_v7 = vpop.f32.mrf.mxu3  ;;  %v2505_v9 = vadd.f32 0.0036580483, %v2504_v38  ;;  %v2540_v14 = vmul.f32 %v6528_v23, %v6528_v23  ;;  %vm2413_vm8 = vcmp.eq.f32.partialorder %v2412_v1, 8.507059e+37 }
 0x293   : > { %v6541_v8 = vadd.f32 %v6275_v57, %v1348_v7  ;;  %v1863_v55 = vadd.f32 0.00028619796, %v1862_v43  ;;  %v1900_v11 = vmul.f32 %v6535_v15, %v6535_v15  ;;  %v1760_v12 = vadd.f32 0.4994258, %v1759_v5 }
 0x294   : > { %v2446_v17 = vmul.f32 %v6504_v41, %v2445_v37  ;;  %v2416_v60 = vsel %vm2413_vm8, %v2415_v32, %v2411_v56  ;;  %v2430_v52 = vmul.f32 %v2429_v47, %v6374_v31  ;;  %v2467_v51 = vadd.f32 0.05243302, %v2466_v29 }
 0x295   : > { %v6546_v21 = vmin.f32 %v2540_v14, 16.0  ;;  %v6548_v28 = vpop.eup %4599  ;;  %vm2449_vm9 = vweird.f32 %v6504_v41  ;;  %v1826_v34 = vmul.f32 %v1825_v63, %v6454_v25  ;;  %v1864_v54 = vmul.f32 %v1863_v55, %v6518_v44 }
 0x296   : > { %v6553_v1 = vmin.f32 %v1900_v11, 16.0  ;;  %v2447_v2 = vadd.f32 %v6504_v41, %v2446_v17  ;;  %v2506_v5 = vmul.f32 %v2505_v9, %v6485_v48  ;;  %v6559_v31 = vmul.f32 0.70710677, %v6541_v8  ;;  %v1308_v9 = vpop.f32.mrf.mxu0 }
 0x297   : > { %v2542_v32 = vmul.f32 2.1237322e-06, %v6546_v21  ;;  %v1751_v38 = vadd.f32 1.1283791, %v6481_v50  ;;  %v1789_v16 = vadd.f32 0.18741608, %v1788_v42  ;;  %v1761_v37 = vmul.f32 %v1760_v12, %v6318_v13 }
 0x298   : > { %v2454_v47 = vand.u32 2147483648, %v6465_v40  ;;  %v2417_v29 = vmul.f32 %v2416_v60, %v2392_v62  ;;  %vm2448_vm10 = vweird.f32 %v6465_v40  ;;  %v2452_v7 = vand.u32 2147483647, %v6465_v40 }
 0x299   : > { %v1865_v56 = vadd.f32 0.0036580483, %v1864_v54  ;;  %v2431_v63 = vadd.f32 1.1283791, %v2430_v52  ;;  %vm6568_vm11 = vmor %vm2448_vm10, %vm2449_vm9  ;;  %v2468_v50 = vmul.f32 %v2467_v51, %v6439_v22  ;;  %v1827_v42 = vadd.f32 0.05243302, %v1826_v34 }
 0x29a   : > { %v1902_v17 = vmul.f32 2.1237322e-06, %v6553_v1  ;;  %v2451_v13 = vsel %vm6568_vm11, %v6504_v41, %v2447_v2  ;;  %v2507_v62 = vadd.f32 0.05243302, %v2506_v5  ;;  %v2543_v40 = vadd.f32 0.00028619796, %v2542_v32 }
 0x29b   : > { %v2580_v14 = vmul.f32 %v6559_v31, %v6559_v31  ;;  %v1790_v55 = vmul.f32 %v1789_v16, %v6350_v58  ;;  %v2455_v11 = vor.u32 1.1754944e-38, %v2454_v47  ;;  %v962_v12 = vmul.f32 %v6548_v28, %v6491_v46 }
 0x29c   : > { %v6582_v60 = vadd.f32 1.0, %v1761_v37  ;;  %v4284_v52 = vclamps-f32 %v2417_v29, 1.0  ;;  %vm2453_vm12 = vcmp.eq.f32.partialorder %v2452_v7, 8.507059e+37  ;;  %v1866_v51 = vmul.f32 %v1865_v56, %v6518_v44 }
 0x29d   : > { %v6586_v34 = vadd.f32 %v6275_v57, %v1308_v9  ;;  %v2456_v41 = vsel %vm2453_vm12, %v2455_v11, %v2451_v13  ;;  %v2469_v54 = vadd.f32 0.18741608, %v2468_v50  ;;  %v1828_v2 = vmul.f32 %v1827_v42, %v6454_v25 }
 0x29e   : > { %v1903_v5 = vadd.f32 0.00028619796, %v1902_v17  ;;  %v2432_v32 = vmul.f32 %v2431_v63, %v6359_v4  ;;  %v2508_v16 = vmul.f32 %v2507_v62, %v6485_v48  ;;  %v2544_v47 = vmul.f32 %v2543_v40, %v6546_v21 }
 0x29f   : > { %8722 = vst [vmem:[#allocation19_spill] sm:$0xff] %v6586_v34  ;;  %v6592_v37 = vmin.f32 %v2580_v14, 16.0  ;;  %v6595_v29 = vmul.f32 0.5, %v6314_v3  ;;  %v1791_v7 = vadd.f32 1.1283791, %v1790_v55  ;;  %v1381_v56 = vmul.f32 0.5, %v6346_v53 }
 0x2a0   : > { %v963_v43 = vmul.f32 %v6548_v28, %v962_v12  ;;  %v2724_v50 = vadd.f32 1.0, %v4284_v52  ;;  %v2457_v9 = vmul.f32 %v2456_v41, %v2432_v32  ;;  %v1867_v42 = vadd.f32 0.05243302, %v1866_v51  ;;  %v1351_v41 = vpop.f32.mrf.mxu3 }
 0x2a1   : > { %v6600_v17 = vmul.f32 0.70710677, %v6586_v34  ;;  %v2470_v4 = vmul.f32 %v2469_v54, %v6439_v22  ;;  %v1829_v63 = vadd.f32 0.18741608, %v1828_v2  ;;  %v1904_v13 = vmul.f32 %v1903_v5, %v6553_v1 }
 0x2a2   : > { %4601 = vrcp.f32 %v6582_v60  ;;  %v6606_v3 = vmul.f32 %v1751_v38, %v6296_v39  ;;  %v2509_v62 = vadd.f32 0.18741608, %v2508_v16  ;;  %v2545_v53 = vadd.f32 0.0036580483, %v2544_v47 }
 0x2a3   : > { %v2582_v40 = vmul.f32 2.1237322e-06, %v6592_v37  ;;  %v6610_v14 = vmul.f32 %v1791_v7, %v6328_v45  ;;  %v6613_v55 = vmul.f32 0.5, %v6399_v0  ;;  %v6615_v11 = vmul.f32 0.5, %v963_v43 }
 0x2a4   : > { %v6618_v12 = vmul.f32 0.5, %v6406_v61  ;;  %v4285_v52 = vclamps-f32 %v2457_v9, 1.0  ;;  %v6621_v51 = vmul.f32 0.5, %v6447_v30  ;;  %v1868_v39 = vmul.f32 %v1867_v42, %v6518_v44 }
 0x2a5   : > { %v1940_v38 = vmul.f32 %v6600_v17, %v6600_v17  ;;  %v6627_v45 = vmul.f32 %v2724_v50, %v6468_v36  ;;  %v2471_v0 = vadd.f32 1.1283791, %v2470_v4  ;;  %v6630_v54 = vmul.f32 0.5, %v6476_v27 }
 0x2a6   : > { %v1905_v2 = vadd.f32 0.0036580483, %v1904_v13  ;;  %v1830_v61 = vmul.f32 %v1829_v63, %v6454_v25  ;;  %v2510_v5 = vmul.f32 %v2509_v62, %v6485_v48  ;;  %v2546_v30 = vmul.f32 %v2545_v53, %v6546_v21 }
 0x2a7   : > { %v2583_v32 = vadd.f32 0.00028619796, %v2582_v40  ;;  %v6639_v7 = vmul.f32 0.5, %v6502_v33  ;;  %v6642_v36 = vadd.f32 %v6275_v57, %v1351_v41  ;;  %v1793_v27 = vmul.f32 3.8918573e-05, %v6350_v58 }
 0x2a8   : > { %v6635_v16 = vpop.eup %4601  ;;  %v2725_v43 = vadd.f32 1.0, %v4285_v52  ;;  %v1869_v50 = vadd.f32 0.18741608, %v1868_v39  ;;  %v6646_v9 = vmul.f32 0.5, %v6541_v8  ;;  %v6648_v42 = vmin.f32 %v1940_v38, 16.0 }
 0x2a9   : > { %8723 = vst [vmem:[#allocation20_spill] sm:$0xff] %v6642_v36  ;;  %v6651_v4 = vmul.f32 %v2471_v0, %v6419_v26  ;;  %v1906_v63 = vmul.f32 %v1905_v2, %v6553_v1  ;;  %v1764_v33 = vmul.f32 %v6635_v16, %v6582_v60  ;;  %v1794_v13 = vadd.f32 0.001143296, %v1793_v27 }
 0x2aa   : > { %v6656_v62 = vadd.f32 1.1283791, %v1830_v61  ;;  %v6658_v53 = vadd.f32 1.1283791, %v2510_v5  ;;  %v2547_v40 = vadd.f32 0.05243302, %v2546_v30  ;;  %v2584_v52 = vmul.f32 %v2583_v32, %v6592_v37 }
 0x2ab   : > { %v6662_v8 = vmul.f32 0.70710677, %v6642_v36  ;;  %v1765_v39 = vsub.f32 1.0, %v1764_v33  ;;  %v1795_v26 = vmul.f32 %v1794_v13, %v6350_v58  ;;  %v2473_v38 = vmul.f32 3.8918573e-05, %v6439_v22 }
 0x2ac   : > { %v2757_v41 = vmul.f32 %v2725_v43, %v1381_v56  ;;  %v1870_v0 = vmul.f32 %v1869_v50, %v6518_v44  ;;  %v1942_v2 = vmul.f32 2.1237322e-06, %v6648_v42  ;;  %v2513_v61 = vmul.f32 3.8918573e-05, %v6485_v48 }
 0x2ad   : > { %8724 = vst [vmem:[#allocation22_spill] sm:$0xff] %v6662_v8  ;;  %v1907_v5 = vadd.f32 0.05243302, %v1906_v63  ;;  %v1766_v30 = vmul.f32 %v6635_v16, %v1765_v39  ;;  %v1796_v27 = vadd.f32 0.014752088, %v1795_v26  ;;  %v2548_v47 = vmul.f32 %v2547_v40, %v6546_v21 }
 0x2ae   : > { %v2474_v32 = vadd.f32 0.001143296, %v2473_v38  ;;  %v2585_v6 = vadd.f32 0.0036580483, %v2584_v52  ;;  %v2514_v33 = vadd.f32 0.001143296, %v2513_v61  ;;  %v2620_v56 = vmul.f32 %v6662_v8, %v6662_v8 }
 0x2af   : > { %v1833_v13 = vmul.f32 3.8918573e-05, %v6454_v25  ;;  %v1774_v43 = vand.u32 2147483648, %v6582_v60  ;;  %v1797_v50 = vmul.f32 %v1796_v27, %v6350_v58  ;;  %v1767_v63 = vadd.f32 %v6635_v16, %v1766_v30 }
 0x2b0   : > { %v2475_v35 = vmul.f32 %v2474_v32, %v6439_v22  ;;  %vm1769_vm13 = vweird.f32 %v6635_v16  ;;  %v2515_v39 = vmul.f32 %v2514_v33, %v6485_v48  ;;  %v6680_v52 = vadd.f32 1.1283791, %v1870_v0 }
 0x2b1   : > { %v1834_v40 = vadd.f32 0.001143296, %v1833_v13  ;;  %vm1768_vm14 = vweird.f32 %v6582_v60  ;;  %v1798_v26 = vadd.f32 0.112945676, %v1797_v50  ;;  %v1943_v61 = vadd.f32 0.00028619796, %v1942_v2 }
 0x2b2   : > { %v2476_v38 = vadd.f32 0.014752088, %v2475_v35  ;;  %v1772_v36 = vand.u32 2147483647, %v6582_v60  ;;  %v2516_v24 = vadd.f32 0.014752088, %v2515_v39  ;;  %v1908_v30 = vmul.f32 %v1907_v5, %v6553_v1  ;;  %vm6686_vm15 = vmor %vm1768_vm14, %vm1769_vm13 }
 0x2b3   : > { %v1835_v27 = vmul.f32 %v1834_v40, %v6454_v25  ;;  %v2549_v32 = vadd.f32 0.18741608, %v2548_v47  ;;  %v1799_v0 = vmul.f32 %v1798_v26, %v6350_v58  ;;  %v6692_v13 = vmin.f32 %v2620_v56, 16.0  ;;  %v2796_v56 = vld [vmem:[%s8570_s6] sm:$0x3] }
 0x2b4   : > { %v2477_v33 = vmul.f32 %v2476_v38, %v6439_v22  ;;  %v1771_v35 = vsel %vm6686_vm15, %v6635_v16, %v1767_v63  ;;  %v1775_v60 = vor.u32 1.1754944e-38, %v1774_v43  ;;  %v2517_v2 = vmul.f32 %v2516_v24, %v6485_v48 }
 0x2b5   : > { %v2586_v47 = vmul.f32 %v2585_v6, %v6592_v37  ;;  %v1800_v5 = vadd.f32 0.4994258, %v1799_v0  ;;  %v1836_v39 = vadd.f32 0.014752088, %v1835_v27  ;;  %v1944_v40 = vmul.f32 %v1943_v61, %v6648_v42 }
 0x2b6   : > { %v2478_v50 = vadd.f32 0.112945676, %v2477_v33  ;;  %vm1773_vm0 = vcmp.eq.f32.partialorder %v1772_v36, 8.507059e+37  ;;  %v6704_v38 = vpack.c.bf16 %v2757_v41, %v6627_v45  ;;  %v2518_v16 = vadd.f32 0.112945676, %v2517_v2 }
 0x2b7   : > { %v2550_v8 = vmul.f32 %v2549_v32, %v6546_v21  ;;  %v1909_v24 = vadd.f32 0.18741608, %v1908_v30  ;;  %v1776_v43 = vsel %vm1773_vm0, %v1775_v60, %v1771_v35  ;;  %v1801_v6 = vmul.f32 %v1800_v5, %v6350_v58 }
 0x2b8   : > { %8727 = vst [vmem:[#allocation21_spill] sm:$0xff] %v6704_v38  ;;  %v6708_v63 = vperm.slane %v2796_v56, 0  ;;  %v6710_v27 = vperm.slane %v2796_v56, 1  ;;  %2950 = vmatmul.bf16.vlgmr.msrb.gmra.mxu3 %v6704_v38  ;;  %v2479_v36 = vmul.f32 %v2478_v50, %v6439_v22  ;;  %v2519_v61 = vmul.f32 %v2518_v16, %v6485_v48 }
 0x2b9   : > { %v2587_v0 = vadd.f32 0.05243302, %v2586_v47  ;;  %v6715_v45 = vadd.f32 1.0, %v1801_v6  ;;  %v1837_v41 = vmul.f32 %v1836_v39, %v6454_v25  ;;  %v1873_v32 = vmul.f32 3.8918573e-05, %v6518_v44 }
 0x2ba   : > { %v6721_v58 = vmul.f32 %v6656_v62, %v6431_v18  ;;  %v2622_v30 = vmul.f32 2.1237322e-06, %v6692_v13  ;;  %v2480_v35 = vadd.f32 0.4994258, %v2479_v36  ;;  %v2520_v60 = vadd.f32 0.4994258, %v2519_v61 }
 0x2bb   : > { %v2551_v2 = vadd.f32 1.1283791, %v2550_v8  ;;  %v1945_v5 = vadd.f32 0.0036580483, %v1944_v40  ;;  %v1777_v50 = vmul.f32 %v1776_v43, %v6606_v3  ;;  %4603 = vrcp.f32 %v6715_v45 }
 0x2bc   : > { %v2481_v18 = vmul.f32 %v2480_v35, %v6439_v22  ;;  %v2521_v62 = vmul.f32 %v2520_v60, %v6485_v48  ;;  %v1910_v56 = vmul.f32 %v1909_v24, %v6553_v1  ;;  %v2588_v16 = vmul.f32 %v2587_v0, %v6592_v37 }
 0x2bd   : > { %v1838_v8 = vadd.f32 0.112945676, %v1837_v41  ;;  %v1874_v40 = vadd.f32 0.001143296, %v1873_v32  ;;  %v2623_v6 = vadd.f32 0.00028619796, %v2622_v30  ;;  %v6744_v22 = vmul.f32 %v6658_v53, %v6462_v19  ;;  %v1353_v41 = vpop.f32.mrf.mxu3 }
 0x2be   : > { %v6740_v36 = vadd.f32 1.0, %v2521_v62  ;;  %v6748_v48 = vmul.f32 %v6680_v52, %v6495_v49  ;;  %v6751_v24 = vmul.f32 %v1945_v5, %v6648_v42  ;;  %v4268_v61 = vclamps-f32 %v1777_v50, 1.0 }
 0x2bf   : > { %v6754_v0 = vmul.f32 %v2551_v2, %v6528_v23  ;;  %v1839_v32 = vmul.f32 %v1838_v8, %v6454_v25  ;;  %v1875_v19 = vmul.f32 %v1874_v40, %v6518_v44  ;;  %v1812_v30 = vand.u32 2147483647, %v6715_v45 }
 0x2c0   : > { %v1814_v49 = vand.u32 2147483648, %v6715_v45  ;;  %v2553_v52 = vmul.f32 3.8918573e-05, %v6546_v21  ;;  %v6765_v23 = vadd.f32 0.18741608, %v2588_v16  ;;  %v6768_v35 = vmul.f32 %v2623_v6, %v6692_v13 }
 0x2c1   : > { %v2891_v26 = vpop.f32.mrf.mxu1  ;;  %v4604_v53 = vpop.eup %4603  ;;  %v2708_v5 = vadd.f32 1.0, %v4268_v61  ;;  %v6772_v50 = vadd.f32 %v6275_v57, %v1353_v41  ;;  %vm1808_vm1 = vweird.f32 %v6715_v45  ;;  %v1840_v16 = vadd.f32 0.4994258, %v1839_v32 }
 0x2c2   : > { %v6727_v47 = vadd.f32 %v2891_v26, %v6708_v63  ;;  %v6738_v26 = vadd.f32 1.0, %v2481_v18  ;;  %v1804_v60 = vmul.f32 %v4604_v53, %v6715_v45  ;;  %v1876_v8 = vadd.f32 0.014752088, %v1875_v19 }
 0x2c3   : > { %vm6781_vm2 = vcmp.eq.f32.partialorder %v1812_v30, 8.507059e+37  ;;  %v1815_v6 = vor.u32 1.1754944e-38, %v1814_v49  ;;  %vm1809_vm3 = vweird.f32 %v4604_v53  ;;  %vm2528_vm5 = vweird.f32 %v6740_v36 }
 0x2c4   : > { %8728 = vst [vmem:[#allocation27_spill] sm:$0xff] %v6727_v47  ;;  %4605 = vrcp.f32 %v6738_v26  ;;  %vm2488_vm4 = vweird.f32 %v6738_v26  ;;  %v2492_v19 = vand.u32 2147483647, %v6738_v26  ;;  %v2494_v30 = vand.u32 2147483648, %v6738_v26  ;;  %vm1810_vm6 = vmor %vm1808_vm1, %vm1809_vm3 }
 0x2c5   : > { %4607 = vrcp.f32 %v6740_v36 }
 0x2c6   : > { %vm2493_vm10 = vcmp.eq.f32.partialorder %v2492_v19, 8.507059e+37 }
 0x2c7   : > { %v2980_v33 = vpop.f32.mrf.mxu2 }
 0x2c8   : > { %v6730_v39 = vadd.f32 %v2980_v33, %v6710_v27  ;;  %v6763_v33 = vadd.f32 1.1283791, %v1910_v56  ;;  %v1805_v56 = vsub.f32 1.0, %v1804_v60  ;;  %v1877_v60 = vmul.f32 %v1876_v8, %v6518_v44 }
 0x2c9   : > { %v2893_v3 = vpop.f32.mrf.mxu1 }
 0x2ca   : > { %8729 = vst [vmem:[#allocation28_spill] sm:$0xff] %v6730_v39  ;;  %v3062_v43 = vadd.f32 %v6730_v39, %v6727_v47  ;;  %v6775_v18 = vadd.f32 %v2893_v3, %v6708_v63  ;;  %v4606_v61 = vpop.eup %4605  ;;  %v1806_v3 = vmul.f32 %v4604_v53, %v1805_v56  ;;  %v2534_v56 = vand.u32 2147483648, %v6740_v36 }
 0x2cb   : > { %v4608_v39 = vpop.eup %4607  ;;  %v2484_v32 = vmul.f32 %v4606_v61, %v6738_v26  ;;  %vm2489_vm7 = vweird.f32 %v4606_v61  ;;  %v1878_v47 = vadd.f32 0.112945676, %v1877_v60 }
 0x2cc   : > { %3063 = vadd.xlane.f32.xlu1 %v3062_v43  ;;  %8730 = vst [vmem:[#allocation29_spill] sm:$0xff] %v6775_v18  ;;  %v2554_v43 = vadd.f32 0.001143296, %v2553_v52  ;;  %v1807_v49 = vadd.f32 %v4604_v53, %v1806_v3  ;;  %v2524_v52 = vmul.f32 %v4608_v39, %v6740_v36  ;;  %vm2529_vm8 = vweird.f32 %v4608_v39  ;;  %vm2490_vm9 = vmor %vm2488_vm4, %vm2489_vm7 }
 0x2cd   : > { %vm2530_vm11 = vmor %vm2528_vm5, %vm2529_vm8 }
 0x2ce   : > { %v2525_v3 = vsub.f32 1.0, %v2524_v52 }
 0x2cf   : > { %v2982_v2 = vpop.f32.mrf.mxu2 }
 0x2d0   : > { %v6778_v62 = vadd.f32 %v2982_v2, %v6710_v27  ;;  %v1841_v2 = vmul.f32 %v1840_v16, %v6454_v25  ;;  %v2485_v16 = vsub.f32 1.0, %v2484_v32  ;;  %v2495_v32 = vor.u32 1.1754944e-38, %v2494_v30 }
 0x2d1   : > { %v2896_v41 = vpop.f32.mrf.mxu1  ;;  %v2535_v30 = vor.u32 1.1754944e-38, %v2534_v56 }
 0x2d2   : > { %8731 = vst [vmem:[#allocation30_spill] sm:$0xff] %v6778_v62  ;;  %v3065_v57 = vadd.f32 %v6778_v62, %v6775_v18  ;;  %v6799_v25 = vadd.f32 %v2896_v41, %v6708_v63  ;;  %v6801_v8 = vadd.f32 1.0, %v1841_v2  ;;  %v1811_v62 = vsel %vm1810_vm6, %v4604_v53, %v1807_v49 }
 0x2d3   : > { %v1816_v38 = vsel %vm6781_vm2, %v1815_v6, %v1811_v62  ;;  %v2486_v45 = vmul.f32 %v4606_v61, %v2485_v16  ;;  %v2526_v2 = vmul.f32 %v4608_v39, %v2525_v3  ;;  %v1879_v6 = vmul.f32 %v1878_v47, %v6518_v44 }
 0x2d4   : > { %3066 = vadd.xlane.f32.xlu2 %v3065_v57  ;;  %v2555_v57 = vmul.f32 %v2554_v43, %v6546_v21  ;;  %4609 = vrcp.f32 %v6801_v8  ;;  %v1817_v41 = vmul.f32 %v1816_v38, %v6610_v14  ;;  %v2532_v43 = vand.u32 2147483647, %v6740_v36 }
 0x2d5   : > { %v2487_v53 = vadd.f32 %v4606_v61, %v2486_v45  ;;  %v2593_v14 = vmul.f32 3.8918573e-05, %v6592_v37  ;;  %v2740_v38 = vmul.f32 %v2708_v5, %v6451_v59  ;;  %vm1848_vm13 = vweird.f32 %v6801_v8 }
 0x2d6   : > { %v2556_v49 = vadd.f32 0.014752088, %v2555_v57  ;;  %v4269_v40 = vclamps-f32 %v1817_v41, 1.0  ;;  %vm2533_vm12 = vcmp.eq.f32.partialorder %v2532_v43, 8.507059e+37  ;;  %v1880_v41 = vadd.f32 0.4994258, %v1879_v6 }
 0x2d7   : > { %v2985_v18 = vpop.f32.mrf.mxu2  ;;  %v2491_v52 = vsel %vm2490_vm9, %v4606_v61, %v2487_v53  ;;  %v2594_v56 = vadd.f32 0.001143296, %v2593_v14  ;;  %v1913_v14 = vmul.f32 3.8918573e-05, %v6553_v1 }
 0x2d8   : > { %v6807_v34 = vadd.f32 %v2985_v18, %v6710_v27  ;;  %v2527_v18 = vadd.f32 %v4608_v39, %v2526_v2  ;;  %v2709_v16 = vadd.f32 1.0, %v4269_v40  ;;  %v2496_v57 = vsel %vm2493_vm10, %v2495_v32, %v2491_v52 }
 0x2d9   : > { %v2898_v62 = vpop.f32.mrf.mxu1  ;;  %v2497_v47 = vmul.f32 %v2496_v57, %v6651_v4  ;;  %v2557_v59 = vmul.f32 %v2556_v49, %v6546_v21  ;;  %v1881_v43 = vmul.f32 %v1880_v41, %v6518_v44  ;;  %v6839_v32 = vmul.f32 0.70710677, %v6772_v50 }
 0x2da   : > { %v3068_v60 = vadd.f32 %v6807_v34, %v6799_v25  ;;  %v2531_v3 = vsel %vm2530_vm11, %v4608_v39, %v2527_v18  ;;  %v6823_v26 = vpop.eup %4609  ;;  %v2741_v5 = vmul.f32 %v2709_v16, %v6595_v29  ;;  %v6832_v39 = vadd.f32 %v2898_v62, %v6708_v63 }
 0x2db   : > { %v2536_v45 = vsel %vm2533_vm12, %v2535_v30, %v2531_v3  ;;  %v1844_v36 = vmul.f32 %v6823_v26, %v6801_v8  ;;  %v4286_v2 = vclamps-f32 %v2497_v47, 1.0  ;;  %v6841_v49 = vadd.f32 1.0, %v1881_v43 }
 0x2dc   : > { %3069 = vadd.xlane.f32.xlu0 %v3068_v60  ;;  %v2537_v61 = vmul.f32 %v2536_v45, %v6744_v22  ;;  %v2768_v53 = vpack.c.bf16 %v2741_v5, %v2740_v38  ;;  %v2558_v62 = vadd.f32 0.112945676, %v2557_v59  ;;  %v2595_v6 = vmul.f32 %v2594_v56, %v6592_v37 }
 0x2dd   : > { %v1845_v22 = vsub.f32 1.0, %v1844_v36  ;;  %v2726_v60 = vadd.f32 1.0, %v4286_v2  ;;  %v1947_v38 = vadd.f32 0.05243302, %v6751_v24  ;;  %vm1849_vm14 = vweird.f32 %v6823_v26 }
 0x2de   : > { %v4287_v29 = vclamps-f32 %v2537_v61, 1.0  ;;  %2910 = vmatmul.bf16.gmra.mxu1 %v2768_v53  ;;  %2999 = vmatmul.bf16.gmra.mxu2 %v2768_v53  ;;  %4611 = vrcp.f32 %v6841_v49  ;;  %v1854_v3 = vand.u32 2147483648, %v6801_v8  ;;  %v1852_v47 = vand.u32 2147483647, %v6801_v8  ;;  %vm6864_vm15 = vmor %vm1848_vm13, %vm1849_vm14 }
 0x2df   : > { %v2987_v19 = vpop.f32.mrf.mxu2  ;;  %v1846_v44 = vmul.f32 %v6823_v26, %v1845_v22  ;;  %v2758_v30 = vmul.f32 %v2726_v60, %v6613_v55  ;;  %v2559_v24 = vmul.f32 %v2558_v62, %v6546_v21  ;;  %v2596_v45 = vadd.f32 0.014752088, %v2595_v6 }
 0x2e0   : > { %v6836_v4 = vadd.f32 %v2987_v19, %v6710_v27  ;;  %v2727_v18 = vadd.f32 1.0, %v4287_v29  ;;  %v1914_v41 = vadd.f32 0.001143296, %v1913_v14  ;;  %v2660_v59 = vmul.f32 %v6839_v32, %v6839_v32 }
 0x2e1   : > { %v2901_v52 = vpop.f32.mrf.mxu1  ;;  %v1847_v57 = vadd.f32 %v6823_v26, %v1846_v44  ;;  %v1953_v36 = vmul.f32 3.8918573e-05, %v6648_v42  ;;  %v2560_v2 = vadd.f32 0.4994258, %v2559_v24  ;;  %v2597_v8 = vmul.f32 %v2596_v45, %v6592_v37 }
 0x2e2   : > { %v3071_v40 = vadd.f32 %v6836_v4, %v6832_v39  ;;  %v2759_v16 = vmul.f32 %v2727_v18, %v6621_v51  ;;  %v6869_v51 = vadd.f32 %v2901_v52, %v6708_v63  ;;  %v1855_v43 = vor.u32 1.1754944e-38, %v1854_v3 }
 0x2e3   : > { %v1851_v19 = vsel %vm6864_vm15, %v6823_v26, %v1847_v57  ;;  %v1915_v53 = vmul.f32 %v1914_v41, %v6553_v1  ;;  %v1954_v29 = vadd.f32 0.001143296, %v1953_v36  ;;  %v2633_v22 = vmul.f32 3.8918573e-05, %v6692_v13 }
 0x2e4   : > { %3072 = vadd.xlane.f32.xlu1 %v3071_v40  ;;  %v6860_v5 = vpack.c.bf16 %v2759_v16, %v2758_v30  ;;  %v4612_v60 = vpop.eup %4611  ;;  %vm1853_vm0 = vcmp.eq.f32.partialorder %v1852_v47, 8.507059e+37  ;;  %v2561_v26 = vmul.f32 %v2560_v2, %v6546_v21  ;;  %v2598_v62 = vadd.f32 0.112945676, %v2597_v8 }
 0x2e5   : > { %v2590_v18 = vmul.f32 %v6765_v23, %v6592_v37  ;;  %v1856_v44 = vsel %vm1853_vm0, %v1855_v43, %v1851_v19  ;;  %v1884_v6 = vmul.f32 %v4612_v60, %v6841_v49  ;;  %v1916_v14 = vadd.f32 0.014752088, %v1915_v53 }
 0x2e6   : > { %2955 = vmatmul.bf16.gmra.mxu3 %v6860_v5  ;;  %v6888_v52 = vmin.f32 %v2660_v59, 16.0  ;;  %v6890_v30 = vadd.f32 1.0, %v2561_v26  ;;  %v2599_v16 = vmul.f32 %v2598_v62, %v6592_v37  ;;  %v1955_v57 = vmul.f32 %v1954_v29, %v6648_v42 }
 0x2e7   : > { %v2990_v61 = vpop.f32.mrf.mxu2  ;;  %v2625_v3 = vadd.f32 0.0036580483, %v6768_v35  ;;  %v1885_v21 = vsub.f32 1.0, %v1884_v6  ;;  %v1917_v47 = vmul.f32 %v1916_v14, %v6553_v1  ;;  %v2634_v24 = vadd.f32 0.001143296, %v2633_v22 }
 0x2e8   : > { %v6876_v56 = vadd.f32 %v2990_v61, %v6710_v27  ;;  %v1857_v23 = vmul.f32 %v1856_v44, %v6721_v58  ;;  %v1892_v45 = vand.u32 2147483647, %v6841_v49  ;;  %v1894_v41 = vand.u32 2147483648, %v6841_v49 }
 0x2e9   : > { %4613 = vrcp.f32 %v6890_v30  ;;  %v1886_v59 = vmul.f32 %v4612_v60, %v1885_v21  ;;  %vm1889_vm1 = vweird.f32 %v4612_v60  ;;  %v2600_v55 = vadd.f32 0.4994258, %v2599_v16 }
 0x2ea   : > { %v3074_v40 = vadd.f32 %v6876_v56, %v6869_v51  ;;  %v1918_v61 = vadd.f32 0.112945676, %v1917_v47  ;;  %v1948_v36 = vmul.f32 %v1947_v38, %v6648_v42  ;;  %v2662_v35 = vmul.f32 2.1237322e-06, %v6888_v52 }
 0x2eb   : > { %v1956_v19 = vadd.f32 0.014752088, %v1955_v57  ;;  %v2635_v2 = vmul.f32 %v2634_v24, %v6692_v13  ;;  %v1887_v8 = vadd.f32 %v4612_v60, %v1886_v59  ;;  %vm1888_vm2 = vweird.f32 %v6841_v49 }
 0x2ec   : > { %3075 = vadd.xlane.f32.xlu2 %v3074_v40  ;;  %v2601_v58 = vmul.f32 %v2600_v55, %v6592_v37  ;;  %v1919_v43 = vmul.f32 %v1918_v61, %v6553_v1  ;;  %v4270_v53 = vclamps-f32 %v1857_v23, 1.0  ;;  %vm1890_vm3 = vmor %vm1888_vm2, %vm1889_vm1  ;;  %v1895_v29 = vor.u32 1.1754944e-38, %v1894_v41 }
 0x2ed   : > { %v1957_v22 = vmul.f32 %v1956_v19, %v6648_v42  ;;  %v2636_v40 = vadd.f32 0.014752088, %v2635_v2  ;;  %v1891_v26 = vsel %vm1890_vm3, %v4612_v60, %v1887_v8  ;;  %vm1893_vm4 = vcmp.eq.f32.partialorder %v1892_v45, 8.507059e+37  ;;  %v2903_v8 = vpop.f32.mrf.mxu1 }
 0x2ee   : > { %v6907_v38 = vadd.f32 1.0, %v2601_v58  ;;  %v1920_v62 = vadd.f32 0.4994258, %v1919_v43  ;;  %v6911_v6 = vmul.f32 %v6763_v33, %v6535_v15  ;;  %v1896_v49 = vsel %vm1893_vm4, %v1895_v29, %v1891_v26  ;;  %v676_v33 = vpop.xlane.xlu1 %675 }
 0x2ef   : > { %v4614_v44 = vpop.eup %4613  ;;  %v1958_v37 = vadd.f32 0.112945676, %v1957_v22  ;;  %v2637_v14 = vmul.f32 %v2636_v40, %v6692_v13  ;;  %v2591_v16 = vadd.f32 1.1283791, %v2590_v18  ;;  %v1897_v57 = vmul.f32 %v1896_v49, %v6748_v48 }
 0x2f0   : > { %v2564_v21 = vmul.f32 %v4614_v44, %v6890_v30  ;;  %4615 = vrcp.f32 %v6907_v38  ;;  %v6917_v60 = vadd.f32 0.18741608, %v1948_v36  ;;  %v2626_v47 = vmul.f32 %v2625_v3, %v6692_v13 }
 0x2f1   : > { %v2663_v24 = vadd.f32 0.00028619796, %v2662_v35  ;;  %v2710_v23 = vadd.f32 1.0, %v4270_v53  ;;  %v4271_v45 = vclamps-f32 %v1897_v57, 1.0  ;;  %v1921_v41 = vmul.f32 %v1920_v62, %v6553_v1 }
 0x2f2   : > { %v2565_v15 = vsub.f32 1.0, %v2564_v21  ;;  %v2673_v59 = vmul.f32 3.8918573e-05, %v6888_v52  ;;  %v2572_v18 = vand.u32 2147483647, %v6890_v30  ;;  %v2574_v48 = vand.u32 2147483648, %v6890_v30 }
 0x2f3   : > { %v1959_v55 = vmul.f32 %v1958_v37, %v6648_v42  ;;  %v2638_v61 = vadd.f32 0.112945676, %v2637_v14  ;;  %v2711_v36 = vadd.f32 1.0, %v4271_v45  ;;  %vm2569_vm5 = vweird.f32 %v4614_v44 }
 0x2f4   : > { %v2566_v19 = vmul.f32 %v4614_v44, %v2565_v15  ;;  %v6925_v3 = vadd.f32 1.0, %v1921_v41  ;;  %v2592_v35 = vmul.f32 %v2591_v16, %v6559_v31  ;;  %v2742_v2 = vmul.f32 %v2710_v23, %v6618_v12  ;;  %v2992_v16 = vpop.f32.mrf.mxu2 }
 0x2f5   : > { %vm2568_vm6 = vweird.f32 %v6890_v30  ;;  %v718_v1 = vmul.f32 %v676_v33, %v5234_v20  ;;  %v2743_v43 = vmul.f32 %v2711_v36, %v6630_v54  ;;  %v1960_v29 = vadd.f32 0.4994258, %v1959_v55 }
 0x2f6   : > { %v4616_v58 = vpop.eup %4615  ;;  %v2567_v53 = vadd.f32 %v4614_v44, %v2566_v19  ;;  %4617 = vrcp.f32 %v6925_v3  ;;  %v2664_v22 = vmul.f32 %v2663_v24, %v6888_v52  ;;  %vm2570_vm7 = vmor %vm2568_vm6, %vm2569_vm5  ;;  %v2575_v40 = vor.u32 1.1754944e-38, %v2574_v48 }
 0x2f7   : > { %v2604_v31 = vmul.f32 %v4616_v58, %v6907_v38  ;;  %v2639_v12 = vmul.f32 %v2638_v61, %v6692_v13  ;;  %v2769_v26 = vpack.c.bf16 %v2743_v43, %v2742_v2  ;;  %vm2573_vm8 = vcmp.eq.f32.partialorder %v2572_v18, 8.507059e+37  ;;  %v2906_v2 = vpop.f32.mrf.mxu1 }
 0x2f8   : > { %v2571_v62 = vsel %vm2570_vm7, %v4614_v44, %v2567_v53  ;;  %v2674_v30 = vadd.f32 0.001143296, %v2673_v59  ;;  %v6937_v49 = vadd.f32 %v2903_v8, %v6708_v63  ;;  %v6939_v14 = vadd.f32 1e-05, %v718_v1 }
 0x2f9   : > { %v2576_v54 = vsel %vm2573_vm8, %v2575_v40, %v2571_v62  ;;  %v2605_v37 = vsub.f32 1.0, %v2604_v31  ;;  %2915 = vmatmul.bf16.gmra.mxu1 %v2769_v26  ;;  %3004 = vmatmul.bf16.gmra.mxu2 %v2769_v26  ;;  %vm2609_vm9 = vweird.f32 %v4616_v58  ;;  %v2612_v57 = vand.u32 2147483647, %v6907_v38 }
 0x2fa   : > { %v2614_v21 = vand.u32 2147483648, %v6907_v38  ;;  %v1961_v24 = vmul.f32 %v1960_v29, %v6648_v42  ;;  %v2577_v44 = vmul.f32 %v2576_v54, %v6754_v0  ;;  %v6946_v45 = vadd.f32 %v2992_v16, %v6710_v27  ;;  %v678_v54 = vpop.xlane.xlu2 %677 }
 0x2fb   : > { %v2606_v23 = vmul.f32 %v4616_v58, %v2605_v37  ;;  %v2640_v15 = vadd.f32 0.4994258, %v2639_v12  ;;  %v2627_v41 = vadd.f32 0.05243302, %v2626_v47  ;;  %vm2608_vm10 = vweird.f32 %v6907_v38 }
 0x2fc   : > { %v4618_v33 = vpop.eup %4617  ;;  %v6949_v59 = vadd.f32 1.0, %v1961_v24  ;;  %v2675_v18 = vmul.f32 %v2674_v30, %v6888_v52  ;;  %4619 = vrsqrt.f32 %v6939_v14  ;;  %v3077_v0 = vadd.f32 %v6946_v45, %v6937_v49  ;;  %vm2610_vm11 = vmor %vm2608_vm10, %vm2609_vm9  ;;  %v2995_v12 = vpop.f32.mrf.mxu2 }
 0x2fd   : > { %v2607_v48 = vadd.f32 %v4616_v58, %v2606_v23  ;;  %v1924_v55 = vmul.f32 %v4618_v33, %v6925_v3  ;;  %v2665_v61 = vadd.f32 0.0036580483, %v2664_v22  ;;  %vm2613_vm12 = vcmp.eq.f32.partialorder %v2612_v57, 8.507059e+37 }
 0x2fe   : > { %v2615_v36 = vor.u32 1.1754944e-38, %v2614_v21  ;;  %4621 = vrcp.f32 %v6949_v59  ;;  %v4288_v38 = vclamps-f32 %v2577_v44, 1.0  ;;  %3078 = vadd.xlane.f32.xlu0 %v3077_v0  ;;  %v2641_v8 = vmul.f32 %v2640_v15, %v6692_v13 }
 0x2ff   : > { %v2611_v47 = vsel %vm2610_vm11, %v4616_v58, %v2607_v48  ;;  %v1925_v19 = vsub.f32 1.0, %v1924_v55  ;;  %v1950_v1 = vmul.f32 %v6917_v60, %v6648_v42  ;;  %v1934_v53 = vand.u32 2147483648, %v6925_v3 }
 0x300   : > { %v2616_v43 = vsel %vm2613_vm12, %v2615_v36, %v2611_v47  ;;  %v2676_v29 = vadd.f32 0.014752088, %v2675_v18  ;;  %vm1929_vm13 = vweird.f32 %v4618_v33  ;;  %v1932_v31 = vand.u32 2147483647, %v6925_v3 }
 0x301   : > { %v2617_v22 = vmul.f32 %v2616_v43, %v2592_v35  ;;  %v1926_v40 = vmul.f32 %v4618_v33, %v1925_v19  ;;  %v2666_v58 = vmul.f32 %v2665_v61, %v6888_v52  ;;  %vm1928_vm14 = vweird.f32 %v6925_v3 }
 0x302   : > { %v6966_v26 = vadd.f32 %v2906_v2, %v6708_v63  ;;  %v6969_v62 = vadd.f32 %v2995_v12, %v6710_v27  ;;  %v6971_v42 = vpop.eup %4619  ;;  %v2728_v30 = vadd.f32 1.0, %v4288_v38  ;;  %v6973_v37 = vadd.f32 1.0, %v2641_v8  ;;  %vm1930_vm15 = vmor %vm1928_vm14, %vm1929_vm13 }
 0x303   : > { %v4289_v60 = vclamps-f32 %v2617_v22, 1.0  ;;  %v1927_v35 = vadd.f32 %v4618_v33, %v1926_v40  ;;  %v2628_v57 = vmul.f32 %v2627_v41, %v6692_v13  ;;  %v1935_v3 = vor.u32 1.1754944e-38, %v1934_v53 }
 0x304   : > { %v4622_v16 = vpop.eup %4621  ;;  %v3080_v21 = vadd.f32 %v6969_v62, %v6966_v26  ;;  %v2677_v24 = vmul.f32 %v2676_v29, %v6888_v52  ;;  %vm1933_vm0 = vcmp.eq.f32.partialorder %v1932_v31, 8.507059e+37  ;;  %v1951_v18 = vadd.f32 1.1283791, %v1950_v1 }
 0x305   : > { %v2729_v44 = vadd.f32 1.0, %v4289_v60  ;;  %v1931_v23 = vsel %vm1930_vm15, %v4618_v33, %v1927_v35  ;;  %v1964_v15 = vmul.f32 %v4622_v16, %v6949_v59  ;;  %v719_v55 = vmul.f32 %v678_v54, %v5234_v20  ;;  %v680_v54 = vpop.xlane.xlu0 %679 }
 0x306   : > { %v1936_v48 = vsel %vm1933_vm0, %v1935_v3, %v1931_v23  ;;  %3081 = vadd.xlane.f32.xlu1 %v3080_v21  ;;  %4623 = vrcp.f32 %v6973_v37  ;;  %v2667_v41 = vadd.f32 0.05243302, %v2666_v58  ;;  %v2760_v0 = vmul.f32 %v2728_v30, %v6639_v7 }
 0x307   : > { %v2761_v61 = vmul.f32 %v2729_v44, %v6646_v9  ;;  %v1965_v36 = vsub.f32 1.0, %v1964_v15  ;;  %v972_v38 = vmul.f32 %v6971_v42, %v6939_v14  ;;  %v1972_v33 = vand.u32 2147483647, %v6949_v59 }
 0x308   : > { %v1974_v47 = vand.u32 2147483648, %v6949_v59  ;;  %v2678_v19 = vadd.f32 0.112945676, %v2677_v24  ;;  %vm967_vm1 = vweird.f32 %v6491_v46  ;;  %vm968_vm2 = vweird.f32 %v6548_v28 }
 0x309   : > { %v6991_v2 = vpack.c.bf16 %v2761_v61, %v2760_v0  ;;  %v1937_v8 = vmul.f32 %v1936_v48, %v6911_v6  ;;  %v1966_v7 = vmul.f32 %v4622_v16, %v1965_v36  ;;  %vm1969_vm3 = vweird.f32 %v4622_v16  ;;  %vm7035_vm8 = vmor %vm967_vm1, %vm968_vm2 }
 0x30a   : > { %v8736_v9 = vsub.f32 1.5, %v6615_v11  ;;  %v1368_v43 = vmul.f32 0.5, %v6509_v10  ;;  %v7000_v53 = vadd.f32 1e-05, %v719_v55  ;;  %v2679_v29 = vmul.f32 %v2678_v19, %v6888_v52  ;;  %v2908_v10 = vpop.f32.mrf.mxu1 }
 0x30b   : > { %v1952_v22 = vmul.f32 %v1951_v18, %v6600_v17  ;;  %v2629_v40 = vadd.f32 0.18741608, %v2628_v57  ;;  %2960 = vmatmul.bf16.gmra.mxu3 %v6991_v2  ;;  %v1967_v31 = vadd.f32 %v4622_v16, %v1966_v7  ;;  %vm1968_vm4 = vweird.f32 %v6949_v59  ;;  %v2997_v57 = vpop.f32.mrf.mxu2 }
 0x30c   : > { %v6997_v1 = vmul.f32 %v6548_v28, %v8736_v9  ;;  %v4624_v6 = vpop.eup %4623  ;;  %v2668_v11 = vmul.f32 %v2667_v41, %v6888_v52  ;;  %v973_v12 = vmul.f32 %v6971_v42, %v972_v38  ;;  %vm1970_vm5 = vmor %vm1968_vm4, %vm1969_vm3  ;;  %v1975_v58 = vor.u32 1.1754944e-38, %v1974_v47 }
 0x30d   : > { %v2680_v60 = vadd.f32 0.4994258, %v2679_v29  ;;  %v4272_v30 = vclamps-f32 %v1937_v8, 1.0  ;;  %v1971_v35 = vsel %vm1970_vm5, %v4622_v16, %v1967_v31  ;;  %vm1973_vm6 = vcmp.eq.f32.partialorder %v1972_v33, 8.507059e+37  ;;  %v8737_v16 = vld [vmem:[#allocation19_spill] sm:$0xff] }
 0x30e   : > { %v2644_v17 = vmul.f32 %v4624_v6, %v6973_v37  ;;  %v1976_v3 = vsel %vm1973_vm6, %v1975_v58, %v1971_v35  ;;  %4625 = vrsqrt.f32 %v7000_v53  ;;  %v720_v21 = vmul.f32 %v680_v54, %v5234_v20  ;;  %v4726_v31 = vld [vmem:[#allocation7] ss:$0 sm:$0xff] }
 0x30f   : > { %v2681_v59 = vmul.f32 %v2680_v60, %v6888_v52  ;;  %v1977_v24 = vmul.f32 %v1976_v3, %v1952_v22  ;;  %v7013_v44 = vadd.f32 %v2908_v10, %v6708_v63  ;;  %v7016_v15 = vadd.f32 %v2997_v57, %v6710_v27 }
 0x310   : > { %v2645_v23 = vsub.f32 1.0, %v2644_v17  ;;  %v1369_v18 = vmul.f32 0.5, %v8737_v16  ;;  %v974_v48 = vmul.f32 0.5, %v973_v12  ;;  %v7021_v41 = vadd.f32 1e-05, %v720_v21  ;;  %v8742_v17 = vld [vmem:[#allocation22_spill] sm:$0xff] }
 0x311   : > { %v7019_v55 = vadd.f32 1.0, %v2681_v59  ;;  %v4273_v0 = vclamps-f32 %v1977_v24, 1.0  ;;  %v2712_v61 = vadd.f32 1.0, %v4272_v30  ;;  %v3083_v20 = vadd.f32 %v7016_v15, %v7013_v44 }
 0x312   : > { %v2646_v36 = vmul.f32 %v4624_v6, %v2645_v23  ;;  %v2630_v38 = vmul.f32 %v2629_v40, %v6692_v13  ;;  %v2669_v33 = vadd.f32 0.18741608, %v2668_v11  ;;  %vm2649_vm7 = vweird.f32 %v4624_v6 }
 0x313   : > { %4627 = vrcp.f32 %v7019_v55  ;;  %v2713_v47 = vadd.f32 1.0, %v4273_v0  ;;  %v2654_v8 = vand.u32 2147483648, %v6973_v37  ;;  %3084 = vadd.xlane.f32.xlu2 %v3083_v20  ;;  %vm2648_vm9 = vweird.f32 %v6973_v37 }
 0x314   : > { %v2647_v19 = vadd.f32 %v4624_v6, %v2646_v36  ;;  %4629 = vrsqrt.f32 %v7021_v41  ;;  %v7029_v7 = vpop.eup %4625  ;;  %v2652_v13 = vand.u32 2147483647, %v6973_v37  ;;  %v975_v29 = vsub.f32 1.5, %v974_v48  ;;  %vm7041_vm10 = vmor %vm2648_vm9, %vm2649_vm7  ;;  %v8744_v36 = vld [vmem:[#allocation24_spill] sm:$0xff] }
 0x315   : > { %v2744_v22 = vmul.f32 %v2712_v61, %v1368_v43  ;;  %v2745_v40 = vmul.f32 %v2713_v47, %v1369_v18  ;;  %v2631_v11 = vadd.f32 1.1283791, %v2630_v38  ;;  %v2670_v46 = vmul.f32 %v2669_v33, %v6888_v52  ;;  %v1311_v18 = vpop.f32.mrf.mxu0  ;;  %v4725_v38 = vld [vmem:[#allocation5] ss:$0 sm:$0xff] }
 0x316   : > { %v2651_v12 = vsel %vm7041_vm10, %v4624_v6, %v2647_v19  ;;  %v2655_v10 = vor.u32 1.1754944e-38, %v2654_v8  ;;  %v970_v37 = vsel %vm7035_vm8, %v6548_v28, %v6997_v1  ;;  %v982_v43 = vmul.f32 %v7029_v7, %v7000_v53  ;;  %v8743_v1 = vld [vmem:[#allocation23_spill] sm:$0xff] }
 0x317   : > { %v2770_v58 = vpack.c.bf16 %v2745_v40, %v2744_v22  ;;  %vm2653_vm11 = vcmp.eq.f32.partialorder %v2652_v13, 8.507059e+37  ;;  %v976_v35 = vmul.f32 %v6971_v42, %v975_v29  ;;  %vm978_vm12 = vweird.f32 %v6971_v42 }
 0x318   : > { %v2656_v52 = vsel %vm2653_vm11, %v2655_v10, %v2651_v12  ;;  %v2632_v54 = vmul.f32 %v2631_v11, %v8742_v17  ;;  %v1101_v57 = vmul.f32 %v970_v37, %v8743_v1  ;;  %v2671_v3 = vadd.f32 1.1283791, %v2670_v46 }
 0x319   : > { %v4628_v60 = vpop.eup %4627  ;;  %2920 = vmatmul.bf16.gmra.mxu1 %v2770_v58  ;;  %3009 = vmatmul.bf16.gmra.mxu2 %v2770_v58  ;;  %vm977_vm13 = vweird.f32 %v6939_v14  ;;  %v983_v21 = vmul.f32 %v7029_v7, %v982_v43  ;;  %v2692_v23 = vand.u32 2147483647, %v7019_v55  ;;  %v2694_v16 = vand.u32 2147483648, %v7019_v55  ;;  %v8745_v43 = vld [vmem:[#allocation20_spill] sm:$0xff] }
 0x31a   : > { %v7054_v30 = vpop.eup %4629  ;;  %v2684_v6 = vmul.f32 %v4628_v60, %v7019_v55  ;;  %vm979_vm14 = vmor %vm977_vm13, %vm978_vm12  ;;  %v2657_v24 = vmul.f32 %v2656_v52, %v2632_v54  ;;  %vm2689_vm15 = vweird.f32 %v4628_v60  ;;  %v1136_v14 = vmul.f32 %v4725_v38, %v1101_v57 }
 0x31b   : > { %v992_v28 = vmul.f32 %v7054_v30, %v7021_v41  ;;  %v980_v61 = vsel %vm979_vm14, %v6971_v42, %v976_v35  ;;  %vm2688_vm0 = vweird.f32 %v7019_v55  ;;  %v2672_v47 = vmul.f32 %v2671_v3, %v6839_v32 }
 0x31c   : > { %v2685_v59 = vsub.f32 1.0, %v2684_v6  ;;  %v1102_v20 = vmul.f32 %v980_v61, %v8744_v36  ;;  %v984_v19 = vmul.f32 0.5, %v983_v21  ;;  %vm2690_vm1 = vmor %vm2688_vm0, %vm2689_vm15  ;;  %v2695_v8 = vor.u32 1.1754944e-38, %v2694_v16 }
 0x31d   : > { %v993_v0 = vmul.f32 %v7054_v30, %v992_v28  ;;  %v4290_v13 = vclamps-f32 %v2657_v24, 1.0  ;;  %vm2693_vm2 = vcmp.eq.f32.partialorder %v2692_v23, 8.507059e+37  ;;  %v1171_v42 = vadd.f32 %v4726_v31, %v1136_v14  ;;  %v1313_v32 = vpop.f32.mrf.mxu0  ;;  %v8746_v23 = vld [vmem:[#allocation25_spill] sm:$0xff] }
 0x31e   : > { %v2686_v48 = vmul.f32 %v4628_v60, %v2685_v59  ;;  %v1137_v9 = vmul.f32 %v4725_v38, %v1102_v20  ;;  %v985_v46 = vsub.f32 1.5, %v984_v19  ;;  %v1386_v35 = vmul.f32 0.5, %v8745_v43 }
 0x31f   : > { %v994_v22 = vmul.f32 0.5, %v993_v0  ;;  %v2730_v37 = vadd.f32 1.0, %v4290_v13  ;;  %v1387_v52 = vmul.f32 0.5, %v6772_v50  ;;  %vm987_vm3 = vweird.f32 %v7000_v53 }
 0x320   : > { %v2687_v33 = vadd.f32 %v4628_v60, %v2686_v48  ;;  %v1172_v11 = vadd.f32 %v4726_v31, %v1137_v9  ;;  %v986_v54 = vmul.f32 %v7029_v7, %v985_v46  ;;  %vm988_vm4 = vweird.f32 %v7029_v7 }
 0x321   : > { %v995_v55 = vsub.f32 1.5, %v994_v22  ;;  %vm998_vm5 = vweird.f32 %v7054_v30  ;;  %v2762_v28 = vmul.f32 %v2730_v37, %v1386_v35  ;;  %vm989_vm6 = vmor %vm987_vm3, %vm988_vm4  ;;  %vm997_vm7 = vweird.f32 %v7021_v41 }
 0x322   : > { %v2691_v29 = vsel %vm2690_vm1, %v4628_v60, %v2687_v33  ;;  %v1193_v58 = vpack.c.bf16 %v1172_v11, %v1171_v42  ;;  %v7074_v60 = vld [vmem:[#allocation10] ss:$0 sm:$0xff]  ;;  %vm999_vm8 = vmor %vm997_vm7, %vm998_vm5  ;;  %v990_v21 = vsel %vm989_vm6, %v7029_v7, %v986_v54 }
 0x323   : > { %v2696_v40 = vsel %vm2693_vm2, %v2695_v8, %v2691_v29  ;;  %v7077_v17 = vadd.f32 %v7074_v60, %v1311_v18  ;;  %v996_v57 = vmul.f32 %v7054_v30, %v995_v55  ;;  %v7085_v50 = vadd.f32 %v7074_v60, %v1313_v32  ;;  %v8747_v18 = vld [vmem:[#allocation26_spill] sm:$0xff]  ;;  %v8748_v29 = vld [vmem:[#allocation21_spill] sm:$0xff] }
 0x324   : > { %v2697_v12 = vmul.f32 %v2696_v40, %v2672_v47  ;;  %1325 = vmatmul.bf16.gmra.mxu0 %v1193_v58  ;;  %v1103_v16 = vmul.f32 %v990_v21, %v8746_v23 }
 0x325   : > { %v7091_v59 = vmul.f32 0.70710677, %v7077_v17  ;;  %v7095_v53 = vmul.f32 0.70710677, %v7085_v50  ;;  %v1000_v24 = vsel %vm999_vm8, %v7054_v30, %v996_v57  ;;  %v1316_v47 = vpop.f32.mrf.mxu0 }
 0x326   : > { %v4291_v10 = vclamps-f32 %v2697_v12, 1.0  ;;  %v1104_v48 = vmul.f32 %v1000_v24, %v8747_v18  ;;  %v1138_v0 = vmul.f32 %v4725_v38, %v1103_v16  ;;  %v7108_v8 = vadd.f32 %v7074_v60, %v1316_v47 }
 0x327   : > { %v1980_v41 = vmul.f32 %v7091_v59, %v7091_v59  ;;  %v2020_v36 = vmul.f32 %v7095_v53, %v7095_v53 }
 0x328   : > { %v2731_v6 = vadd.f32 1.0, %v4291_v10  ;;  %v1139_v61 = vmul.f32 %v4725_v38, %v1104_v48  ;;  %v1173_v20 = vadd.f32 %v4726_v31, %v1138_v0  ;;  %v7112_v38 = vmul.f32 0.70710677, %v7108_v8 }
 0x329   : > { %v1981_v33 = vmin.f32 %v1980_v41, 16.0  ;;  %v7105_v7 = vmin.f32 %v2020_v36, 16.0 }
 0x32a   : > { %v2763_v1 = vmul.f32 %v2731_v6, %v1387_v52  ;;  %v1174_v14 = vadd.f32 %v4726_v31, %v1139_v61  ;;  %v2060_v31 = vmul.f32 %v7112_v38, %v7112_v38 }
 0x32b   : > { %v1982_v30 = vmul.f32 2.1237322e-06, %v1981_v33  ;;  %v2022_v9 = vmul.f32 2.1237322e-06, %v7105_v7  ;;  %v1993_v12 = vmul.f32 3.8918573e-05, %v1981_v33 }
 0x32c   : > { %v7087_v3 = vpack.c.bf16 %v2763_v1, %v2762_v28  ;;  %v1194_v19 = vpack.c.bf16 %v1174_v14, %v1173_v20  ;;  %v7118_v58 = vmin.f32 %v2060_v31, 16.0  ;;  %v2033_v1 = vmul.f32 3.8918573e-05, %v7105_v7 }
 0x32d   : > { %v1983_v13 = vadd.f32 0.00028619796, %v1982_v30  ;;  %v2023_v22 = vadd.f32 0.00028619796, %v2022_v9  ;;  %v1318_v11 = vpop.f32.mrf.mxu0  ;;  %v1994_v10 = vadd.f32 0.001143296, %v1993_v12 }
 0x32e   : > { %2965 = vmatmul.bf16.gmra.mxu3 %v7087_v3  ;;  %v7121_v55 = vadd.f32 %v7074_v60, %v1318_v11  ;;  %v2062_v35 = vmul.f32 2.1237322e-06, %v7118_v58  ;;  %v2034_v16 = vadd.f32 0.001143296, %v2033_v1 }
 0x32f   : > { %v1984_v40 = vmul.f32 %v1983_v13, %v1981_v33  ;;  %v2024_v42 = vmul.f32 %v2023_v22, %v7105_v7  ;;  %v1995_v32 = vmul.f32 %v1994_v10, %v1981_v33 }
 0x330   : > { %v7126_v54 = vmul.f32 0.70710677, %v7121_v55  ;;  %v2063_v21 = vadd.f32 0.00028619796, %v2062_v35  ;;  %v2035_v0 = vmul.f32 %v2034_v16, %v7105_v7 }
 0x331   : > { %v1985_v46 = vadd.f32 0.0036580483, %v1984_v40  ;;  %v2025_v37 = vadd.f32 0.0036580483, %v2024_v42  ;;  %v1996_v52 = vadd.f32 0.014752088, %v1995_v32 }
 0x332   : > { %v2100_v48 = vmul.f32 %v7126_v54, %v7126_v54  ;;  %v2064_v36 = vmul.f32 %v2063_v21, %v7118_v58  ;;  %v2036_v14 = vadd.f32 0.014752088, %v2035_v0 }
 0x333   : > { %v1986_v43 = vmul.f32 %v1985_v46, %v1981_v33  ;;  %v2026_v6 = vmul.f32 %v2025_v37, %v7105_v7  ;;  %v1997_v28 = vmul.f32 %v1996_v52, %v1981_v33 }
 0x334   : > { %1330 = vmatmul.bf16.gmra.mxu0 %v1194_v19  ;;  %v7135_v19 = vmin.f32 %v2100_v48, 16.0  ;;  %v2037_v9 = vmul.f32 %v2036_v14, %v7105_v7 }
 0x335   : > { %v1987_v57 = vadd.f32 0.05243302, %v1986_v43  ;;  %v1321_v24 = vpop.f32.mrf.mxu0  ;;  %v1998_v23 = vadd.f32 0.112945676, %v1997_v28  ;;  %v2027_v18 = vadd.f32 0.05243302, %v2026_v6 }
 0x336   : > { %v7140_v22 = vadd.f32 %v7074_v60, %v1321_v24  ;;  %v2038_v31 = vadd.f32 0.112945676, %v2037_v9  ;;  %v2102_v46 = vmul.f32 2.1237322e-06, %v7135_v19  ;;  %v2113_v48 = vmul.f32 3.8918573e-05, %v7135_v19 }
 0x337   : > { %v1999_v41 = vmul.f32 %v1998_v23, %v1981_v33  ;;  %v1988_v61 = vmul.f32 %v1987_v57, %v1981_v33  ;;  %v2028_v47 = vmul.f32 %v2027_v18, %v7105_v7 }
 0x338   : > { %v7147_v37 = vmul.f32 0.70710677, %v7140_v22  ;;  %v2039_v32 = vmul.f32 %v2038_v31, %v7105_v7  ;;  %v2103_v1 = vadd.f32 0.00028619796, %v2102_v46 }
 0x339   : > { %v2000_v20 = vadd.f32 0.4994258, %v1999_v41  ;;  %v1989_v13 = vadd.f32 0.18741608, %v1988_v61  ;;  %v2029_v11 = vadd.f32 0.18741608, %v2028_v47 }
 0x33a   : > { %v2040_v28 = vadd.f32 0.4994258, %v2039_v32 }
 0x33b   : > { %v2001_v30 = vmul.f32 %v2000_v20, %v1981_v33  ;;  %v1990_v10 = vmul.f32 %v1989_v13, %v1981_v33  ;;  %v2030_v6 = vmul.f32 %v2029_v11, %v7105_v7  ;;  %v2140_v33 = vmul.f32 %v7147_v37, %v7147_v37 }
 0x33c   : > { %v2041_v21 = vmul.f32 %v2040_v28, %v7105_v7 }
 0x33d   : > { %v7142_v40 = vadd.f32 1.0, %v2001_v30  ;;  %v1323_v12 = vpop.f32.mrf.mxu0  ;;  %v1991_v57 = vadd.f32 1.1283791, %v1990_v10  ;;  %v2031_v41 = vadd.f32 1.1283791, %v2030_v6  ;;  %v7168_v20 = vmin.f32 %v2140_v33, 16.0 }
 0x33e   : > { %3039 = vmatmul.bf16.vlgmr.msra.gmra.mxu3 %v8748_v29  ;;  %v2065_v29 = vadd.f32 0.0036580483, %v2064_v36  ;;  %v7153_v52 = vadd.f32 %v7074_v60, %v1323_v12  ;;  %v7165_v61 = vadd.f32 1.0, %v2041_v21  ;;  %v2104_v36 = vmul.f32 %v2103_v1, %v7135_v19 }
 0x33f   : > { %4631 = vrcp.f32 %v7142_v40  ;;  %v1992_v30 = vmul.f32 %v1991_v57, %v7091_v59  ;;  %v7177_v13 = vmul.f32 %v2031_v41, %v7095_v53  ;;  %v2012_v46 = vand.u32 2147483647, %v7142_v40 }
 0x340   : > { %v2066_v35 = vmul.f32 %v2065_v29, %v7118_v58  ;;  %v7160_v18 = vmul.f32 0.70710677, %v7153_v52  ;;  %4633 = vrcp.f32 %v7165_v61  ;;  %v2105_v11 = vadd.f32 0.0036580483, %v2104_v36 }
 0x341   : > { %v2142_v10 = vmul.f32 2.1237322e-06, %v7168_v20  ;;  %vm2008_vm10 = vweird.f32 %v7142_v40  ;;  %v2153_v28 = vmul.f32 3.8918573e-05, %v7168_v20  ;;  %vm2013_vm12 = vcmp.eq.f32.partialorder %v2012_v46, 8.507059e+37 }
 0x342   : > { %v2067_v16 = vadd.f32 0.05243302, %v2066_v35  ;;  %vm2048_vm14 = vweird.f32 %v7165_v61 }
 0x343   : > { %v2143_v41 = vadd.f32 0.00028619796, %v2142_v10 }
 0x344   : > { %v2068_v9 = vmul.f32 %v2067_v16, %v7118_v58  ;;  %v2106_v16 = vmul.f32 %v2105_v11, %v7135_v19 }
 0x345   : > { %v4632_v23 = vpop.eup %4631 }
 0x346   : > { %v2004_v0 = vmul.f32 %v4632_v23, %v7142_v40  ;;  %vm2009_vm9 = vweird.f32 %v4632_v23  ;;  %v4634_v1 = vpop.eup %4633  ;;  %v2069_v57 = vadd.f32 0.18741608, %v2068_v9  ;;  %v2052_v9 = vand.u32 2147483647, %v7165_v61 }
 0x347   : > { %vm2010_vm11 = vmor %vm2008_vm10, %vm2009_vm9  ;;  %vm2049_vm13 = vweird.f32 %v4634_v1  ;;  %v2107_v10 = vadd.f32 0.05243302, %v2106_v16 }
 0x348   : > { %v2005_v14 = vsub.f32 1.0, %v2004_v0  ;;  %vm2050_vm15 = vmor %vm2048_vm14, %vm2049_vm13  ;;  %vm2053_vm0 = vcmp.eq.f32.partialorder %v2052_v9, 8.507059e+37 }
 0x34a   : > { %v2006_v31 = vmul.f32 %v4632_v23, %v2005_v14 }
 0x34c   : > { %v2007_v32 = vadd.f32 %v4632_v23, %v2006_v31 }
 0x34e   : > { %3044 = vmatmul.bf16.gmra.mxu3 %v6860_v5  ;;  %v2073_v5 = vmul.f32 3.8918573e-05, %v7118_v58  ;;  %v2011_v33 = vsel %vm2010_vm11, %v4632_v23, %v2007_v32  ;;  %v2144_v32 = vmul.f32 %v2143_v41, %v7168_v20 }
 0x350   : > { %v2074_v42 = vadd.f32 0.001143296, %v2073_v5  ;;  %v2114_v5 = vadd.f32 0.001143296, %v2113_v48  ;;  %v2145_v41 = vadd.f32 0.0036580483, %v2144_v32 }
 0x352   : > { %v2075_v43 = vmul.f32 %v2074_v42, %v7118_v58  ;;  %v2014_v42 = vand.u32 2147483648, %v7142_v40  ;;  %v2115_v6 = vmul.f32 %v2114_v5, %v7135_v19  ;;  %v2044_v40 = vmul.f32 %v4634_v1, %v7165_v61 }
 0x354   : > { %v2076_v24 = vadd.f32 0.014752088, %v2075_v43  ;;  %v2015_v21 = vor.u32 1.1754944e-38, %v2014_v42  ;;  %v2116_v48 = vadd.f32 0.014752088, %v2115_v6 }
 0x356   : > { %v2077_v47 = vmul.f32 %v2076_v24, %v7118_v58  ;;  %v2016_v0 = vsel %vm2013_vm12, %v2015_v21, %v2011_v33  ;;  %v2117_v23 = vmul.f32 %v2116_v48, %v7135_v19 }
 0x357   : > { %v2017_v31 = vmul.f32 %v2016_v0, %v1992_v30 }
 0x358   : > { %v2078_v53 = vadd.f32 0.112945676, %v2077_v47  ;;  %v2045_v47 = vsub.f32 1.0, %v2044_v40  ;;  %v2118_v11 = vadd.f32 0.112945676, %v2117_v23 }
 0x35a   : > { %v2079_v24 = vmul.f32 %v2078_v53, %v7118_v58  ;;  %v2046_v42 = vmul.f32 %v4634_v1, %v2045_v47 }
 0x35b   : > { %v2911_v7 = vpop.f32.mrf.mxu1 }
 0x35c   : > { %v7181_v12 = vadd.f32 %v2911_v7, %v6708_v63  ;;  %v2080_v36 = vadd.f32 0.4994258, %v2079_v24  ;;  %v2154_v7 = vadd.f32 0.001143296, %v2153_v28  ;;  %v2047_v6 = vadd.f32 %v4634_v1, %v2046_v42 }
 0x35d   : > { %v2119_v28 = vmul.f32 %v2118_v11, %v7135_v19  ;;  %v4274_v24 = vclamps-f32 %v2017_v31, 1.0  ;;  %v1370_v31 = vmul.f32 0.5, %v7077_v17  ;;  %v2146_v42 = vmul.f32 %v2145_v41, %v7168_v20 }
 0x35e   : > { %3049 = vmatmul.bf16.gmra.mxu3 %v6991_v2  ;;  %v2180_v2 = vmul.f32 %v7160_v18, %v7160_v18  ;;  %v2081_v5 = vmul.f32 %v2080_v36, %v7118_v58  ;;  %v2051_v16 = vsel %vm2050_vm15, %v4634_v1, %v2047_v6  ;;  %v2070_v36 = vmul.f32 %v2069_v57, %v7118_v58 }
 0x35f   : > { %v2120_v40 = vadd.f32 0.4994258, %v2119_v28  ;;  %v1371_v57 = vmul.f32 0.5, %v7085_v50 }
 0x360   : > { %v7189_v43 = vmin.f32 %v2180_v2, 16.0  ;;  %v2054_v2 = vand.u32 2147483648, %v7165_v61  ;;  %v7206_v53 = vadd.f32 1.0, %v2081_v5  ;;  %v2071_v32 = vadd.f32 1.1283791, %v2070_v36 }
 0x361   : > { %v3000_v29 = vpop.f32.mrf.mxu2 }
 0x362   : > { %v7184_v59 = vadd.f32 %v3000_v29, %v6710_v27  ;;  %v2182_v14 = vmul.f32 2.1237322e-06, %v7189_v43  ;;  %v2155_v29 = vmul.f32 %v2154_v7, %v7168_v20  ;;  %v2193_v46 = vmul.f32 3.8918573e-05, %v7189_v43 }
 0x363   : > { %v2055_v30 = vor.u32 1.1754944e-38, %v2054_v2  ;;  %4635 = vrcp.f32 %v7206_v53  ;;  %v2714_v2 = vadd.f32 1.0, %v4274_v24  ;;  %v2094_v24 = vand.u32 2147483648, %v7206_v53 }
 0x364   : > { %v3086_v35 = vadd.f32 %v7184_v59, %v7181_v12  ;;  %v2194_v33 = vadd.f32 0.001143296, %v2193_v46  ;;  %v2183_v21 = vadd.f32 0.00028619796, %v2182_v14  ;;  %v2108_v14 = vmul.f32 %v2107_v10, %v7135_v19  ;;  %v7227_v46 = vpop.f32.mrf.mxu3 }
 0x365   : > { %v2056_v0 = vsel %vm2053_vm0, %v2055_v30, %v2051_v16  ;;  %v2746_v28 = vmul.f32 %v2714_v2, %v1370_v31  ;;  %v2147_v30 = vadd.f32 0.05243302, %v2146_v42  ;;  %vm2088_vm2 = vweird.f32 %v7206_v53 }
 0x366   : > { %3087 = vadd.xlane.f32.xlu0 %v3086_v35  ;;  %v2156_v35 = vadd.f32 0.014752088, %v2155_v29  ;;  %v2195_v61 = vmul.f32 %v2194_v33, %v7189_v43  ;;  %v2057_v7 = vmul.f32 %v2056_v0, %v7177_v13  ;;  %v2184_v47 = vmul.f32 %v2183_v21, %v7189_v43 }
 0x367   : > { %v2148_v2 = vmul.f32 %v2147_v30, %v7168_v20 }
 0x368   : > { %v2157_v48 = vmul.f32 %v2156_v35, %v7168_v20  ;;  %v2196_v23 = vadd.f32 0.014752088, %v2195_v61  ;;  %v4275_v1 = vclamps-f32 %v2057_v7, 1.0  ;;  %v2109_v35 = vadd.f32 0.18741608, %v2108_v14 }
 0x369   : > { %v4636_v29 = vpop.eup %4635  ;;  %v2185_v6 = vadd.f32 0.0036580483, %v2184_v47  ;;  %v2095_v14 = vor.u32 1.1754944e-38, %v2094_v24 }
 0x36a   : > { %v2158_v9 = vadd.f32 0.112945676, %v2157_v48  ;;  %v2197_v13 = vmul.f32 %v2196_v23, %v7189_v43  ;;  %v2715_v11 = vadd.f32 1.0, %v4275_v1  ;;  %v2084_v10 = vmul.f32 %v4636_v29, %v7206_v53 }
 0x36b   : > { %vm2089_vm1 = vweird.f32 %v4636_v29  ;;  %v2092_v48 = vand.u32 2147483647, %v7206_v53  ;;  %v2186_v41 = vmul.f32 %v2185_v6, %v7189_v43  ;;  %v2110_v7 = vmul.f32 %v2109_v35, %v7135_v19 }
 0x36c   : > { %v2159_v58 = vmul.f32 %v2158_v9, %v7168_v20  ;;  %v2747_v17 = vmul.f32 %v2715_v11, %v1371_v57  ;;  %v2085_v33 = vsub.f32 1.0, %v2084_v10  ;;  %v2198_v16 = vadd.f32 0.112945676, %v2197_v13  ;;  %vm2090_vm3 = vmor %vm2088_vm2, %vm2089_vm1  ;;  %v7241_v57 = vpop.f32.mrf.mxu3 }
 0x36d   : > { %v2072_v1 = vmul.f32 %v2071_v32, %v7112_v38  ;;  %vm2093_vm4 = vcmp.eq.f32.partialorder %v2092_v48, 8.507059e+37  ;;  %v2187_v42 = vadd.f32 0.05243302, %v2186_v41  ;;  %v2111_v13 = vadd.f32 1.1283791, %v2110_v7 }
 0x36e   : > { %3054 = vmatmul.bf16.gmra.mxu3 %v7087_v3  ;;  %v2121_v3 = vmul.f32 %v2120_v40, %v7135_v19  ;;  %v2160_v21 = vadd.f32 0.4994258, %v2159_v58  ;;  %v2771_v40 = vpack.c.bf16 %v2747_v17, %v2746_v28  ;;  %v2086_v50 = vmul.f32 %v4636_v29, %v2085_v33 }
 0x36f   : > { %v2199_v61 = vmul.f32 %v2198_v16, %v7189_v43  ;;  %v2149_v32 = vadd.f32 0.18741608, %v2148_v2  ;;  %v2112_v17 = vmul.f32 %v2111_v13, %v7126_v54 }
 0x370   : > { %v7220_v5 = vadd.f32 1.0, %v2121_v3  ;;  %v2161_v0 = vmul.f32 %v2160_v21, %v7168_v20  ;;  %2925 = vmatmul.bf16.gmra.mxu1 %v2771_v40  ;;  %3014 = vmatmul.bf16.gmra.mxu2 %v2771_v40  ;;  %v2087_v3 = vadd.f32 %v4636_v29, %v2086_v50 }
 0x371   : > { %v2200_v23 = vadd.f32 0.4994258, %v2199_v61  ;;  %v2150_v16 = vmul.f32 %v2149_v32, %v7168_v20 }
 0x372   : > { %4637 = vrcp.f32 %v7220_v5  ;;  %v2162_v9 = vadd.f32 1.0, %v2161_v0  ;;  %v2091_v31 = vsel %vm2090_vm3, %v4636_v29, %v2087_v3  ;;  %v2132_v53 = vand.u32 2147483647, %v7220_v5 }
 0x373   : > { %v2096_v58 = vsel %vm2093_vm4, %v2095_v14, %v2091_v31  ;;  %v2134_v11 = vand.u32 2147483648, %v7220_v5  ;;  %v2201_v38 = vmul.f32 %v2200_v23, %v7189_v43  ;;  %v2188_v29 = vmul.f32 %v2187_v42, %v7189_v43 }
 0x374   : > { %4639 = vrcp.f32 %v2162_v9  ;;  %v2097_v10 = vmul.f32 %v2096_v58, %v2072_v1  ;;  %vm2128_vm6 = vweird.f32 %v7220_v5  ;;  %vm2133_vm8 = vcmp.eq.f32.partialorder %v2132_v53, 8.507059e+37  ;;  %v7250_v14 = vpop.f32.mrf.mxu3 }
 0x375   : > { %v2202_v28 = vadd.f32 1.0, %v2201_v38  ;;  %v2135_v33 = vor.u32 1.1754944e-38, %v2134_v11  ;;  %v2189_v48 = vadd.f32 0.18741608, %v2188_v29  ;;  %v2151_v3 = vadd.f32 1.1283791, %v2150_v16 }
 0x376   : > { %v4276_v30 = vclamps-f32 %v2097_v10, 1.0  ;;  %v1373_v1 = vmul.f32 0.5, %v7121_v55  ;;  %vm2168_vm10 = vweird.f32 %v2162_v9 }
 0x377   : > { %4641 = vrcp.f32 %v2202_v28  ;;  %v2190_v20 = vmul.f32 %v2189_v48, %v7189_v43  ;;  %v2152_v53 = vmul.f32 %v2151_v3, %v7147_v37  ;;  %v2214_v32 = vand.u32 2147483648, %v2202_v28 }
 0x378   : > { %v4638_v36 = vpop.eup %4637  ;;  %v2716_v7 = vadd.f32 1.0, %v4276_v30  ;;  %v2212_v43 = vand.u32 2147483647, %v2202_v28  ;;  %vm2208_vm14 = vweird.f32 %v2202_v28  ;;  %v1375_v48 = vmul.f32 0.5, %v7153_v52 }
 0x379   : > { %v2124_v47 = vmul.f32 %v4638_v36, %v7220_v5  ;;  %vm2129_vm5 = vweird.f32 %v4638_v36  ;;  %v2174_v5 = vand.u32 2147483648, %v2162_v9 }
 0x37a   : > { %vm2130_vm7 = vmor %vm2128_vm6, %vm2129_vm5  ;;  %v4640_v21 = vpop.eup %4639  ;;  %vm2213_vm0 = vcmp.eq.f32.partialorder %v2212_v43, 8.507059e+37 }
 0x37b   : > { %v2125_v19 = vsub.f32 1.0, %v2124_v47  ;;  %v2164_v50 = vmul.f32 %v4640_v21, %v2162_v9  ;;  %vm2169_vm9 = vweird.f32 %v4640_v21  ;;  %v2172_v47 = vand.u32 2147483647, %v2162_v9 }
 0x37c   : > { %vm2170_vm11 = vmor %vm2168_vm10, %vm2169_vm9  ;;  %v2175_v13 = vor.u32 1.1754944e-38, %v2174_v5  ;;  %v7257_v37 = vpop.f32.mrf.mxu3 }
 0x37d   : > { %v2126_v35 = vmul.f32 %v4638_v36, %v2125_v19  ;;  %v2165_v0 = vsub.f32 1.0, %v2164_v50  ;;  %v4642_v23 = vpop.eup %4641  ;;  %vm2173_vm12 = vcmp.eq.f32.partialorder %v2172_v47, 8.507059e+37  ;;  %v1374_v50 = vmul.f32 0.5, %v7140_v22 }
 0x37e   : > { %v2204_v42 = vmul.f32 %v4642_v23, %v2202_v28  ;;  %vm2209_vm13 = vweird.f32 %v4642_v23 }
 0x37f   : > { %v2127_v6 = vadd.f32 %v4638_v36, %v2126_v35  ;;  %v2166_v54 = vmul.f32 %v4640_v21, %v2165_v0  ;;  %v2191_v35 = vadd.f32 1.1283791, %v2190_v20  ;;  %vm2210_vm15 = vmor %vm2208_vm14, %vm2209_vm13 }
 0x380   : > { %v2205_v10 = vsub.f32 1.0, %v2204_v42 }
 0x381   : > { %v2131_v24 = vsel %vm2130_vm7, %v4638_v36, %v2127_v6  ;;  %v1372_v36 = vmul.f32 0.5, %v7108_v8  ;;  %v2167_v31 = vadd.f32 %v4640_v21, %v2166_v54  ;;  %v2215_v6 = vor.u32 1.1754944e-38, %v2214_v32 }
 0x382   : > { %v2136_v40 = vsel %vm2133_vm8, %v2135_v33, %v2131_v24  ;;  %v2206_v29 = vmul.f32 %v4642_v23, %v2205_v10 }
 0x383   : > { %v2137_v41 = vmul.f32 %v2136_v40, %v2112_v17  ;;  %v2748_v58 = vmul.f32 %v2716_v7, %v1372_v36  ;;  %v2171_v11 = vsel %vm2170_vm11, %v4640_v21, %v2167_v31  ;;  %v2192_v17 = vmul.f32 %v2191_v35, %v7160_v18  ;;  %v2913_v31 = vpop.f32.mrf.mxu1 }
 0x384   : > { %v2176_v8 = vsel %vm2173_vm12, %v2175_v13, %v2171_v11  ;;  %v2207_v9 = vadd.f32 %v4642_v23, %v2206_v29 }
 0x385   : > { %v4277_v61 = vclamps-f32 %v2137_v41, 1.0  ;;  %v2177_v55 = vmul.f32 %v2176_v8, %v2152_v53  ;;  %v7290_v53 = vadd.f32 %v7227_v46, %v6708_v63 }
 0x386   : > { %v2211_v21 = vsel %vm2210_vm15, %v4642_v23, %v2207_v9 }
 0x387   : > { %v2717_v2 = vadd.f32 1.0, %v4277_v61  ;;  %v4278_v33 = vclamps-f32 %v2177_v55, 1.0  ;;  %v2216_v30 = vsel %vm2213_vm0, %v2215_v6, %v2211_v21  ;;  %v7314_v21 = vadd.f32 %v2913_v31, %v6708_v63 }
 0x388   : > { %v2217_v24 = vmul.f32 %v2216_v30, %v2192_v17  ;;  %v7318_v30 = vadd.f32 %v7241_v57, %v6708_v63 }
 0x389   : > { %v2749_v19 = vmul.f32 %v2717_v2, %v1373_v1  ;;  %v2718_v40 = vadd.f32 1.0, %v4278_v33  ;;  %v3002_v2 = vpop.f32.mrf.mxu2  ;;  %8750 = vst [vmem:[#allocation22_spill] sm:$0xff] %v7314_v21 }
 0x38a   : > { %v4279_v16 = vclamps-f32 %v2217_v24, 1.0  ;;  %v7311_v33 = vadd.f32 %v3002_v2, %v6710_v27 }
 0x38b   : > { %v2772_v38 = vpack.c.bf16 %v2749_v19, %v2748_v58  ;;  %v2750_v0 = vmul.f32 %v2718_v40, %v1374_v50  ;;  %v2916_v55 = vpop.f32.mrf.mxu1 }
 0x38c   : > { %v2719_v41 = vadd.f32 1.0, %v4279_v16  ;;  %8749 = vst [vmem:[#allocation19_spill] sm:$0xff] %v7311_v33 }
 0x38d   : > { %2930 = vmatmul.bf16.gmra.mxu1 %v2772_v38  ;;  %3019 = vmatmul.bf16.gmra.mxu2 %v2772_v38 }
 0x38e   : > { %v2751_v28 = vmul.f32 %v2719_v41, %v1375_v48  ;;  %v7261_v7 = vpop.f32.mrf.mxu3 }
 0x390   : > { %v2773_v61 = vpack.c.bf16 %v2751_v28, %v2750_v0  ;;  %v3089_v28 = vadd.f32 %v7311_v33, %v7314_v21 }
 0x391   : > { %v3005_v8 = vpop.f32.mrf.mxu2 }
 0x396   : > { %v7263_v5 = vpop.f32.mrf.mxu3 }
 0x39d   : > { %2935 = vmatmul.bf16.gmra.mxu1 %v2773_v61  ;;  %3024 = vmatmul.bf16.gmra.mxu2 %v2773_v61 }
 0x3a1   : > { %v1326_v18 = vpop.f32.mrf.mxu0 }
 0x3a2   : > { %v7268_v47 = vadd.f32 %v7074_v60, %v1326_v18 }
 0x3a4   : > { %v7271_v22 = vmul.f32 0.70710677, %v7268_v47 }
 0x3a6   : > { %v2220_v36 = vmul.f32 %v7271_v22, %v7271_v22 }
 0x3a8   : > { %v7283_v42 = vmin.f32 %v2220_v36, 16.0  ;;  %v3007_v36 = vpop.f32.mrf.mxu2 }
 0x3a9   : > { %v1328_v3 = vpop.f32.mrf.mxu0 }
 0x3aa   : > { %v7274_v52 = vadd.f32 %v7074_v60, %v1328_v3  ;;  %v2222_v19 = vmul.f32 2.1237322e-06, %v7283_v42  ;;  %v2233_v43 = vmul.f32 3.8918573e-05, %v7283_v42 }
 0x3ac   : > { %v7281_v20 = vmul.f32 0.70710677, %v7274_v52  ;;  %v2223_v29 = vadd.f32 0.00028619796, %v2222_v19  ;;  %v2234_v17 = vadd.f32 0.001143296, %v2233_v43  ;;  %v7349_v43 = vadd.f32 %v2916_v55, %v6708_v63 }
 0x3ae   : > { %v2260_v58 = vmul.f32 %v7281_v20, %v7281_v20  ;;  %v2224_v24 = vmul.f32 %v2223_v29, %v7283_v42  ;;  %v2235_v40 = vmul.f32 %v2234_v17, %v7283_v42  ;;  %v7346_v29 = vadd.f32 %v3005_v8, %v6710_v27 }
 0x3b0   : > { %v7295_v10 = vmin.f32 %v2260_v58, 16.0  ;;  %v2236_v0 = vadd.f32 0.014752088, %v2235_v40  ;;  %v2225_v61 = vadd.f32 0.0036580483, %v2224_v24  ;;  %v2918_v58 = vpop.f32.mrf.mxu1  ;;  %v3092_v55 = vadd.f32 %v7346_v29, %v7349_v43 }
 0x3b1   : > { %v7265_v54 = vpop.f32.mrf.mxu3  ;;  %v1331_v1 = vpop.f32.mrf.mxu0 }
 0x3b2   : > { %v7298_v35 = vadd.f32 %v7074_v60, %v1331_v1  ;;  %v2262_v46 = vmul.f32 2.1237322e-06, %v7295_v10  ;;  %v2237_v18 = vmul.f32 %v2236_v0, %v7283_v42  ;;  %v2273_v3 = vmul.f32 3.8918573e-05, %v7295_v10 }
 0x3b4   : > { %v7305_v9 = vmul.f32 0.70710677, %v7298_v35  ;;  %v2263_v50 = vadd.f32 0.00028619796, %v2262_v46  ;;  %v2238_v19 = vadd.f32 0.112945676, %v2237_v18  ;;  %v2226_v46 = vmul.f32 %v2225_v61, %v7283_v42 }
 0x3b6   : > { %v2300_v48 = vmul.f32 %v7305_v9, %v7305_v9  ;;  %v2264_v1 = vmul.f32 %v2263_v50, %v7295_v10  ;;  %v2239_v24 = vmul.f32 %v2238_v19, %v7283_v42 }
 0x3b8   : > { %v7337_v2 = vmin.f32 %v2300_v48, 16.0  ;;  %v2265_v40 = vadd.f32 0.0036580483, %v2264_v1  ;;  %v2240_v8 = vadd.f32 0.4994258, %v2239_v24 }
 0x3b9   : > { %v7276_v23 = vpop.f32.mrf.mxu3  ;;  %v1333_v38 = vpop.f32.mrf.mxu0 }
 0x3ba   : > { %v7308_v6 = vadd.f32 %v7074_v60, %v1333_v38  ;;  %v4998_v38 = vmov 256.0   ;;  %v2302_v50 = vmul.f32 2.1237322e-06, %v7337_v2  ;;  %v2241_v61 = vmul.f32 %v2240_v8, %v7283_v42 }
 0x3bb   : > { %4643 = vrcp.f32 %v4998_v38  ;;  %v7377_v8 = vadd.f32 %v2918_v58, %v6708_v63 }
 0x3bc   : > { %v7328_v41 = vmul.f32 0.70710677, %v7308_v6  ;;  %v2303_v19 = vadd.f32 0.00028619796, %v2302_v50  ;;  %v7371_v38 = vadd.f32 1.0, %v2241_v61 }
 0x3bd   : > { %8754 = vst [vmem:[#allocation25_spill] sm:$0xff] %v7377_v8 }
 0x3be   : > { %v2340_v31 = vmul.f32 %v7328_v41, %v7328_v41  ;;  %4645 = vrcp.f32 %v7371_v38  ;;  %vm2248_vm2 = vweird.f32 %v7371_v38 }
 0x3c1   : > { %v3040_v13 = vpop.f32.mrf.mxu3  ;;  %v7367_v1 = vpop.eup %4643 }
 0x3c2   : > { %v7293_v11 = vadd.f32 %v3040_v13, %v6710_v27  ;;  %v2274_v13 = vadd.f32 0.001143296, %v2273_v3  ;;  %v2313_v3 = vmul.f32 3.8918573e-05, %v7337_v2  ;;  %v7391_v58 = vmul.f32 256.0, %v7367_v1 }
 0x3c3   : > { %vm3163_vm9 = vweird.f32 %v7367_v1 }
 0x3c4   : > { %v3134_v32 = vadd.f32 %v7293_v11, %v7290_v53  ;;  %v2314_v24 = vadd.f32 0.001143296, %v2313_v3 }
 0x3c6   : > { %3135 = vadd.xlane.f32.xlu1 %v3134_v32  ;;  %v7343_v32 = vadd.f32 %v7250_v14, %v6708_v63  ;;  %v7358_v14 = vmin.f32 %v2340_v31, 16.0  ;;  %v2266_v31 = vmul.f32 %v2265_v40, %v7295_v10  ;;  %v2921_v40 = vpop.f32.mrf.mxu1 }
 0x3c8   : > { %8751 = vst [vmem:[#allocation23_spill] sm:$0xff] %v7343_v32 }
 0x3c9   : > { %v3042_v16 = vpop.f32.mrf.mxu3 }
 0x3ca   : > { %v7323_v60 = vadd.f32 %v3042_v16, %v6710_v27  ;;  %v2275_v16 = vmul.f32 %v2274_v13, %v7295_v10  ;;  %v2342_v13 = vmul.f32 2.1237322e-06, %v7358_v14 }
 0x3cc   : > { %v3137_v57 = vadd.f32 %v7323_v60, %v7318_v30  ;;  %v2276_v0 = vadd.f32 0.014752088, %v2275_v16  ;;  %v3010_v16 = vpop.f32.mrf.mxu2  ;;  %v2343_v3 = vadd.f32 0.00028619796, %v2342_v13 }
 0x3ce   : > { %3138 = vadd.xlane.f32.xlu2 %v3137_v57  ;;  %3090 = vadd.xlane.f32.xlu1 %v3089_v28  ;;  %v2227_v28 = vadd.f32 0.05243302, %v2226_v46  ;;  %v2277_v18 = vmul.f32 %v2276_v0, %v7295_v10  ;;  %v7374_v46 = vadd.f32 %v3007_v36, %v6710_v27  ;;  %v7381_v0 = vadd.f32 %v7257_v37, %v6708_v63 }
 0x3cf   : > { %v2304_v37 = vmul.f32 %v2303_v19, %v7337_v2 }
 0x3d0   : > { %8753 = vst [vmem:[#allocation20_spill] sm:$0xff] %v7374_v46  ;;  %v2228_v50 = vmul.f32 %v2227_v28, %v7283_v42  ;;  %v3095_v33 = vadd.f32 %v7374_v46, %v7377_v8 }
 0x3d1   : > { %v3045_v17 = vpop.f32.mrf.mxu3  ;;  %8755 = vst [vmem:[#allocation26_spill] sm:$0xff] %v7381_v0 }
 0x3d2   : > { %v7356_v48 = vadd.f32 %v3045_v17, %v6710_v27  ;;  %v2278_v17 = vadd.f32 0.112945676, %v2277_v18  ;;  %v2315_v18 = vmul.f32 %v2314_v24, %v7337_v2  ;;  %v2353_v24 = vmul.f32 3.8918573e-05, %v7358_v14 }
 0x3d4   : > { %8752 = vst [vmem:[#allocation24_spill] sm:$0xff] %v7356_v48  ;;  %v3140_v57 = vadd.f32 %v7356_v48, %v7343_v32  ;;  %v2279_v36 = vmul.f32 %v2278_v17, %v7295_v10  ;;  %v2316_v21 = vadd.f32 0.014752088, %v2315_v18  ;;  %v2229_v17 = vadd.f32 0.18741608, %v2228_v50 }
 0x3d5   : > { %v2344_v18 = vmul.f32 %v2343_v3, %v7358_v14  ;;  %v3012_v3 = vpop.f32.mrf.mxu2 }
 0x3d6   : > { %3093 = vadd.xlane.f32.xlu2 %v3092_v55  ;;  %3141 = vadd.xlane.f32.xlu0 %v3140_v57  ;;  %v2267_v57 = vadd.f32 0.05243302, %v2266_v31  ;;  %v2280_v31 = vadd.f32 0.4994258, %v2279_v36  ;;  %v2317_v13 = vmul.f32 %v2316_v21, %v7337_v2  ;;  %v2305_v36 = vadd.f32 0.0036580483, %v2304_v37 }
 0x3d7   : > { %v2230_v21 = vmul.f32 %v2229_v17, %v7283_v42  ;;  %v2345_v50 = vadd.f32 0.0036580483, %v2344_v18 }
 0x3d8   : > { %v2268_v48 = vmul.f32 %v2267_v57, %v7295_v10  ;;  %v2281_v19 = vmul.f32 %v2280_v31, %v7295_v10  ;;  %v2318_v57 = vadd.f32 0.112945676, %v2317_v13  ;;  %v2923_v13 = vpop.f32.mrf.mxu1 }
 0x3d9   : > { %v3047_v55 = vpop.f32.mrf.mxu3  ;;  %v2231_v18 = vadd.f32 1.1283791, %v2230_v21 }
 0x3da   : > { %v7386_v61 = vadd.f32 %v3047_v55, %v6710_v27  ;;  %v7399_v55 = vadd.f32 %v3010_v16, %v6710_v27  ;;  %v2354_v16 = vadd.f32 0.001143296, %v2353_v24  ;;  %v7411_v8 = vadd.f32 1.0, %v2281_v19 }
 0x3db   : > { %v2269_v31 = vadd.f32 0.18741608, %v2268_v48  ;;  %v2319_v42 = vmul.f32 %v2318_v57, %v7337_v2  ;;  %v2254_v48 = vand.u32 2147483648, %v7371_v38 }
 0x3dc   : > { %8756 = vst [vmem:[#allocation21_spill] sm:$0xff] %v7386_v61  ;;  %v3143_v28 = vadd.f32 %v7386_v61, %v7381_v0  ;;  %v4646_v61 = vpop.eup %4645  ;;  %v7406_v0 = vadd.f32 %v2921_v40, %v6708_v63  ;;  %v2355_v37 = vmul.f32 %v2354_v16, %v7358_v14  ;;  %4647 = vrcp.f32 %v7411_v8 }
 0x3dd   : > { %8757 = vst [vmem:[#allocation31_spill] sm:$0xff] %v7399_v55  ;;  %v2244_v46 = vmul.f32 %v4646_v61, %v7371_v38  ;;  %vm2249_vm1 = vweird.f32 %v4646_v61  ;;  %v7431_v16 = vadd.f32 %v3012_v3, %v6710_v27  ;;  %v2294_v3 = vand.u32 2147483648, %v7411_v8 }
 0x3de   : > { %3144 = vadd.xlane.f32.xlu1 %v3143_v28  ;;  %3096 = vadd.xlane.f32.xlu0 %v3095_v33  ;;  %8758 = vst [vmem:[#allocation32_spill] sm:$0xff] %v7406_v0  ;;  %v7415_v33 = vadd.f32 %v7261_v7, %v6708_v63  ;;  %v3098_v40 = vadd.f32 %v7399_v55, %v7406_v0  ;;  %v2356_v17 = vadd.f32 0.014752088, %v2355_v37  ;;  %vm7440_vm3 = vmor %vm2248_vm2, %vm2249_vm1  ;;  %vm2288_vm6 = vweird.f32 %v7411_v8 }
 0x3df   : > { %v2245_v19 = vsub.f32 1.0, %v2244_v46  ;;  %v2306_v7 = vmul.f32 %v2305_v36, %v7337_v2  ;;  %v2252_v46 = vand.u32 2147483647, %v7371_v38  ;;  %v7436_v36 = vadd.f32 %v2923_v13, %v6708_v63 }
 0x3e0   : > { %v2357_v32 = vmul.f32 %v2356_v17, %v7358_v14  ;;  %v2270_v37 = vmul.f32 %v2269_v31, %v7295_v10  ;;  %v7447_v13 = vadd.f32 %v7263_v5, %v6708_v63 }
 0x3e1   : > { %v3050_v28 = vpop.f32.mrf.mxu3  ;;  %v2246_v0 = vmul.f32 %v4646_v61, %v2245_v19  ;;  %v2307_v19 = vadd.f32 0.05243302, %v2306_v7  ;;  %v3101_v21 = vadd.f32 %v7431_v16, %v7436_v36  ;;  %vm2253_vm4 = vcmp.eq.f32.partialorder %v2252_v46, 8.507059e+37 }
 0x3e2   : > { %v7422_v24 = vadd.f32 %v3050_v28, %v6710_v27  ;;  %v2320_v28 = vadd.f32 0.4994258, %v2319_v42  ;;  %v4648_v17 = vpop.eup %4647  ;;  %8762 = vst [vmem:[#allocation34_spill] sm:$0xff] %v7447_v13 }
 0x3e3   : > { %v2247_v57 = vadd.f32 %v4646_v61, %v2246_v0  ;;  %v2255_v0 = vor.u32 1.1754944e-38, %v2254_v48  ;;  %vm2289_vm5 = vweird.f32 %v4648_v17 }
 0x3e4   : > { %8759 = vst [vmem:[#allocation33_spill] sm:$0xff] %v7422_v24  ;;  %v3146_v55 = vadd.f32 %v7422_v24, %v7415_v33  ;;  %v2321_v42 = vmul.f32 %v2320_v28, %v7337_v2  ;;  %v2358_v24 = vadd.f32 0.112945676, %v2357_v32  ;;  %v2232_v32 = vmul.f32 %v2231_v18, %v7271_v22  ;;  %vm2290_vm7 = vmor %vm2288_vm6, %vm2289_vm5 }
 0x3e5   : > { %v2251_v38 = vsel %vm7440_vm3, %v4646_v61, %v2247_v57  ;;  %v2271_v28 = vadd.f32 1.1283791, %v2270_v37  ;;  %v2308_v61 = vmul.f32 %v2307_v19, %v7337_v2  ;;  %v8764_v37 = vsub.f32 1.0, %v7391_v58 }
 0x3e6   : > { %3147 = vadd.xlane.f32.xlu2 %v3146_v55  ;;  %3099 = vadd.xlane.f32.xlu1 %v3098_v40  ;;  %v2346_v55 = vmul.f32 %v2345_v50, %v7358_v14  ;;  %v2284_v40 = vmul.f32 %v4648_v17, %v7411_v8  ;;  %v7455_v31 = vadd.f32 1.0, %v2321_v42  ;;  %v2256_v7 = vsel %vm2253_vm4, %v2255_v0, %v2251_v38 }
 0x3e7   : > { %v2359_v50 = vmul.f32 %v2358_v24, %v7358_v14  ;;  %v2257_v22 = vmul.f32 %v2256_v7, %v2232_v32  ;;  %v2292_v38 = vand.u32 2147483647, %v7411_v8  ;;  %v3161_v19 = vmul.f32 %v7367_v1, %v8764_v37 }
 0x3e8   : > { %v2285_v48 = vsub.f32 1.0, %v2284_v40  ;;  %4649 = vrcp.f32 %v7455_v31  ;;  %v2347_v57 = vadd.f32 0.05243302, %v2346_v55  ;;  %v2272_v0 = vmul.f32 %v2271_v28, %v7281_v20 }
 0x3e9   : > { %v3052_v10 = vpop.f32.mrf.mxu3  ;;  %v2360_v42 = vadd.f32 0.4994258, %v2359_v50  ;;  %v2295_v40 = vor.u32 1.1754944e-38, %v2294_v3  ;;  %vm2293_vm8 = vcmp.eq.f32.partialorder %v2292_v38, 8.507059e+37  ;;  %v7479_v58 = vadd.f32 %v7265_v54, %v6708_v63 }
 0x3ea   : > { %v7459_v5 = vadd.f32 %v3052_v10, %v6710_v27  ;;  %v2286_v18 = vmul.f32 %v4648_v17, %v2285_v48  ;;  %v2309_v10 = vadd.f32 0.18741608, %v2308_v61  ;;  %v4280_v48 = vclamps-f32 %v2257_v22, 1.0 }
 0x3eb   : > { %v2361_v24 = vmul.f32 %v2360_v42, %v7358_v14  ;;  %8765 = vst [vmem:[#allocation36_spill] sm:$0xff] %v7479_v58  ;;  %v3162_v61 = vadd.f32 %v7367_v1, %v3161_v19  ;;  %v2334_v38 = vand.u32 2147483648, %v7455_v31  ;;  %v2332_v37 = vand.u32 2147483647, %v7455_v31 }
 0x3ec   : > { %8763 = vst [vmem:[#allocation35_spill] sm:$0xff] %v7459_v5  ;;  %v3149_v46 = vadd.f32 %v7459_v5, %v7447_v13  ;;  %v2287_v55 = vadd.f32 %v4648_v17, %v2286_v18  ;;  %v2720_v18 = vadd.f32 1.0, %v4280_v48  ;;  %vm2328_vm11 = vweird.f32 %v7455_v31 }
 0x3ed   : > { %v7474_v32 = vadd.f32 1.0, %v2361_v24  ;;  %v7494_v19 = vsel %vm3163_vm9, %v7367_v1, %v3162_v61  ;;  %vm2333_vm13 = vcmp.eq.f32.partialorder %v2332_v37, 8.507059e+37 }
 0x3ee   : > { %3102 = vadd.xlane.f32.xlu2 %v3101_v21  ;;  %3150 = vadd.xlane.f32.xlu0 %v3149_v46  ;;  %v4650_v7 = vpop.eup %4649  ;;  %v2348_v21 = vmul.f32 %v2347_v57, %v7358_v14  ;;  %v2291_v46 = vsel %vm2290_vm7, %v4648_v17, %v2287_v55  ;;  %v2310_v17 = vmul.f32 %v2309_v10, %v7337_v2  ;;  %v1376_v55 = vmul.f32 0.5, %v7268_v47 }
 0x3ef   : > { %v2296_v20 = vsel %vm2293_vm8, %v2295_v40, %v2291_v46  ;;  %v2324_v28 = vmul.f32 %v4650_v7, %v7455_v31  ;;  %4651 = vrcp.f32 %v7474_v32  ;;  %vm2329_vm10 = vweird.f32 %v4650_v7  ;;  %v2926_v46 = vpop.f32.mrf.mxu1 }
 0x3f0   : > { %v2297_v3 = vmul.f32 %v2296_v20, %v2272_v0  ;;  %v2349_v42 = vadd.f32 0.18741608, %v2348_v21  ;;  %v1377_v2 = vmul.f32 0.5, %v7274_v52  ;;  %v7500_v10 = vadd.f32 %v7276_v23, %v6708_v63  ;;  %vm2330_vm12 = vmor %vm2328_vm11, %vm2329_vm10  ;;  %v3064_v52 = vpop.xlane.xlu1 %3063 }
 0x3f1   : > { %v3055_v50 = vpop.f32.mrf.mxu3  ;;  %v2325_v54 = vsub.f32 1.0, %v2324_v28  ;;  %v2311_v40 = vadd.f32 1.1283791, %v2310_v17  ;;  %v2752_v1 = vmul.f32 %v2720_v18, %v1376_v55  ;;  %v2335_v47 = vor.u32 1.1754944e-38, %v2334_v38 }
 0x3f2   : > { %v7482_v8 = vadd.f32 %v3055_v50, %v6710_v27  ;;  %v4281_v22 = vclamps-f32 %v2297_v3, 1.0  ;;  %8767 = vst [vmem:[#allocation38_spill] sm:$0xff] %v7500_v10  ;;  %v2350_v48 = vmul.f32 %v2349_v42, %v7358_v14  ;;  %v3165_v42 = vmul.f32 %v7494_v19, %v3064_v52 }
 0x3f3   : > { %v2326_v24 = vmul.f32 %v4650_v7, %v2325_v54  ;;  %v2374_v18 = vand.u32 2147483648, %v7474_v32  ;;  %v3015_v38 = vpop.f32.mrf.mxu2  ;;  %v2372_v37 = vand.u32 2147483647, %v7474_v32  ;;  %vm2368_vm15 = vweird.f32 %v7474_v32 }
 0x3f4   : > { %8766 = vst [vmem:[#allocation37_spill] sm:$0xff] %v7482_v8  ;;  %v3152_v57 = vadd.f32 %v7482_v8, %v7479_v58  ;;  %v2721_v0 = vadd.f32 1.0, %v4281_v22  ;;  %v2351_v22 = vadd.f32 1.1283791, %v2350_v48  ;;  %v7519_v55 = vadd.f32 %v3015_v38, %v6710_v27 }
 0x3f5   : > { %v2327_v21 = vadd.f32 %v4650_v7, %v2326_v24  ;;  %v4652_v50 = vpop.eup %4651  ;;  %vm2373_vm1 = vcmp.eq.f32.partialorder %v2372_v37, 8.507059e+37  ;;  %v8772_v37 = vld [vmem:[#allocation30_spill] sm:$0xff] }
 0x3f6   : > { %3153 = vadd.xlane.f32.xlu1 %v3152_v57  ;;  %v2753_v28 = vmul.f32 %v2721_v0, %v1377_v2  ;;  %v2364_v3 = vmul.f32 %v4652_v50, %v7474_v32  ;;  %v2312_v57 = vmul.f32 %v2311_v40, %v7305_v9  ;;  %vm2369_vm14 = vweird.f32 %v4652_v50  ;;  %v8769_v0 = vld [vmem:[#allocation27_spill] sm:$0xff] }
 0x3f7   : > { %v2331_v23 = vsel %vm2330_vm12, %v4650_v7, %v2327_v21  ;;  %v7516_v9 = vadd.f32 %v2926_v46, %v6708_v63  ;;  %v7523_v40 = vsub.f32 %v8769_v0, %v3165_v42  ;;  %v8770_v21 = vld [vmem:[#allocation28_spill] sm:$0xff]  ;;  %vm2370_vm0 = vmor %vm2368_vm15, %vm2369_vm14  ;;  %v2352_v46 = vmul.f32 %v2351_v22, %v7328_v41 }
 0x3f8   : > { %v2774_v17 = vpack.c.bf16 %v2753_v28, %v2752_v1  ;;  %v2336_v31 = vsel %vm2333_vm13, %v2335_v47, %v2331_v23  ;;  %v2365_v54 = vsub.f32 1.0, %v2364_v3  ;;  %v7526_v48 = vsub.f32 %v8770_v21, %v3165_v42  ;;  %v3067_v28 = vpop.xlane.xlu2 %3066  ;;  %v2928_v23 = vpop.f32.mrf.mxu1 }
 0x3f9   : > { %v3057_v20 = vpop.f32.mrf.mxu3  ;;  %v2337_v7 = vmul.f32 %v2336_v31, %v2312_v57  ;;  %v2375_v1 = vor.u32 1.1754944e-38, %v2374_v18  ;;  %v3261_v31 = vmul.f32 %v7523_v40, %v7523_v40  ;;  %v7537_v41 = vadd.f32 %v2928_v23, %v6708_v63 }
 0x3fa   : > { %v7506_v61 = vadd.f32 %v3057_v20, %v6710_v27  ;;  %2940 = vmatmul.bf16.gmra.mxu1 %v2774_v17  ;;  %3029 = vmatmul.bf16.gmra.mxu2 %v2774_v17  ;;  %v2366_v24 = vmul.f32 %v4652_v50, %v2365_v54  ;;  %v3104_v20 = vadd.f32 %v7519_v55, %v7516_v9  ;;  %v1378_v22 = vmul.f32 0.5, %v7298_v35 }
 0x3fb   : > { %v4282_v47 = vclamps-f32 %v2337_v7, 1.0  ;;  %v3166_v17 = vmul.f32 %v7494_v19, %v3067_v28  ;;  %v3262_v57 = vmul.f32 %v7526_v48, %v7526_v48  ;;  %v1379_v18 = vmul.f32 0.5, %v7308_v6  ;;  %v8771_v7 = vld [vmem:[#allocation29_spill] sm:$0xff] }
 0x3fc   : > { %8768 = vst [vmem:[#allocation39_spill] sm:$0xff] %v7506_v61  ;;  %v3155_v14 = vadd.f32 %v7506_v61, %v7500_v10  ;;  %v2367_v2 = vadd.f32 %v4652_v50, %v2366_v24  ;;  %3105 = vadd.xlane.f32.xlu0 %v3104_v20 }
 0x3fd   : > { %v2722_v42 = vadd.f32 1.0, %v4282_v47  ;;  %v7545_v24 = vsub.f32 %v8771_v7, %v3166_v17  ;;  %v3325_v21 = vadd.f32 %v3262_v57, %v3261_v31  ;;  %v3070_v47 = vpop.xlane.xlu0 %3069 }
 0x3fe   : > { %3156 = vadd.xlane.f32.xlu2 %v3155_v14  ;;  %v2371_v52 = vsel %vm2370_vm0, %v4652_v50, %v2367_v2  ;;  %v3017_v14 = vpop.f32.mrf.mxu2  ;;  %v7548_v2 = vsub.f32 %v8772_v37, %v3166_v17  ;;  %v3167_v23 = vmul.f32 %v7494_v19, %v3070_v47 }
 0x3ff   : > { %v2376_v32 = vsel %vm2373_vm1, %v2375_v1, %v2371_v52  ;;  %v7540_v50 = vadd.f32 %v3017_v14, %v6710_v27  ;;  %v2754_v20 = vmul.f32 %v2722_v42, %v1378_v22  ;;  %v3263_v35 = vmul.f32 %v7545_v24, %v7545_v24  ;;  %v3073_v42 = vpop.xlane.xlu1 %3072 }
 0x400   : > { %v2377_v3 = vmul.f32 %v2376_v32, %v2352_v46  ;;  %v3264_v6 = vmul.f32 %v7548_v2, %v7548_v2  ;;  %v7564_v57 = vsub.f32 %v6799_v25, %v3167_v23  ;;  %v7567_v14 = vsub.f32 %v6807_v34, %v3167_v23 }
 0x401   : > { %v3107_v0 = vadd.f32 %v7540_v50, %v7537_v41  ;;  %v3168_v22 = vmul.f32 %v7494_v19, %v3073_v42 }
 0x402   : > { %v4283_v54 = vclamps-f32 %v2377_v3, 1.0  ;;  %v3328_v52 = vadd.f32 %v3264_v6, %v3263_v35 }
 0x403   : > { %3108 = vadd.xlane.f32.xlu1 %v3107_v0  ;;  %v7583_v37 = vsub.f32 %v6832_v39, %v3168_v22  ;;  %v7586_v0 = vsub.f32 %v6836_v4, %v3168_v22 }
 0x404   : > { %v2723_v38 = vadd.f32 1.0, %v4283_v54  ;;  %3326 = vadd.xlane.f32.xlu0 %v3325_v21 }
 0x405   : > { %v3267_v35 = vmul.f32 %v7583_v37, %v7583_v37  ;;  %v3268_v39 = vmul.f32 %v7586_v0, %v7586_v0 }
 0x406   : > { %v2755_v1 = vmul.f32 %v2723_v38, %v1379_v18  ;;  %v3265_v18 = vmul.f32 %v7564_v57, %v7564_v57  ;;  %v3266_v38 = vmul.f32 %v7567_v14, %v7567_v14 }
 0x408   : > { %v2775_v28 = vpack.c.bf16 %v2755_v1, %v2754_v20  ;;  %v3331_v20 = vadd.f32 %v3266_v38, %v3265_v18  ;;  %v3076_v1 = vpop.xlane.xlu2 %3075 }
 0x40a   : > { %v2931_v46 = vpop.f32.mrf.mxu1  ;;  %2945 = vmatmul.bf16.gmra.mxu1 %v2775_v28  ;;  %3034 = vmatmul.bf16.gmra.mxu2 %v2775_v28 }
 0x40b   : > { %3329 = vadd.xlane.f32.xlu1 %v3328_v52  ;;  %v7558_v3 = vadd.f32 %v2931_v46, %v6708_v63  ;;  %v3169_v46 = vmul.f32 %v7494_v19, %v3076_v1 }
 0x40d   : > { %v7602_v52 = vsub.f32 %v6869_v51, %v3169_v46  ;;  %v7605_v23 = vsub.f32 %v6876_v56, %v3169_v46 }
 0x40f   : > { %8775 = vst [vmem:[#allocation29_spill] sm:$0xff] %v7602_v52  ;;  %v3269_v18 = vmul.f32 %v7602_v52, %v7602_v52  ;;  %v3270_v51 = vmul.f32 %v7605_v23, %v7605_v23 }
 0x410   : > { %v3020_v32 = vpop.f32.mrf.mxu2  ;;  %8776 = vst [vmem:[#allocation30_spill] sm:$0xff] %v7605_v23 }
 0x411   : > { %v7561_v17 = vadd.f32 %v3020_v32, %v6710_v27  ;;  %v3337_v1 = vadd.f32 %v3270_v51, %v3269_v18 }
 0x412   : > { %v2933_v31 = vpop.f32.mrf.mxu1 }
 0x413   : > { %v3110_v54 = vadd.f32 %v7561_v17, %v7558_v3  ;;  %v7577_v25 = vadd.f32 %v2933_v31, %v6708_v63  ;;  %v3334_v31 = vadd.f32 %v3268_v39, %v3267_v35 }
 0x415   : > { %3111 = vadd.xlane.f32.xlu2 %v3110_v54  ;;  %v3079_v54 = vpop.xlane.xlu0 %3078 }
 0x416   : > { %v3170_v22 = vmul.f32 %v7494_v19, %v3079_v54 }
 0x418   : > { %v3022_v7 = vpop.f32.mrf.mxu2 }
 0x419   : > { %v7580_v34 = vadd.f32 %v3022_v7, %v6710_v27 }
 0x41a   : > { %v2936_v28 = vpop.f32.mrf.mxu1 }
 0x41b   : > { %v3113_v21 = vadd.f32 %v7580_v34, %v7577_v25  ;;  %v7596_v4 = vadd.f32 %v2936_v28, %v6708_v63 }
 0x41d   : > { %3114 = vadd.xlane.f32.xlu0 %v3113_v21  ;;  %3332 = vadd.xlane.f32.xlu2 %v3331_v20  ;;  %8773 = vst [vmem:[#allocation27_spill] sm:$0xff] %v7596_v4  ;;  %v7621_v21 = vsub.f32 %v6937_v49, %v3170_v22  ;;  %v7624_v20 = vsub.f32 %v6946_v45, %v3170_v22 }
 0x41f   : > { %8779 = vst [vmem:[#allocation42_spill] sm:$0xff] %v7621_v21  ;;  %v3271_v46 = vmul.f32 %v7621_v21, %v7621_v21  ;;  %v3272_v35 = vmul.f32 %v7624_v20, %v7624_v20 }
 0x420   : > { %v3025_v6 = vpop.f32.mrf.mxu2  ;;  %8780 = vst [vmem:[#allocation43_spill] sm:$0xff] %v7624_v20 }
 0x421   : > { %v7599_v47 = vadd.f32 %v3025_v6, %v6710_v27  ;;  %v3340_v39 = vadd.f32 %v3272_v35, %v3271_v46  ;;  %v3082_v6 = vpop.xlane.xlu1 %3081 }
 0x422   : > { %v2938_v42 = vpop.f32.mrf.mxu1  ;;  %v3171_v10 = vmul.f32 %v7494_v19, %v3082_v6 }
 0x423   : > { %8774 = vst [vmem:[#allocation28_spill] sm:$0xff] %v7599_v47  ;;  %v3116_v32 = vadd.f32 %v7599_v47, %v7596_v4  ;;  %v7615_v56 = vadd.f32 %v2938_v42, %v6708_v63 }
 0x424   : > { %v7668_v20 = vsub.f32 %v6969_v62, %v3171_v10 }
 0x425   : > { %3117 = vadd.xlane.f32.xlu1 %v3116_v32  ;;  %3335 = vadd.xlane.f32.xlu0 %v3334_v31  ;;  %8777 = vst [vmem:[#allocation40_spill] sm:$0xff] %v7615_v56  ;;  %v3088_v32 = vpop.xlane.xlu0 %3087  ;;  %v3085_v31 = vpop.xlane.xlu2 %3084 }
 0x426   : > { %8786 = vst [vmem:[#allocation49_spill] sm:$0xff] %v7668_v20  ;;  %v3274_v62 = vmul.f32 %v7668_v20, %v7668_v20 }
 0x428   : > { %v3027_v38 = vpop.f32.mrf.mxu2 }
 0x429   : > { %v7618_v7 = vadd.f32 %v3027_v38, %v6710_v27 }
 0x42b   : > { %8778 = vst [vmem:[#allocation41_spill] sm:$0xff] %v7618_v7  ;;  %v3119_v28 = vadd.f32 %v7618_v7, %v7615_v56 }
 0x42d   : > { %3338 = vadd.xlane.f32.xlu1 %v3337_v1  ;;  %3120 = vadd.xlane.f32.xlu2 %v3119_v28 }
 0x435   : > { %3341 = vadd.xlane.f32.xlu2 %v3340_v39 }
 0x439   : > { %v3136_v49 = vpop.xlane.xlu1 %3135 }
 0x441   : > { %v7632_v45 = vpop.xlane.xlu1 %3090  ;;  %v3139_v42 = vpop.xlane.xlu2 %3138 }
 0x449   : > { %v7634_v54 = vpop.xlane.xlu0 %3141  ;;  %v7640_v51 = vpop.xlane.xlu2 %3093 }
 0x451   : > { %v7636_v22 = vpop.xlane.xlu1 %3144  ;;  %v7638_v18 = vpop.xlane.xlu0 %3096 }
 0x459   : > { %v7642_v38 = vpop.xlane.xlu1 %3099  ;;  %v7646_v28 = vpop.xlane.xlu2 %3147 }
 0x461   : > { %v7644_v1 = vpop.xlane.xlu0 %3150  ;;  %v7652_v5 = vpop.xlane.xlu2 %3102 }
 0x462   : > { %8781 = vst [vmem:[#allocation44_spill] sm:$0xff] %v7644_v1 }
 0x469   : > { %v7648_v46 = vpop.xlane.xlu1 %3153 }
 0x46a   : > { %8782 = vst [vmem:[#allocation45_spill] sm:$0xff] %v7648_v46  ;;  %v7665_v46 = vsub.f32 %v6966_v26, %v3171_v10 }
 0x46c   : > { %8785 = vst [vmem:[#allocation48_spill] sm:$0xff] %v7665_v46  ;;  %v3273_v26 = vmul.f32 %v7665_v46, %v7665_v46 }
 0x46f   : > { %v7650_v35 = vpop.xlane.xlu0 %3105 }
 0x471   : > { %v7670_v21 = vpop.xlane.xlu2 %3156 }
 0x472   : > { %8787 = vst [vmem:[#allocation50_spill] sm:$0xff] %v7670_v21 }
 0x476   : > { %v7654_v13 = vpop.xlane.xlu1 %3108 }
 0x477   : > { %v2941_v39 = vpop.f32.mrf.mxu1  ;;  %v3327_v61 = vpop.xlane.xlu0 %3326 }
 0x478   : > { %v3421_v8 = vmul.f32 %v3327_v61, %v7494_v19  ;;  %v7659_v47 = vadd.f32 %v2941_v39, %v6708_v63  ;;  %v3172_v39 = vmul.f32 %v7494_v19, %v3085_v31 }
 0x47a   : > { %8783 = vst [vmem:[#allocation46_spill] sm:$0xff] %v7659_v47  ;;  %v3453_v1 = vadd.f32 1e-05, %v3421_v8  ;;  %v3173_v8 = vmul.f32 %v7494_v19, %v3088_v32  ;;  %v7682_v10 = vsub.f32 %v7013_v44, %v3172_v39  ;;  %v7685_v21 = vsub.f32 %v7016_v15, %v3172_v39 }
 0x47b   : > { %v3343_v39 = vadd.f32 %v3274_v62, %v3273_v26 }
 0x47c   : > { %4653 = vrsqrt.f32 %v3453_v1  ;;  %8788 = vst [vmem:[#allocation51_spill] sm:$0xff] %v7682_v10  ;;  %v7688_v31 = vsub.f32 %v7181_v12, %v3173_v8  ;;  %vm3491_vm3 = vweird.f32 %v3453_v1 }
 0x47d   : > { %v3030_v58 = vpop.f32.mrf.mxu2  ;;  %8789 = vst [vmem:[#allocation52_spill] sm:$0xff] %v7685_v21 }
 0x47e   : > { %v7662_v4 = vadd.f32 %v3030_v58, %v6710_v27  ;;  %v3330_v58 = vpop.xlane.xlu1 %3329  ;;  %8790 = vst [vmem:[#allocation53_spill] sm:$0xff] %v7688_v31 }
 0x47f   : > { %v2943_v6 = vpop.f32.mrf.mxu1  ;;  %v3422_v7 = vmul.f32 %v3330_v58, %v7494_v19 }
 0x480   : > { %8784 = vst [vmem:[#allocation47_spill] sm:$0xff] %v7662_v4  ;;  %v3122_v61 = vadd.f32 %v7662_v4, %v7659_v47  ;;  %v7691_v4 = vsub.f32 %v7184_v59, %v3173_v8  ;;  %v7694_v58 = vadd.f32 %v2943_v6, %v6708_v63  ;;  %v3275_v59 = vmul.f32 %v7682_v10, %v7682_v10 }
 0x481   : > { %v7696_v46 = vadd.f32 1e-05, %v3422_v7  ;;  %v3276_v7 = vmul.f32 %v7685_v21, %v7685_v21  ;;  %v3277_v6 = vmul.f32 %v7688_v31, %v7688_v31  ;;  %v3189_v8 = vmul.f32 %v7494_v19, %v3136_v49 }
 0x482   : > { %3123 = vadd.xlane.f32.xlu0 %v3122_v61  ;;  %v4654_v61 = vpop.eup %4653  ;;  %8791 = vst [vmem:[#allocation54_spill] sm:$0xff] %v7691_v4  ;;  %v3278_v26 = vmul.f32 %v7691_v4, %v7691_v4 }
 0x483   : > { %8792 = vst [vmem:[#allocation55_spill] sm:$0xff] %v7694_v58  ;;  %v3486_v44 = vmul.f32 %v4654_v61, %v3453_v1  ;;  %4655 = vrsqrt.f32 %v7696_v46  ;;  %vm3492_vm2 = vweird.f32 %v4654_v61  ;;  %v3346_v21 = vadd.f32 %v3276_v7, %v3275_v59 }
 0x484   : > { %v7722_v49 = vsub.f32 %v7290_v53, %v3189_v8  ;;  %v7733_v4 = vadd.f32 %v3278_v26, %v3277_v6  ;;  %vm3493_vm4 = vmor %vm3491_vm3, %vm3492_vm2  ;;  %v7764_v23 = vsub.f32 %v7293_v11, %v3189_v8  ;;  %vm3501_vm6 = vweird.f32 %v7696_v46 }
 0x485   : > { %v3032_v32 = vpop.f32.mrf.mxu2  ;;  %v3487_v47 = vmul.f32 %v4654_v61, %v3486_v44  ;;  %v3060_v44 = vld [vmem:[%s8571_s7] sm:$0x3] }
 0x486   : > { %v7699_v20 = vadd.f32 %v3032_v32, %v6710_v27  ;;  %v3190_v32 = vmul.f32 %v7494_v19, %v3139_v42  ;;  %8794 = vst [vmem:[#allocation57_spill] sm:$0xff] %v7722_v49 }
 0x487   : > { %v2946_v56 = vpop.f32.mrf.mxu1  ;;  %v3488_v62 = vmul.f32 0.5, %v3487_v47  ;;  %v3061_v47 = vld [vmem:[%s8572_s8] sm:$0x3]  ;;  %8795 = vst [vmem:[#allocation58_spill] sm:$0xff] %v7764_v23 }
 0x488   : > { %8793 = vst [vmem:[#allocation56_spill] sm:$0xff] %v7699_v20  ;;  %v7702_v15 = vpop.xlane.xlu2 %3111  ;;  %v3125_v12 = vadd.f32 %v7699_v20, %v7694_v58  ;;  %v7725_v42 = vsub.f32 %v7318_v30, %v3190_v32  ;;  %v3175_v30 = vmul.f32 %v7494_v19, %v7640_v51  ;;  %v7748_v6 = vadd.f32 %v2946_v56, %v6708_v63 }
 0x489   : > { %v3489_v10 = vsub.f32 1.5, %v3488_v62  ;;  %v7719_v20 = vpop.eup %4655  ;;  %v7752_v26 = vperm.slane %v3061_v47, 0  ;;  %v7757_v51 = vperm.slane %v3061_v47, 1  ;;  %v3191_v47 = vmul.f32 %v7494_v19, %v7634_v54 }
 0x48a   : > { %3126 = vadd.xlane.f32.xlu1 %v3125_v12  ;;  %3344 = vadd.xlane.f32.xlu0 %v3343_v39  ;;  %v7728_v12 = vsub.f32 %v7323_v60, %v3190_v32  ;;  %v3496_v53 = vmul.f32 %v7719_v20, %v7696_v46  ;;  %v7742_v60 = vperm.slane %v3060_v44, 0  ;;  %v7744_v32 = vperm.slane %v3060_v44, 1 }
 0x48b   : > { %v3490_v59 = vmul.f32 %v4654_v61, %v3489_v10  ;;  %vm3502_vm5 = vweird.f32 %v7719_v20  ;;  %v3174_v54 = vmul.f32 %v7494_v19, %v7632_v45  ;;  %v7783_v8 = vsub.f32 %v7349_v43, %v3175_v30  ;;  %v8798_v43 = vld [vmem:[#allocation23_spill] sm:$0xff] }
 0x48c   : > { %v7796_v45 = vsub.f32 %v7346_v29, %v3175_v30  ;;  %vm3503_vm7 = vmor %vm3501_vm6, %vm3502_vm5  ;;  %v3310_v29 = vmul.f32 %v7764_v23, %v7764_v23  ;;  %v8800_v30 = vld [vmem:[#allocation24_spill] sm:$0xff]  ;;  %v8806_v23 = vld [vmem:[#allocation33_spill] sm:$0xff] }
 0x48d   : > { %v3035_v39 = vpop.f32.mrf.mxu2  ;;  %v3494_v62 = vsel %vm3493_vm4, %v4654_v61, %v3490_v59  ;;  %v3311_v59 = vmul.f32 %v7725_v42, %v7725_v42  ;;  %8796 = vst [vmem:[#allocation59_spill] sm:$0xff] %v7783_v8 }
 0x48e   : > { %v7738_v7 = vadd.f32 %v3035_v39, %v6710_v27  ;;  %v3497_v39 = vmul.f32 %v7719_v20, %v3496_v53  ;;  %v3805_v44 = vmul.f32 %v3494_v62, %v7523_v40  ;;  %v3806_v58 = vmul.f32 %v3494_v62, %v7526_v48  ;;  %8797 = vst [vmem:[#allocation60_spill] sm:$0xff] %v7796_v45 }
 0x48f   : > { %v3312_v53 = vmul.f32 %v7728_v12, %v7728_v12 }
 0x490   : > { %v3333_v10 = vpop.xlane.xlu2 %3332  ;;  %v7750_v1 = vpop.xlane.xlu0 %3114  ;;  %v3128_v56 = vadd.f32 %v7738_v7, %v7748_v6  ;;  %v3498_v52 = vmul.f32 0.5, %v3497_v39  ;;  %v3874_v40 = vmul.f32 %v7742_v60, %v3805_v44  ;;  %v3875_v48 = vmul.f32 %v7744_v32, %v3806_v58 }
 0x491   : > { %v3423_v31 = vmul.f32 %v3333_v10, %v7494_v19 }
 0x492   : > { %3347 = vadd.xlane.f32.xlu1 %v3346_v21  ;;  %v2948_v21 = vpop.f32.mrf.mxu1  ;;  %3129 = vadd.xlane.f32.xlu2 %v3128_v56  ;;  %v3499_v11 = vsub.f32 1.5, %v3498_v52  ;;  %v3943_v58 = vadd.f32 %v7752_v26, %v3874_v40  ;;  %v3944_v10 = vadd.f32 %v7757_v51, %v3875_v48  ;;  %v7799_v56 = vsub.f32 %v8798_v43, %v3191_v47 }
 0x493   : > { %v7766_v61 = vadd.f32 1e-05, %v3423_v31  ;;  %v3309_v31 = vmul.f32 %v7722_v49, %v7722_v49  ;;  %v7790_v39 = vadd.f32 %v2948_v21, %v6708_v63  ;;  %v7813_v40 = vsub.f32 %v8800_v30, %v3191_v47 }
 0x494   : > { %v3500_v52 = vmul.f32 %v7719_v20, %v3499_v11  ;;  %8799 = vst [vmem:[#allocation23_spill] sm:$0xff] %v7799_v56 }
 0x495   : > { %4657 = vrsqrt.f32 %v7766_v61  ;;  %v3037_v62 = vpop.f32.mrf.mxu2  ;;  %4007 = vst [vmem:[%s7803_s25] sm:$0xff] %v3943_v58  ;;  %v8802_v58 = vld [vmem:[#allocation22_spill] sm:$0xff]  ;;  %vm3511_vm9 = vweird.f32 %v7766_v61 }
 0x496   : > { %v7793_v44 = vadd.f32 %v3037_v62, %v6710_v27  ;;  %v3400_v27 = vadd.f32 %v3312_v53, %v3311_v59  ;;  %8801 = vst [vmem:[#allocation24_spill] sm:$0xff] %v7813_v40  ;;  %v3504_v48 = vsel %vm3503_vm7, %v7719_v20, %v3500_v52  ;;  %v7821_v62 = vsub.f32 %v8802_v58, %v3174_v54 }
 0x497   : > { %4008 = vst [vmem:[%s7803_s25 + $0x8] sm:$0xff] %v3944_v10  ;;  %v3176_v59 = vmul.f32 %v7494_v19, %v7638_v18  ;;  %v3807_v53 = vmul.f32 %v3504_v48, %v7545_v24  ;;  %v3808_v43 = vmul.f32 %v3504_v48, %v7548_v2  ;;  %v8803_v10 = vld [vmem:[#allocation19_spill] sm:$0xff]  ;;  %v3193_v20 = vmul.f32 %v7494_v19, %v7646_v28 }
 0x498   : > { %v7808_v63 = vpop.xlane.xlu1 %3117  ;;  %v3336_v46 = vpop.xlane.xlu0 %3335  ;;  %v3131_v11 = vadd.f32 %v7793_v44, %v7790_v39  ;;  %v7828_v30 = vsub.f32 %v8803_v10, %v3174_v54  ;;  %v3282_v54 = vmul.f32 %v7796_v45, %v7796_v45  ;;  %v3192_v28 = vmul.f32 %v7494_v19, %v7636_v22 }
 0x499   : > { %v3424_v21 = vmul.f32 %v3336_v46, %v7494_v19  ;;  %v3281_v46 = vmul.f32 %v7783_v8, %v7783_v8  ;;  %v3876_v18 = vmul.f32 %v7742_v60, %v3807_v53  ;;  %v3877_v24 = vmul.f32 %v7744_v32, %v3808_v43  ;;  %v8805_v43 = vld [vmem:[#allocation20_spill] sm:$0xff] }
 0x49a   : > { %3401 = vadd.xlane.f32.xlu1 %v3400_v27  ;;  %3132 = vadd.xlane.f32.xlu0 %v3131_v11  ;;  %v3313_v27 = vmul.f32 %v7799_v56, %v7799_v56  ;;  %v3314_v48 = vmul.f32 %v7813_v40, %v7813_v40  ;;  %v7855_v10 = vsub.f32 %v8805_v43, %v3176_v59 }
 0x49b   : > { %v4658_v47 = vpop.eup %4657  ;;  %v7832_v52 = vadd.f32 1e-05, %v3424_v21  ;;  %3350 = vadd.xlane.f32.xlu2 %v7733_v4  ;;  %v8804_v21 = vld [vmem:[#allocation25_spill] sm:$0xff]  ;;  %v3945_v58 = vadd.f32 %v7752_v26, %v3876_v18  ;;  %v3946_v4 = vadd.f32 %v7757_v51, %v3877_v24  ;;  %v7858_v22 = vsub.f32 %v7415_v33, %v3193_v20 }
 0x49c   : > { %v3506_v2 = vmul.f32 %v4658_v47, %v7766_v61  ;;  %v7850_v11 = vsub.f32 %v8804_v21, %v3176_v59  ;;  %v7861_v49 = vsub.f32 %v8806_v23, %v3193_v20  ;;  %v3397_v56 = vadd.f32 %v3310_v29, %v3309_v31  ;;  %v8808_v33 = vld [vmem:[#allocation21_spill] sm:$0xff] }
 0x49d   : > { %4659 = vrsqrt.f32 %v7832_v52  ;;  %4009 = vst [vmem:[%s7803_s25 + $0x10] sm:$0xff] %v3945_v58  ;;  %v3355_v18 = vadd.f32 %v3282_v54, %v3281_v46  ;;  %v3279_v24 = vmul.f32 %v7821_v62, %v7821_v62  ;;  %v3280_v59 = vmul.f32 %v7828_v30, %v7828_v30 }
 0x49e   : > { %v3507_v53 = vmul.f32 %v4658_v47, %v3506_v2  ;;  %v8807_v2 = vld [vmem:[#allocation26_spill] sm:$0xff]  ;;  %v7874_v8 = vsub.f32 %v8808_v33, %v3192_v28  ;;  %4010 = vst [vmem:[%s7803_s25 + $0x18] sm:$0xff] %v3946_v4  ;;  %v3403_v31 = vadd.f32 %v3314_v48, %v3313_v27  ;;  %v3178_v29 = vmul.f32 %v7494_v19, %v7652_v5 }
 0x49f   : > { %v7871_v43 = vsub.f32 %v8807_v2, %v3192_v28  ;;  %vm3512_vm8 = vweird.f32 %v4658_v47  ;;  %v3283_v46 = vmul.f32 %v7850_v11, %v7850_v11  ;;  %v3317_v28 = vmul.f32 %v7858_v22, %v7858_v22 }
 0x4a0   : > { %v3508_v40 = vmul.f32 0.5, %v3507_v53  ;;  %v3339_v21 = vpop.xlane.xlu1 %3338  ;;  %v7864_v45 = vpop.xlane.xlu2 %3120  ;;  %v3318_v4 = vmul.f32 %v7861_v49, %v7861_v49  ;;  %v3284_v27 = vmul.f32 %v7855_v10, %v7855_v10  ;;  %v3179_v5 = vmul.f32 %v7494_v19, %v7650_v35  ;;  %vm3513_vm10 = vmor %vm3511_vm9, %vm3512_vm8 }
 0x4a1   : > { %v3425_v23 = vmul.f32 %v3339_v21, %v7494_v19  ;;  %v7896_v53 = vsub.f32 %v7436_v36, %v3178_v29  ;;  %v3315_v2 = vmul.f32 %v7871_v43, %v7871_v43  ;;  %vm3521_vm12 = vweird.f32 %v7832_v52 }
 0x4a2   : > { %v3509_v20 = vsub.f32 1.5, %v3508_v40  ;;  %3356 = vadd.xlane.f32.xlu1 %v3355_v18  ;;  %3398 = vadd.xlane.f32.xlu0 %v3397_v56  ;;  %v3352_v56 = vadd.f32 %v3280_v59, %v3279_v24  ;;  %v3358_v61 = vadd.f32 %v3284_v27, %v3283_v46  ;;  %v7908_v24 = vsub.f32 %v7516_v9, %v3179_v5 }
 0x4a3   : > { %v4660_v54 = vpop.eup %4659  ;;  %v7882_v58 = vadd.f32 1e-05, %v3425_v23  ;;  %3404 = vadd.xlane.f32.xlu2 %v3403_v31  ;;  %v3316_v23 = vmul.f32 %v7874_v8, %v7874_v8  ;;  %v7905_v31 = vsub.f32 %v7431_v16, %v3178_v29  ;;  %v3409_v59 = vadd.f32 %v3318_v4, %v3317_v28 }
 0x4a4   : > { %v3510_v40 = vmul.f32 %v4658_v47, %v3509_v20  ;;  %v3516_v48 = vmul.f32 %v4660_v54, %v7832_v52  ;;  %v7911_v20 = vsub.f32 %v7519_v55, %v3179_v5  ;;  %v3177_v27 = vmul.f32 %v7494_v19, %v7642_v38 }
 0x4a5   : > { %4661 = vrsqrt.f32 %v7882_v58  ;;  %vm3522_vm11 = vweird.f32 %v4660_v54  ;;  %v3287_v9 = vmul.f32 %v7896_v53, %v7896_v53  ;;  %v3181_v55 = vmul.f32 %v7494_v19, %v7702_v15 }
 0x4a6   : > { %v3514_v21 = vsel %vm3513_vm10, %v4658_v47, %v3510_v40  ;;  %v3517_v18 = vmul.f32 %v4660_v54, %v3516_v48  ;;  %v3288_v48 = vmul.f32 %v7905_v31, %v7905_v31  ;;  %vm3523_vm13 = vmor %vm3521_vm12, %vm3522_vm11  ;;  %v3289_v15 = vmul.f32 %v7908_v24, %v7908_v24 }
 0x4a7   : > { %v3809_v35 = vmul.f32 %v3514_v21, %v7564_v57  ;;  %v3810_v33 = vmul.f32 %v3514_v21, %v7567_v14  ;;  %v3182_v52 = vmul.f32 %v7494_v19, %v7750_v1  ;;  %vm3531_vm15 = vweird.f32 %v7882_v58 }
 0x4a8   : > { %v3518_v36 = vmul.f32 0.5, %v3517_v18  ;;  %v3342_v47 = vpop.xlane.xlu2 %3341 }
 0x4a9   : > { %v3878_v57 = vmul.f32 %v7742_v60, %v3809_v35  ;;  %v3879_v14 = vmul.f32 %v7744_v32, %v3810_v33  ;;  %v3426_v46 = vmul.f32 %v3342_v47, %v7494_v19  ;;  %v3406_v35 = vadd.f32 %v3316_v23, %v3315_v2 }
 0x4aa   : > { %v3519_v16 = vsub.f32 1.5, %v3518_v36  ;;  %3410 = vadd.xlane.f32.xlu1 %v3409_v59  ;;  %3353 = vadd.xlane.f32.xlu0 %v3352_v56  ;;  %v3290_v56 = vmul.f32 %v7911_v20, %v7911_v20  ;;  %v7941_v33 = vsub.f32 %v7558_v3, %v3181_v55  ;;  %v8809_v59 = vld [vmem:[#allocation32_spill] sm:$0xff]  ;;  %v3180_v2 = vmul.f32 %v7494_v19, %v7654_v13 }
 0x4ab   : > { %v4662_v29 = vpop.eup %4661  ;;  %v3947_v28 = vadd.f32 %v7752_v26, %v3878_v57  ;;  %v3948_v4 = vadd.f32 %v7757_v51, %v3879_v14  ;;  %v7924_v5 = vadd.f32 1e-05, %v3426_v46  ;;  %3359 = vadd.xlane.f32.xlu2 %v3358_v61  ;;  %v7944_v61 = vsub.f32 %v7561_v17, %v3181_v55  ;;  %v8810_v14 = vld [vmem:[#allocation31_spill] sm:$0xff] }
 0x4ac   : > { %v3520_v38 = vmul.f32 %v4660_v54, %v3519_v16  ;;  %v3526_v40 = vmul.f32 %v4662_v29, %v7882_v58  ;;  %v7949_v57 = vsub.f32 %v8809_v59, %v3177_v27  ;;  %v7952_v46 = vsub.f32 %v8810_v14, %v3177_v27 }
 0x4ad   : > { %4011 = vst [vmem:[%s7803_s25 + $0x20] sm:$0xff] %v3947_v28  ;;  %4663 = vrsqrt.f32 %v7924_v5  ;;  %v3367_v23 = vadd.f32 %v3290_v56, %v3289_v15  ;;  %vm3532_vm14 = vweird.f32 %v4662_v29  ;;  %v3293_v55 = vmul.f32 %v7941_v33, %v7941_v33 }
 0x4ae   : > { %4012 = vst [vmem:[%s7803_s25 + $0x28] sm:$0xff] %v3948_v4  ;;  %v3524_v21 = vsel %vm3523_vm13, %v4660_v54, %v3520_v38  ;;  %v3527_v18 = vmul.f32 %v4662_v29, %v3526_v40  ;;  %v3364_v54 = vadd.f32 %v3288_v48, %v3287_v9  ;;  %vm3533_vm0 = vmor %vm3531_vm15, %vm3532_vm14  ;;  %v3285_v38 = vmul.f32 %v7949_v57, %v7949_v57 }
 0x4af   : > { %v3811_v36 = vmul.f32 %v3524_v21, %v7583_v37  ;;  %v3812_v47 = vmul.f32 %v3524_v21, %v7586_v0  ;;  %v7959_v37 = vsub.f32 %v7577_v25, %v3182_v52  ;;  %v7962_v0 = vsub.f32 %v7580_v34, %v3182_v52  ;;  %v8811_v21 = vld [vmem:[#allocation29_spill] sm:$0xff] }
 0x4b0   : > { %v3528_v1 = vmul.f32 0.5, %v3527_v18  ;;  %v3294_v25 = vmul.f32 %v7944_v61, %v7944_v61  ;;  %v3184_v34 = vmul.f32 %v7494_v19, %v7864_v45  ;;  %v3286_v40 = vmul.f32 %v7952_v46, %v7952_v46 }
 0x4b1   : > { %v3880_v3 = vmul.f32 %v7742_v60, %v3811_v36  ;;  %v3881_v17 = vmul.f32 %v7744_v32, %v3812_v47  ;;  %v3295_v58 = vmul.f32 %v7959_v37, %v7959_v37  ;;  %v3296_v45 = vmul.f32 %v7962_v0, %v7962_v0  ;;  %v8813_v47 = vld [vmem:[#allocation40_spill] sm:$0xff] }
 0x4b2   : > { %v3529_v16 = vsub.f32 1.5, %v3528_v1  ;;  %3365 = vadd.xlane.f32.xlu1 %v3364_v54  ;;  %3407 = vadd.xlane.f32.xlu0 %v3406_v35  ;;  %v7985_v56 = vsub.f32 %v7537_v41, %v3180_v2  ;;  %v7988_v52 = vsub.f32 %v7540_v50, %v3180_v2  ;;  %v8812_v35 = vld [vmem:[#allocation30_spill] sm:$0xff]  ;;  %v7993_v59 = vsub.f32 %v8813_v47, %v3184_v34 }
 0x4b3   : > { %v4664_v27 = vpop.eup %4663  ;;  %v3949_v9 = vadd.f32 %v7752_v26, %v3880_v3  ;;  %v3950_v13 = vadd.f32 %v7757_v51, %v3881_v17  ;;  %3368 = vadd.xlane.f32.xlu2 %v3367_v23  ;;  %v3373_v54 = vadd.f32 %v3294_v25, %v3293_v55  ;;  %v3361_v17 = vadd.f32 %v3286_v40, %v3285_v38  ;;  %v8815_v38 = vld [vmem:[#allocation42_spill] sm:$0xff] }
 0x4b4   : > { %v3530_v28 = vmul.f32 %v4662_v29, %v3529_v16  ;;  %v3536_v4 = vmul.f32 %v4664_v27, %v7924_v5  ;;  %vm3542_vm1 = vweird.f32 %v4664_v27  ;;  %v3376_v2 = vadd.f32 %v3296_v45, %v3295_v58  ;;  %v8817_v45 = vld [vmem:[#allocation27_spill] sm:$0xff] }
 0x4b5   : > { %4013 = vst [vmem:[%s7803_s25 + $0x30] sm:$0xff] %v3949_v9  ;;  %v3291_v9 = vmul.f32 %v7985_v56, %v7985_v56  ;;  %vm3541_vm2 = vweird.f32 %v7924_v5  ;;  %v3299_v25 = vmul.f32 %v7993_v59, %v7993_v59  ;;  %v8816_v5 = vld [vmem:[#allocation43_spill] sm:$0xff] }
 0x4b6   : > { %4014 = vst [vmem:[%s7803_s25 + $0x38] sm:$0xff] %v3950_v13  ;;  %v3534_v48 = vsel %vm3533_vm0, %v4662_v29, %v3530_v28  ;;  %v3537_v15 = vmul.f32 %v4664_v27, %v3536_v4  ;;  %v8814_v29 = vld [vmem:[#allocation41_spill] sm:$0xff]  ;;  %v3292_v13 = vmul.f32 %v7988_v52, %v7988_v52  ;;  %vm3543_vm3 = vmor %vm3541_vm2, %vm3542_vm1 }
 0x4b7   : > { %v3813_v18 = vmul.f32 %v3534_v48, %v8811_v21  ;;  %v3814_v36 = vmul.f32 %v3534_v48, %v8812_v35  ;;  %v7996_v14 = vsub.f32 %v8814_v29, %v3184_v34  ;;  %v3183_v34 = vmul.f32 %v7494_v19, %v7808_v63 }
 0x4b8   : > { %v3538_v1 = vmul.f32 0.5, %v3537_v15  ;;  %v3370_v15 = vadd.f32 %v3292_v13, %v3291_v9 }
 0x4b9   : > { %v3882_v3 = vmul.f32 %v7742_v60, %v3813_v18  ;;  %v3883_v41 = vmul.f32 %v7744_v32, %v3814_v36  ;;  %v3300_v28 = vmul.f32 %v7996_v14, %v7996_v14  ;;  %v8019_v21 = vsub.f32 %v8817_v45, %v3183_v34  ;;  %v8818_v18 = vld [vmem:[#allocation28_spill] sm:$0xff] }
 0x4ba   : > { %v3539_v50 = vsub.f32 1.5, %v3538_v1  ;;  %3374 = vadd.xlane.f32.xlu1 %v3373_v54  ;;  %3362 = vadd.xlane.f32.xlu0 %v3361_v17  ;;  %v8022_v35 = vsub.f32 %v8818_v18, %v3183_v34  ;;  %v8819_v17 = vld [vmem:[#allocation46_spill] sm:$0xff] }
 0x4bb   : > { %v3951_v23 = vadd.f32 %v7752_v26, %v3882_v3  ;;  %v3952_v16 = vadd.f32 %v7757_v51, %v3883_v41  ;;  %3377 = vadd.xlane.f32.xlu2 %v3376_v2  ;;  %v3382_v58 = vadd.f32 %v3300_v28, %v3299_v25  ;;  %v3297_v29 = vmul.f32 %v8019_v21, %v8019_v21  ;;  %v8820_v2 = vld [vmem:[#allocation47_spill] sm:$0xff] }
 0x4bc   : > { %v3540_v55 = vmul.f32 %v4664_v27, %v3539_v50  ;;  %v3298_v1 = vmul.f32 %v8022_v35, %v8022_v35 }
 0x4bd   : > { %4015 = vst [vmem:[%s7803_s25 + $0x40] sm:$0xff] %v3951_v23 }
 0x4be   : > { %4016 = vst [vmem:[%s7803_s25 + $0x48] sm:$0xff] %v3952_v16  ;;  %v3544_v4 = vsel %vm3543_vm3, %v4664_v27, %v3540_v55  ;;  %v3379_v54 = vadd.f32 %v3298_v1, %v3297_v29 }
 0x4bf   : > { %v3815_v40 = vmul.f32 %v3544_v4, %v8815_v38  ;;  %v3816_v48 = vmul.f32 %v3544_v4, %v8816_v5  ;;  %v8821_v4 = vld [vmem:[#allocation45_spill] sm:$0xff] }
 0x4c0   : > { %v3195_v38 = vmul.f32 %v7494_v19, %v8821_v4  ;;  %v8829_v4 = vld [vmem:[#allocation44_spill] sm:$0xff] }
 0x4c1   : > { %v3884_v63 = vmul.f32 %v7742_v60, %v3815_v40  ;;  %v3885_v36 = vmul.f32 %v7744_v32, %v3816_v48  ;;  %v8822_v40 = vld [vmem:[#allocation55_spill] sm:$0xff]  ;;  %v8823_v48 = vld [vmem:[#allocation56_spill] sm:$0xff] }
 0x4c2   : > { %3383 = vadd.xlane.f32.xlu1 %v3382_v58  ;;  %3371 = vadd.xlane.f32.xlu0 %v3370_v15 }
 0x4c3   : > { %v3953_v27 = vadd.f32 %v7752_v26, %v3884_v63  ;;  %v3954_v47 = vadd.f32 %v7757_v51, %v3885_v36  ;;  %v8824_v63 = vld [vmem:[#allocation36_spill] sm:$0xff] }
 0x4c4   : > { %v8060_v36 = vsub.f32 %v8824_v63, %v3195_v38 }
 0x4c5   : > { %4017 = vst [vmem:[%s7803_s25 + $0x50] sm:$0xff] %v3953_v27  ;;  %v8825_v27 = vld [vmem:[#allocation37_spill] sm:$0xff] }
 0x4c6   : > { %4018 = vst [vmem:[%s7803_s25 + $0x58] sm:$0xff] %v3954_v47  ;;  %v8063_v47 = vsub.f32 %v8825_v27, %v3195_v38  ;;  %v3194_v38 = vmul.f32 %v7494_v19, %v8829_v4 }
 0x4ca   : > { %3380 = vadd.xlane.f32.xlu0 %v3379_v54 }
 0x4f5   : > { %v3124_v3 = vpop.xlane.xlu0 %3123 }
 0x4f6   : > { %v3185_v41 = vmul.f32 %v7494_v19, %v3124_v3 }
 0x4f8   : > { %v8036_v50 = vsub.f32 %v8819_v17, %v3185_v41  ;;  %v8039_v23 = vsub.f32 %v8820_v2, %v3185_v41  ;;  %v3321_v41 = vmul.f32 %v8060_v36, %v8060_v36  ;;  %v8826_v2 = vld [vmem:[#allocation50_spill] sm:$0xff] }
 0x4fa   : > { %v3301_v16 = vmul.f32 %v8036_v50, %v8036_v50  ;;  %v3302_v9 = vmul.f32 %v8039_v23, %v8039_v23 }
 0x4fc   : > { %v3385_v13 = vadd.f32 %v3302_v9, %v3301_v16  ;;  %v3196_v16 = vmul.f32 %v7494_v19, %v8826_v2 }
 0x4fd   : > { %v3127_v55 = vpop.xlane.xlu1 %3126  ;;  %v3345_v25 = vpop.xlane.xlu0 %3344 }
 0x4fe   : > { %v3186_v28 = vmul.f32 %v7494_v19, %v3127_v55  ;;  %v3427_v34 = vmul.f32 %v3345_v25, %v7494_v19  ;;  %3386 = vadd.xlane.f32.xlu2 %v3385_v13  ;;  %v3322_v55 = vmul.f32 %v8063_v47, %v8063_v47 }
 0x500   : > { %v8050_v5 = vsub.f32 %v8822_v40, %v3186_v28  ;;  %v8053_v15 = vsub.f32 %v8823_v48, %v3186_v28  ;;  %v3459_v58 = vadd.f32 1e-05, %v3427_v34  ;;  %v8830_v48 = vld [vmem:[#allocation38_spill] sm:$0xff] }
 0x502   : > { %4665 = vrsqrt.f32 %v3459_v58  ;;  %v3303_v45 = vmul.f32 %v8050_v5, %v8050_v5  ;;  %v3304_v18 = vmul.f32 %v8053_v15, %v8053_v15  ;;  %vm3551_vm5 = vweird.f32 %v3459_v58 }
 0x504   : > { %v3388_v29 = vadd.f32 %v3304_v18, %v3303_v45  ;;  %v8085_v45 = vsub.f32 %v8830_v48, %v3196_v16  ;;  %v3415_v18 = vadd.f32 %v3322_v55, %v3321_v41 }
 0x505   : > { %v3348_v1 = vpop.xlane.xlu1 %3347  ;;  %v3130_v3 = vpop.xlane.xlu2 %3129 }
 0x506   : > { %v3428_v54 = vmul.f32 %v3348_v1, %v7494_v19  ;;  %3389 = vadd.xlane.f32.xlu0 %v3388_v29  ;;  %v3187_v13 = vmul.f32 %v7494_v19, %v3130_v3  ;;  %v8831_v1 = vld [vmem:[#allocation39_spill] sm:$0xff] }
 0x508   : > { %v4666_v17 = vpop.eup %4665  ;;  %v8070_v9 = vadd.f32 1e-05, %v3428_v54  ;;  %v8077_v28 = vsub.f32 %v7748_v6, %v3187_v13  ;;  %v8080_v34 = vsub.f32 %v7738_v7, %v3187_v13  ;;  %v8092_v54 = vsub.f32 %v8831_v1, %v3196_v16  ;;  %v8833_v13 = vld [vmem:[#allocation34_spill] sm:$0xff] }
 0x509   : > { %v3546_v25 = vmul.f32 %v4666_v17, %v3459_v58  ;;  %vm3552_vm4 = vweird.f32 %v4666_v17 }
 0x50a   : > { %4667 = vrsqrt.f32 %v8070_v9  ;;  %8827 = vst [vmem:[#allocation22_spill] sm:$0xff] %v8077_v28  ;;  %v3305_v63 = vmul.f32 %v8077_v28, %v8077_v28  ;;  %v3306_v27 = vmul.f32 %v8080_v34, %v8080_v34  ;;  %vm3553_vm6 = vmor %vm3551_vm5, %vm3552_vm4  ;;  %vm3561_vm8 = vweird.f32 %v8070_v9 }
 0x50b   : > { %8828 = vst [vmem:[#allocation19_spill] sm:$0xff] %v8080_v34  ;;  %v3547_v40 = vmul.f32 %v4666_v17, %v3546_v25  ;;  %v8096_v25 = vsub.f32 %v8833_v13, %v3194_v38  ;;  %v8835_v34 = vld [vmem:[#allocation35_spill] sm:$0xff] }
 0x50c   : > { %8832 = vst [vmem:[#allocation25_spill] sm:$0xff] %v8092_v54  ;;  %v3391_v2 = vadd.f32 %v3306_v27, %v3305_v63 }
 0x50d   : > { %v3548_v29 = vmul.f32 0.5, %v3547_v40  ;;  %v3402_v6 = vpop.xlane.xlu1 %3401  ;;  %v3133_v3 = vpop.xlane.xlu0 %3132  ;;  %8834 = vst [vmem:[#allocation20_spill] sm:$0xff] %v8096_v25  ;;  %v8100_v40 = vsub.f32 %v8835_v34, %v3194_v38 }
 0x50e   : > { %v3446_v7 = vmul.f32 %v3402_v6, %v7494_v19  ;;  %3416 = vadd.xlane.f32.xlu0 %v3415_v18  ;;  %v3351_v55 = vpop.xlane.xlu2 %3350  ;;  %v3188_v4 = vmul.f32 %v7494_v19, %v3133_v3  ;;  %3392 = vadd.xlane.f32.xlu1 %v3391_v2  ;;  %v3323_v18 = vmul.f32 %v8085_v45, %v8085_v45  ;;  %v8839_v3 = vld [vmem:[#allocation48_spill] sm:$0xff] }
 0x50f   : > { %v3549_v41 = vsub.f32 1.5, %v3548_v29  ;;  %8836 = vst [vmem:[#allocation33_spill] sm:$0xff] %v8100_v40  ;;  %v3429_v16 = vmul.f32 %v3351_v55, %v7494_v19  ;;  %v3324_v6 = vmul.f32 %v8092_v54, %v8092_v54 }
 0x510   : > { %v4668_v48 = vpop.eup %4667  ;;  %v8102_v28 = vadd.f32 1e-05, %v3446_v7  ;;  %v8109_v29 = vsub.f32 %v7790_v39, %v3188_v4  ;;  %v8115_v38 = vsub.f32 %v7793_v44, %v3188_v4  ;;  %v8840_v39 = vld [vmem:[#allocation49_spill] sm:$0xff]  ;;  %v3319_v4 = vmul.f32 %v8096_v25, %v8096_v25 }
 0x511   : > { %v3550_v63 = vmul.f32 %v4666_v17, %v3549_v41  ;;  %v3556_v27 = vmul.f32 %v4668_v48, %v8070_v9  ;;  %v8112_v34 = vadd.f32 1e-05, %v3429_v16  ;;  %vm3562_vm7 = vweird.f32 %v4668_v48 }
 0x512   : > { %8837 = vst [vmem:[#allocation26_spill] sm:$0xff] %v8109_v29  ;;  %4669 = vrsqrt.f32 %v8102_v28  ;;  %v3307_v58 = vmul.f32 %v8109_v29, %v8109_v29  ;;  %v3308_v44 = vmul.f32 %v8115_v38, %v8115_v38  ;;  %vm3563_vm9 = vmor %vm3561_vm8, %vm3562_vm7  ;;  %vm3741_vm10 = vweird.f32 %v8102_v28 }
 0x513   : > { %8838 = vst [vmem:[#allocation21_spill] sm:$0xff] %v8115_v38  ;;  %v3554_v1 = vsel %vm3553_vm6, %v4666_v17, %v3550_v63  ;;  %v3557_v7 = vmul.f32 %v4668_v48, %v3556_v27  ;;  %4671 = vrsqrt.f32 %v8112_v34  ;;  %v3320_v17 = vmul.f32 %v8100_v40, %v8100_v40 }
 0x514   : > { %v3817_v2 = vmul.f32 %v3554_v1, %v8839_v3  ;;  %v3818_v13 = vmul.f32 %v3554_v1, %v8840_v39  ;;  %v3418_v3 = vadd.f32 %v3324_v6, %v3323_v18  ;;  %v3394_v29 = vadd.f32 %v3308_v44, %v3307_v58 }
 0x515   : > { %v3558_v41 = vmul.f32 0.5, %v3557_v7  ;;  %v3357_v55 = vpop.xlane.xlu1 %3356  ;;  %v3399_v1 = vpop.xlane.xlu0 %3398  ;;  %vm3571_vm11 = vweird.f32 %v8112_v34 }
 0x516   : > { %v3886_v16 = vmul.f32 %v7742_v60, %v3817_v2  ;;  %v3887_v63 = vmul.f32 %v7744_v32, %v3818_v13  ;;  %v3431_v27 = vmul.f32 %v3357_v55, %v7494_v19  ;;  %v3405_v7 = vpop.xlane.xlu2 %3404  ;;  %v3445_v38 = vmul.f32 %v3399_v1, %v7494_v19  ;;  %3419 = vadd.xlane.f32.xlu1 %v3418_v3  ;;  %v8842_v1 = vld [vmem:[#allocation52_spill] sm:$0xff] }
 0x517   : > { %v3559_v39 = vsub.f32 1.5, %v3558_v41  ;;  %v3447_v13 = vmul.f32 %v3405_v7, %v7494_v19  ;;  %3395 = vadd.xlane.f32.xlu2 %v3394_v29  ;;  %v3412_v29 = vadd.f32 %v3320_v17, %v3319_v4 }
 0x518   : > { %v4670_v54 = vpop.eup %4669  ;;  %v3955_v25 = vadd.f32 %v7752_v26, %v3886_v16  ;;  %v3956_v40 = vadd.f32 %v7757_v51, %v3887_v63  ;;  %v8136_v2 = vadd.f32 1e-05, %v3431_v27  ;;  %v8141_v6 = vadd.f32 1e-05, %v3445_v38  ;;  %v8841_v27 = vld [vmem:[#allocation51_spill] sm:$0xff] }
 0x519   : > { %v3560_v55 = vmul.f32 %v4668_v48, %v3559_v39  ;;  %v3736_v18 = vmul.f32 %v4670_v54, %v8102_v28  ;;  %v4672_v58 = vpop.eup %4671  ;;  %v8146_v41 = vadd.f32 1e-05, %v3447_v13  ;;  %vm3742_vm12 = vweird.f32 %v4670_v54 }
 0x51a   : > { %4019 = vst [vmem:[%s7803_s25 + $0x60] sm:$0xff] %v3955_v25  ;;  %4673 = vrsqrt.f32 %v8136_v2  ;;  %v3566_v63 = vmul.f32 %v4672_v58, %v8112_v34  ;;  %vm3572_vm13 = vweird.f32 %v4672_v58  ;;  %vm3743_vm14 = vmor %vm3741_vm10, %vm3742_vm12  ;;  %vm3591_vm15 = vweird.f32 %v8136_v2 }
 0x51b   : > { %4020 = vst [vmem:[%s7803_s25 + $0x68] sm:$0xff] %v3956_v40  ;;  %v3564_v44 = vsel %vm3563_vm9, %v4668_v48, %v3560_v55  ;;  %v3737_v16 = vmul.f32 %v4670_v54, %v3736_v18  ;;  %4675 = vrsqrt.f32 %v8146_v41  ;;  %vm3751_vm1 = vweird.f32 %v8146_v41  ;;  %vm3573_vm2 = vmor %vm3571_vm11, %vm3572_vm13 }
 0x51c   : > { %v3819_v9 = vmul.f32 %v3564_v44, %v8841_v27  ;;  %v3820_v3 = vmul.f32 %v3564_v44, %v8842_v1  ;;  %v3567_v25 = vmul.f32 %v4672_v58, %v3566_v63  ;;  %4677 = vrsqrt.f32 %v8141_v6 }
 0x51d   : > { %v3738_v38 = vmul.f32 0.5, %v3737_v16  ;;  %v3411_v39 = vpop.xlane.xlu1 %3410  ;;  %v3354_v13 = vpop.xlane.xlu0 %3353  ;;  %vm3731_vm5 = vweird.f32 %v8141_v6 }
 0x51e   : > { %v3888_v40 = vmul.f32 %v7742_v60, %v3819_v9  ;;  %v3889_v48 = vmul.f32 %v7744_v32, %v3820_v3  ;;  %v3449_v7 = vmul.f32 %v3411_v39, %v7494_v19  ;;  %v3568_v4 = vmul.f32 0.5, %v3567_v25  ;;  %v3360_v17 = vpop.xlane.xlu2 %3359 }
 0x51f   : > { %v3739_v55 = vsub.f32 1.5, %v3738_v38  ;;  %v3430_v18 = vmul.f32 %v3354_v13, %v7494_v19  ;;  %v3432_v9 = vmul.f32 %v3360_v17, %v7494_v19  ;;  %3413 = vadd.xlane.f32.xlu2 %v3412_v29 }
 0x520   : > { %v4674_v44 = vpop.eup %4673  ;;  %v3957_v16 = vadd.f32 %v7752_v26, %v3888_v40  ;;  %v3958_v63 = vadd.f32 %v7757_v51, %v3889_v48  ;;  %v8162_v27 = vadd.f32 1e-05, %v3449_v7  ;;  %v3569_v3 = vsub.f32 1.5, %v3568_v4 }
 0x521   : > { %v3740_v1 = vmul.f32 %v4670_v54, %v3739_v55  ;;  %v3586_v38 = vmul.f32 %v4674_v44, %v8136_v2  ;;  %v8166_v25 = vpop.eup %4675  ;;  %vm3592_vm0 = vweird.f32 %v4674_v44  ;;  %v8174_v39 = vadd.f32 1e-05, %v3432_v9 }
 0x522   : > { %4021 = vst [vmem:[%s7803_s25 + $0x70] sm:$0xff] %v3957_v16  ;;  %4679 = vrsqrt.f32 %v8162_v27  ;;  %v8176_v40 = vpop.eup %4677  ;;  %v3570_v7 = vmul.f32 %v4672_v58, %v3569_v3  ;;  %v3746_v13 = vmul.f32 %v8166_v25, %v8146_v41  ;;  %v8189_v17 = vadd.f32 1e-05, %v3430_v18  ;;  %v8844_v3 = vld [vmem:[#allocation54_spill] sm:$0xff]  ;;  %vm3593_vm4 = vmor %vm3591_vm15, %vm3592_vm0 }
 0x523   : > { %4022 = vst [vmem:[%s7803_s25 + $0x78] sm:$0xff] %v3958_v63  ;;  %v3744_v48 = vsel %vm3743_vm14, %v4670_v54, %v3740_v1  ;;  %v3587_v29 = vmul.f32 %v4674_v44, %v3586_v38  ;;  %v3726_v4 = vmul.f32 %v8176_v40, %v8141_v6  ;;  %vm3752_vm3 = vweird.f32 %v8166_v25 }
 0x524   : > { %v3855_v28 = vmul.f32 %v3744_v48, %v7725_v42  ;;  %v3856_v55 = vmul.f32 %v3744_v48, %v7728_v12  ;;  %v3574_v54 = vsel %vm3573_vm2, %v4672_v58, %v3570_v7  ;;  %v3747_v63 = vmul.f32 %v8166_v25, %v3746_v13  ;;  %v8843_v12 = vld [vmem:[#allocation53_spill] sm:$0xff]  ;;  %vm3753_vm7 = vmor %vm3751_vm1, %vm3752_vm3 }
 0x525   : > { %v3588_v16 = vmul.f32 0.5, %v3587_v29  ;;  %v3821_v1 = vmul.f32 %v3574_v54, %v8843_v12  ;;  %v3822_v34 = vmul.f32 %v3574_v54, %v8844_v3  ;;  %v3727_v18 = vmul.f32 %v8176_v40, %v3726_v4  ;;  %v3408_v2 = vpop.xlane.xlu0 %3407 }
 0x526   : > { %v3924_v9 = vmul.f32 %v7742_v60, %v3855_v28  ;;  %v3925_v42 = vmul.f32 %v7744_v32, %v3856_v55  ;;  %v3748_v48 = vmul.f32 0.5, %v3747_v63  ;;  %4681 = vrsqrt.f32 %v8174_v39 }
 0x527   : > { %v3589_v38 = vsub.f32 1.5, %v3588_v16  ;;  %v3890_v13 = vmul.f32 %v7742_v60, %v3821_v1  ;;  %v3891_v28 = vmul.f32 %v7744_v32, %v3822_v34  ;;  %v3728_v54 = vmul.f32 0.5, %v3727_v18  ;;  %v3366_v16 = vpop.xlane.xlu1 %3365 }
 0x528   : > { %v8199_v58 = vpop.eup %4679  ;;  %v3993_v7 = vadd.f32 %v7752_v26, %v3924_v9  ;;  %v3994_v29 = vadd.f32 %v7757_v51, %v3925_v42  ;;  %v3749_v12 = vsub.f32 1.5, %v3748_v48  ;;  %vm3732_vm6 = vweird.f32 %v8176_v40  ;;  %v8845_v48 = vld [vmem:[#allocation59_spill] sm:$0xff] }
 0x529   : > { %v3590_v55 = vmul.f32 %v4674_v44, %v3589_v38  ;;  %v3766_v4 = vmul.f32 %v8199_v58, %v8162_v27  ;;  %v3959_v63 = vadd.f32 %v7752_v26, %v3890_v13  ;;  %v3960_v3 = vadd.f32 %v7757_v51, %v3891_v28  ;;  %v3369_v38 = vpop.xlane.xlu2 %3368  ;;  %vm3733_vm9 = vmor %vm3731_vm5, %vm3732_vm6 }
 0x52a   : > { %4057 = vst [vmem:[%s7803_s25 + $0x190] sm:$0xff] %v3993_v7  ;;  %v3750_v42 = vmul.f32 %v8166_v25, %v3749_v12  ;;  %v3729_v1 = vsub.f32 1.5, %v3728_v54  ;;  %v8846_v7 = vld [vmem:[#allocation60_spill] sm:$0xff]  ;;  %vm3771_vm8 = vweird.f32 %v8162_v27  ;;  %4683 = vrsqrt.f32 %v8189_v17 }
 0x52b   : > { %4058 = vst [vmem:[%s7803_s25 + $0x198] sm:$0xff] %v3994_v29  ;;  %v3594_v9 = vsel %vm3593_vm4, %v4674_v44, %v3590_v55  ;;  %v3767_v34 = vmul.f32 %v8199_v58, %v3766_v4  ;;  %v3434_v12 = vmul.f32 %v3366_v16, %v7494_v19  ;;  %v8847_v4 = vld [vmem:[#allocation23_spill] sm:$0xff]  ;;  %vm3772_vm10 = vweird.f32 %v8199_v58 }
 0x52c   : > { %4023 = vst [vmem:[%s7803_s25 + $0x80] sm:$0xff] %v3959_v63  ;;  %v3825_v18 = vmul.f32 %v3594_v9, %v8845_v48  ;;  %v3826_v13 = vmul.f32 %v3594_v9, %v8846_v7  ;;  %v8227_v44 = vpop.eup %4681  ;;  %v3754_v29 = vsel %vm3753_vm7, %v8166_v25, %v3750_v42  ;;  %v3730_v28 = vmul.f32 %v8176_v40, %v3729_v1  ;;  %v8848_v9 = vld [vmem:[#allocation24_spill] sm:$0xff]  ;;  %v8849_v7 = vld [vmem:[#allocation57_spill] sm:$0xff]  ;;  %vm3773_vm11 = vmor %vm3771_vm8, %vm3772_vm10 }
 0x52d   : > { %4024 = vst [vmem:[%s7803_s25 + $0x88] sm:$0xff] %v3960_v3  ;;  %v3768_v55 = vmul.f32 0.5, %v3767_v34  ;;  %v3857_v63 = vmul.f32 %v3754_v29, %v8847_v4  ;;  %v3858_v48 = vmul.f32 %v3754_v29, %v8848_v9  ;;  %v3596_v16 = vmul.f32 %v8227_v44, %v8174_v39 }
 0x52e   : > { %v3894_v54 = vmul.f32 %v7742_v60, %v3825_v18  ;;  %v3895_v41 = vmul.f32 %v7744_v32, %v3826_v13  ;;  %v3734_v25 = vsel %vm3733_vm9, %v8176_v40, %v3730_v28  ;;  %v8850_v13 = vld [vmem:[#allocation58_spill] sm:$0xff]  ;;  %v8260_v4 = vadd.f32 1e-05, %v3434_v12 }
 0x52f   : > { %v3769_v3 = vsub.f32 1.5, %v3768_v55  ;;  %v3926_v34 = vmul.f32 %v7742_v60, %v3857_v63  ;;  %v3927_v18 = vmul.f32 %v7744_v32, %v3858_v48  ;;  %v3853_v6 = vmul.f32 %v3734_v25, %v8849_v7  ;;  %v3363_v7 = vpop.xlane.xlu0 %3362 }
 0x530   : > { %v3963_v42 = vadd.f32 %v7752_v26, %v3894_v54  ;;  %v3964_v1 = vadd.f32 %v7757_v51, %v3895_v41  ;;  %v3854_v29 = vmul.f32 %v3734_v25, %v8850_v13  ;;  %v3597_v28 = vmul.f32 %v8227_v44, %v3596_v16  ;;  %v8253_v55 = vpop.eup %4683  ;;  %v3375_v16 = vpop.xlane.xlu1 %3374 }
 0x531   : > { %v3770_v40 = vmul.f32 %v8199_v58, %v3769_v3  ;;  %v3995_v54 = vadd.f32 %v7752_v26, %v3926_v34  ;;  %v3996_v41 = vadd.f32 %v7757_v51, %v3927_v18  ;;  %v3435_v63 = vmul.f32 %v3369_v38, %v7494_v19  ;;  %v3378_v34 = vpop.xlane.xlu2 %3377 }
 0x532   : > { %4027 = vst [vmem:[%s7803_s25 + $0xa0] sm:$0xff] %v3963_v42  ;;  %v3922_v9 = vmul.f32 %v7742_v60, %v3853_v6  ;;  %v3923_v48 = vmul.f32 %v7744_v32, %v3854_v29  ;;  %v3598_v3 = vmul.f32 0.5, %v3597_v28  ;;  %vm3602_vm12 = vweird.f32 %v8227_v44 }
 0x533   : > { %4028 = vst [vmem:[%s7803_s25 + $0xa8] sm:$0xff] %v3964_v1  ;;  %v3774_v25 = vsel %vm3773_vm11, %v8199_v58, %v3770_v40  ;;  %v3576_v38 = vmul.f32 %v8253_v55, %v8189_v17  ;;  %4685 = vrsqrt.f32 %v8260_v4  ;;  %vm3601_vm13 = vweird.f32 %v8174_v39 }
 0x534   : > { %4059 = vst [vmem:[%s7803_s25 + $0x1a0] sm:$0xff] %v3995_v54  ;;  %v3861_v42 = vmul.f32 %v3774_v25, %v7858_v22  ;;  %v3862_v27 = vmul.f32 %v3774_v25, %v7861_v49  ;;  %v3991_v12 = vadd.f32 %v7752_v26, %v3922_v9  ;;  %v3992_v1 = vadd.f32 %v7757_v51, %v3923_v48  ;;  %vm3603_vm14 = vmor %vm3601_vm13, %vm3602_vm12 }
 0x535   : > { %4060 = vst [vmem:[%s7803_s25 + $0x1a8] sm:$0xff] %v3996_v41  ;;  %v3599_v58 = vsub.f32 1.5, %v3598_v3  ;;  %v3577_v49 = vmul.f32 %v8253_v55, %v3576_v38  ;;  %v8283_v13 = vadd.f32 1e-05, %v3435_v63  ;;  %v3448_v29 = vmul.f32 %v3408_v2, %v7494_v19 }
 0x536   : > { %v3930_v18 = vmul.f32 %v7742_v60, %v3861_v42  ;;  %v3931_v22 = vmul.f32 %v7744_v32, %v3862_v27  ;;  %4055 = vst [vmem:[%s7803_s25 + $0x180] sm:$0xff] %v3991_v12  ;;  %v3437_v40 = vmul.f32 %v3375_v16, %v7494_v19  ;;  %v3438_v41 = vmul.f32 %v3378_v34, %v7494_v19 }
 0x537   : > { %v3600_v6 = vmul.f32 %v8227_v44, %v3599_v58  ;;  %4056 = vst [vmem:[%s7803_s25 + $0x188] sm:$0xff] %v3992_v1  ;;  %v3578_v39 = vmul.f32 0.5, %v3577_v49  ;;  %vm3582_vm15 = vweird.f32 %v8253_v55  ;;  %4687 = vrsqrt.f32 %v8283_v13 }
 0x538   : > { %v3999_v28 = vadd.f32 %v7752_v26, %v3930_v18  ;;  %v4000_v54 = vadd.f32 %v7757_v51, %v3931_v22  ;;  %v8296_v2 = vadd.f32 1e-05, %v3448_v29  ;;  %v8301_v3 = vadd.f32 1e-05, %v3437_v40 }
 0x539   : > { %v3604_v9 = vsel %vm3603_vm14, %v8227_v44, %v3600_v6  ;;  %v3579_v25 = vsub.f32 1.5, %v3578_v39  ;;  %v4686_v16 = vpop.eup %4685  ;;  %vm3581_vm0 = vweird.f32 %v8189_v17  ;;  %v8306_v44 = vadd.f32 1e-05, %v3438_v41  ;;  %v3384_v17 = vpop.xlane.xlu1 %3383 }
 0x53a   : > { %4063 = vst [vmem:[%s7803_s25 + $0x1c0] sm:$0xff] %v3999_v28  ;;  %v3827_v63 = vmul.f32 %v3604_v9, %v7850_v11  ;;  %v3828_v48 = vmul.f32 %v3604_v9, %v7855_v10  ;;  %4689 = vrsqrt.f32 %v8296_v2  ;;  %v3433_v42 = vmul.f32 %v3363_v7, %v7494_v19  ;;  %vm3583_vm1 = vmor %vm3581_vm0, %vm3582_vm15  ;;  %v3372_v28 = vpop.xlane.xlu0 %3371 }
 0x53b   : > { %4064 = vst [vmem:[%s7803_s25 + $0x1c8] sm:$0xff] %v4000_v54  ;;  %v3580_v11 = vmul.f32 %v8253_v55, %v3579_v25  ;;  %v3616_v10 = vmul.f32 %v4686_v16, %v8260_v4  ;;  %vm3621_vm2 = vweird.f32 %v8260_v4  ;;  %4691 = vrsqrt.f32 %v8301_v3 }
 0x53c   : > { %v3896_v27 = vmul.f32 %v7742_v60, %v3827_v63  ;;  %v3897_v38 = vmul.f32 %v7744_v32, %v3828_v48  ;;  %4693 = vrsqrt.f32 %v8306_v44  ;;  %v8323_v7 = vadd.f32 1e-05, %v3433_v42 }
 0x53d   : > { %v3584_v58 = vsel %vm3583_vm1, %v8253_v55, %v3580_v11  ;;  %v3617_v34 = vmul.f32 %v4686_v16, %v3616_v10  ;;  %v4688_v18 = vpop.eup %4687  ;;  %vm3631_vm3 = vweird.f32 %v8283_v13  ;;  %v3440_v40 = vmul.f32 %v3384_v17, %v7494_v19 }
 0x53e   : > { %v3965_v12 = vadd.f32 %v7752_v26, %v3896_v27  ;;  %v3966_v1 = vadd.f32 %v7757_v51, %v3897_v38  ;;  %v3823_v22 = vmul.f32 %v3584_v58, %v7821_v62  ;;  %v3824_v49 = vmul.f32 %v3584_v58, %v7828_v30 }
 0x53f   : > { %v3618_v6 = vmul.f32 0.5, %v3617_v34  ;;  %v3626_v29 = vmul.f32 %v4688_v18, %v8283_v13  ;;  %vm3622_vm4 = vweird.f32 %v4686_v16  ;;  %4695 = vrsqrt.f32 %v8323_v7 }
 0x540   : > { %4029 = vst [vmem:[%s7803_s25 + $0xb0] sm:$0xff] %v3965_v12  ;;  %v4690_v55 = vpop.eup %4689  ;;  %v3892_v54 = vmul.f32 %v7742_v60, %v3823_v22  ;;  %v3893_v62 = vmul.f32 %v7744_v32, %v3824_v49  ;;  %vm3632_vm5 = vweird.f32 %v4688_v18  ;;  %vm3761_vm6 = vweird.f32 %v8296_v2  ;;  %vm3623_vm8 = vmor %vm3621_vm2, %vm3622_vm4 }
 0x541   : > { %4030 = vst [vmem:[%s7803_s25 + $0xb8] sm:$0xff] %v3966_v1  ;;  %v3619_v30 = vsub.f32 1.5, %v3618_v6  ;;  %v3627_v39 = vmul.f32 %v4688_v18, %v3626_v29  ;;  %v3756_v41 = vmul.f32 %v4690_v55, %v8296_v2  ;;  %v4692_v9 = vpop.eup %4691  ;;  %v8337_v25 = vadd.f32 1e-05, %v3440_v40  ;;  %vm3633_vm14 = vmor %vm3631_vm3, %vm3632_vm5 }
 0x542   : > { %v3961_v63 = vadd.f32 %v7752_v26, %v3892_v54  ;;  %v3962_v48 = vadd.f32 %v7757_v51, %v3893_v62  ;;  %v3436_v42 = vmul.f32 %v3372_v28, %v7494_v19  ;;  %v3646_v10 = vmul.f32 %v4692_v9, %v8301_v3  ;;  %v8342_v17 = vpop.eup %4693 }
 0x543   : > { %v3620_v27 = vmul.f32 %v4686_v16, %v3619_v30  ;;  %v3628_v38 = vmul.f32 0.5, %v3627_v39  ;;  %v3757_v11 = vmul.f32 %v4690_v55, %v3756_v41  ;;  %vm3651_vm7 = vweird.f32 %v8301_v3 }
 0x544   : > { %4025 = vst [vmem:[%s7803_s25 + $0x90] sm:$0xff] %v3961_v63  ;;  %vm3762_vm9 = vweird.f32 %v4690_v55  ;;  %vm3652_vm10 = vweird.f32 %v4692_v9  ;;  %4697 = vrsqrt.f32 %v8337_v25  ;;  %v8349_v12 = vadd.f32 1e-05, %v3436_v42 }
 0x545   : > { %4026 = vst [vmem:[%s7803_s25 + $0x98] sm:$0xff] %v3962_v48  ;;  %v3624_v1 = vsel %vm3623_vm8, %v4686_v16, %v3620_v27  ;;  %v3629_v58 = vsub.f32 1.5, %v3628_v38  ;;  %v3758_v34 = vmul.f32 0.5, %v3757_v11  ;;  %v3647_v22 = vmul.f32 %v4692_v9, %v3646_v10  ;;  %v4696_v49 = vpop.eup %4695  ;;  %vm3763_vm0 = vmor %vm3761_vm6, %vm3762_vm9 }
 0x546   : > { %v3831_v6 = vmul.f32 %v3624_v1, %v7896_v53  ;;  %v3832_v29 = vmul.f32 %v3624_v1, %v7905_v31  ;;  %v3656_v4 = vmul.f32 %v8342_v17, %v8306_v44  ;;  %vm3661_vm11 = vweird.f32 %v8306_v44  ;;  %vm3653_vm1 = vmor %vm3651_vm7, %vm3652_vm10 }
 0x547   : > { %vm3662_vm12 = vweird.f32 %v8342_v17  ;;  %v3630_v40 = vmul.f32 %v4688_v18, %v3629_v58  ;;  %v3759_v28 = vsub.f32 1.5, %v3758_v34  ;;  %v3648_v54 = vmul.f32 0.5, %v3647_v22 }
 0x548   : > { %v3606_v16 = vmul.f32 %v4696_v49, %v8323_v7  ;;  %vm3611_vm13 = vweird.f32 %v8323_v7  ;;  %v3900_v62 = vmul.f32 %v7742_v60, %v3831_v6  ;;  %v3901_v53 = vmul.f32 %v7744_v32, %v3832_v29  ;;  %vm3663_vm2 = vmor %vm3661_vm11, %vm3662_vm12 }
 0x549   : > { %v3657_v31 = vmul.f32 %v8342_v17, %v3656_v4  ;;  %vm3612_vm15 = vweird.f32 %v4696_v49  ;;  %v3634_v30 = vsel %vm3633_vm14, %v4688_v18, %v3630_v40  ;;  %v3760_v39 = vmul.f32 %v4690_v55, %v3759_v28 }
 0x54a   : > { %v3649_v41 = vsub.f32 1.5, %v3648_v54  ;;  %v3607_v63 = vmul.f32 %v4696_v49, %v3606_v16  ;;  %v8366_v48 = vpop.eup %4697  ;;  %v3969_v42 = vadd.f32 %v7752_v26, %v3900_v62  ;;  %v3970_v27 = vadd.f32 %v7757_v51, %v3901_v53  ;;  %vm3613_vm3 = vmor %vm3611_vm13, %vm3612_vm15 }
 0x54b   : > { %v3833_v38 = vmul.f32 %v3634_v30, %v7908_v24  ;;  %v3834_v13 = vmul.f32 %v3634_v30, %v7911_v20  ;;  %v3764_v11 = vsel %vm3763_vm0, %v4690_v55, %v3760_v39  ;;  %v3658_v10 = vmul.f32 0.5, %v3657_v31 }
 0x54c   : > { %v3650_v18 = vmul.f32 %v4692_v9, %v3649_v41  ;;  %v3608_v1 = vmul.f32 0.5, %v3607_v63  ;;  %4033 = vst [vmem:[%s7803_s25 + $0xd0] sm:$0xff] %v3969_v42  ;;  %v3859_v22 = vmul.f32 %v3764_v11, %v7871_v43  ;;  %v3860_v6 = vmul.f32 %v3764_v11, %v7874_v8  ;;  %v3381_v41 = vpop.xlane.xlu0 %3380 }
 0x54d   : > { %v3902_v58 = vmul.f32 %v7742_v60, %v3833_v38  ;;  %v3903_v34 = vmul.f32 %v7744_v32, %v3834_v13  ;;  %4034 = vst [vmem:[%s7803_s25 + $0xd8] sm:$0xff] %v3970_v27  ;;  %v3659_v20 = vsub.f32 1.5, %v3658_v10  ;;  %v3676_v55 = vmul.f32 %v8366_v48, %v8337_v25 }
 0x54e   : > { %v3654_v24 = vsel %vm3653_vm1, %v4692_v9, %v3650_v18  ;;  %v3609_v2 = vsub.f32 1.5, %v3608_v1  ;;  %v3928_v43 = vmul.f32 %v7742_v60, %v3859_v22  ;;  %v3929_v8 = vmul.f32 %v7744_v32, %v3860_v6 }
 0x54f   : > { %v3971_v29 = vadd.f32 %v7752_v26, %v3902_v58  ;;  %v3972_v4 = vadd.f32 %v7757_v51, %v3903_v34  ;;  %v3837_v3 = vmul.f32 %v3654_v24, %v7941_v33  ;;  %v3838_v40 = vmul.f32 %v3654_v24, %v7944_v61 }
 0x550   : > { %v3660_v9 = vmul.f32 %v8342_v17, %v3659_v20  ;;  %v3610_v28 = vmul.f32 %v4696_v49, %v3609_v2  ;;  %v3997_v54 = vadd.f32 %v7752_v26, %v3928_v43  ;;  %v3998_v16 = vadd.f32 %v7757_v51, %v3929_v8 }
 0x551   : > { %4035 = vst [vmem:[%s7803_s25 + $0xe0] sm:$0xff] %v3971_v29  ;;  %v3677_v33 = vmul.f32 %v8366_v48, %v3676_v55  ;;  %v3906_v61 = vmul.f32 %v7742_v60, %v3837_v3  ;;  %v3907_v62 = vmul.f32 %v7744_v32, %v3838_v40  ;;  %4699 = vrsqrt.f32 %v8349_v12 }
 0x552   : > { %4036 = vst [vmem:[%s7803_s25 + $0xe8] sm:$0xff] %v3972_v4  ;;  %v3664_v44 = vsel %vm3663_vm2, %v8342_v17, %v3660_v9  ;;  %v3614_v53 = vsel %vm3613_vm3, %v4696_v49, %v3610_v28  ;;  %vm3682_vm4 = vweird.f32 %v8366_v48  ;;  %v3439_v49 = vmul.f32 %v3381_v41, %v7494_v19 }
 0x553   : > { %4061 = vst [vmem:[%s7803_s25 + $0x1b0] sm:$0xff] %v3997_v54  ;;  %v3839_v31 = vmul.f32 %v3664_v44, %v7959_v37  ;;  %v3840_v30 = vmul.f32 %v3664_v44, %v7962_v0  ;;  %v3829_v39 = vmul.f32 %v3614_v53, %v7949_v57  ;;  %v3830_v7 = vmul.f32 %v3614_v53, %v7952_v46 }
 0x554   : > { %4062 = vst [vmem:[%s7803_s25 + $0x1b8] sm:$0xff] %v3998_v16  ;;  %v3975_v63 = vadd.f32 %v7752_v26, %v3906_v61  ;;  %v3976_v42 = vadd.f32 %v7757_v51, %v3907_v62  ;;  %v3678_v27 = vmul.f32 0.5, %v3677_v33  ;;  %vm3681_vm5 = vweird.f32 %v8337_v25 }
 0x555   : > { %v3908_v17 = vmul.f32 %v7742_v60, %v3839_v31  ;;  %v3909_v37 = vmul.f32 %v7744_v32, %v3840_v30  ;;  %v3898_v0 = vmul.f32 %v7742_v60, %v3829_v39  ;;  %v3899_v57 = vmul.f32 %v7744_v32, %v3830_v7  ;;  %vm3683_vm6 = vmor %vm3681_vm5, %vm3682_vm4 }
 0x556   : > { %4039 = vst [vmem:[%s7803_s25 + $0x100] sm:$0xff] %v3975_v63  ;;  %v3679_v46 = vsub.f32 1.5, %v3678_v27  ;;  %v3471_v1 = vadd.f32 1e-05, %v3439_v49  ;;  %vm3641_vm8 = vweird.f32 %v8349_v12 }
 0x557   : > { %4040 = vst [vmem:[%s7803_s25 + $0x108] sm:$0xff] %v3976_v42  ;;  %v3977_v38 = vadd.f32 %v7752_v26, %v3908_v17  ;;  %v3978_v13 = vadd.f32 %v7757_v51, %v3909_v37  ;;  %v3967_v11 = vadd.f32 %v7752_v26, %v3898_v0  ;;  %v3968_v18 = vadd.f32 %v7757_v51, %v3899_v57  ;;  %v4700_v58 = vpop.eup %4699 }
 0x558   : > { %v3680_v10 = vmul.f32 %v8366_v48, %v3679_v46  ;;  %4701 = vrsqrt.f32 %v3471_v1  ;;  %v3636_v24 = vmul.f32 %v4700_v58, %v8349_v12  ;;  %vm3642_vm7 = vweird.f32 %v4700_v58 }
 0x559   : > { %4041 = vst [vmem:[%s7803_s25 + $0x110] sm:$0xff] %v3977_v38  ;;  %vm3643_vm9 = vmor %vm3641_vm8, %vm3642_vm7  ;;  %vm3671_vm11 = vweird.f32 %v3471_v1 }
 0x55a   : > { %4042 = vst [vmem:[%s7803_s25 + $0x118] sm:$0xff] %v3978_v13  ;;  %v3684_v34 = vsel %vm3683_vm6, %v8366_v48, %v3680_v10  ;;  %v3637_v2 = vmul.f32 %v4700_v58, %v3636_v24 }
 0x55b   : > { %4031 = vst [vmem:[%s7803_s25 + $0xc0] sm:$0xff] %v3967_v11  ;;  %v3843_v22 = vmul.f32 %v3684_v34, %v7993_v59  ;;  %v3844_v6 = vmul.f32 %v3684_v34, %v7996_v14 }
 0x55c   : > { %4032 = vst [vmem:[%s7803_s25 + $0xc8] sm:$0xff] %v3968_v18  ;;  %v3638_v48 = vmul.f32 0.5, %v3637_v2 }
 0x55d   : > { %v3912_v25 = vmul.f32 %v7742_v60, %v3843_v22  ;;  %v3913_v20 = vmul.f32 %v7744_v32, %v3844_v6 }
 0x55e   : > { %v4702_v4 = vpop.eup %4701  ;;  %v3639_v43 = vsub.f32 1.5, %v3638_v48 }
 0x55f   : > { %v3981_v55 = vadd.f32 %v7752_v26, %v3912_v25  ;;  %v3982_v29 = vadd.f32 %v7757_v51, %v3913_v20  ;;  %v3666_v59 = vmul.f32 %v4702_v4, %v3471_v1  ;;  %vm3672_vm10 = vweird.f32 %v4702_v4 }
 0x560   : > { %v3640_v14 = vmul.f32 %v4700_v58, %v3639_v43  ;;  %vm3673_vm12 = vmor %vm3671_vm11, %vm3672_vm10 }
 0x561   : > { %4045 = vst [vmem:[%s7803_s25 + $0x130] sm:$0xff] %v3981_v55  ;;  %v3667_v8 = vmul.f32 %v4702_v4, %v3666_v59 }
 0x562   : > { %4046 = vst [vmem:[%s7803_s25 + $0x138] sm:$0xff] %v3982_v29  ;;  %v3644_v3 = vsel %vm3643_vm9, %v4700_v58, %v3640_v14 }
 0x563   : > { %v3668_v40 = vmul.f32 0.5, %v3667_v8  ;;  %v3835_v9 = vmul.f32 %v3644_v3, %v7985_v56  ;;  %v3836_v28 = vmul.f32 %v3644_v3, %v7988_v52 }
 0x565   : > { %v3669_v54 = vsub.f32 1.5, %v3668_v40  ;;  %v3904_v16 = vmul.f32 %v7742_v60, %v3835_v9  ;;  %v3905_v33 = vmul.f32 %v7744_v32, %v3836_v28 }
 0x567   : > { %v3670_v61 = vmul.f32 %v4702_v4, %v3669_v54  ;;  %v3973_v12 = vadd.f32 %v7752_v26, %v3904_v16  ;;  %v3974_v62 = vadd.f32 %v7757_v51, %v3905_v33 }
 0x569   : > { %v3674_v44 = vsel %vm3673_vm12, %v4702_v4, %v3670_v61  ;;  %4037 = vst [vmem:[%s7803_s25 + $0xf0] sm:$0xff] %v3973_v12 }
 0x56a   : > { %v3841_v56 = vmul.f32 %v3674_v44, %v8019_v21  ;;  %v3842_v52 = vmul.f32 %v3674_v44, %v8022_v35  ;;  %4038 = vst [vmem:[%s7803_s25 + $0xf8] sm:$0xff] %v3974_v62 }
 0x56c   : > { %v3910_v53 = vmul.f32 %v7742_v60, %v3841_v56  ;;  %v3911_v31 = vmul.f32 %v7744_v32, %v3842_v52 }
 0x56e   : > { %v3979_v30 = vadd.f32 %v7752_v26, %v3910_v53  ;;  %v3980_v39 = vadd.f32 %v7757_v51, %v3911_v31 }
 0x570   : > { %4043 = vst [vmem:[%s7803_s25 + $0x120] sm:$0xff] %v3979_v30 }
 0x571   : > { %v3387_v7 = vpop.xlane.xlu2 %3386  ;;  %4044 = vst [vmem:[%s7803_s25 + $0x128] sm:$0xff] %v3980_v39 }
 0x572   : > { %v3441_v41 = vmul.f32 %v3387_v7, %v7494_v19 }
 0x574   : > { %v3473_v63 = vadd.f32 1e-05, %v3441_v41 }
 0x576   : > { %4703 = vrsqrt.f32 %v3473_v63  ;;  %vm3691_vm14 = vweird.f32 %v3473_v63 }
 0x579   : > { %v3390_v42 = vpop.xlane.xlu0 %3389 }
 0x57a   : > { %v3442_v21 = vmul.f32 %v3390_v42, %v7494_v19 }
 0x57c   : > { %v4704_v35 = vpop.eup %4703  ;;  %v3474_v27 = vadd.f32 1e-05, %v3442_v21 }
 0x57d   : > { %v3686_v17 = vmul.f32 %v4704_v35, %v3473_v63  ;;  %vm3692_vm13 = vweird.f32 %v4704_v35 }
 0x57e   : > { %4705 = vrsqrt.f32 %v3474_v27  ;;  %vm3693_vm15 = vmor %vm3691_vm14, %vm3692_vm13  ;;  %vm3701_vm1 = vweird.f32 %v3474_v27 }
 0x57f   : > { %v3687_v37 = vmul.f32 %v4704_v35, %v3686_v17 }
 0x581   : > { %v3688_v0 = vmul.f32 0.5, %v3687_v37  ;;  %v3417_v57 = vpop.xlane.xlu0 %3416  ;;  %v3393_v38 = vpop.xlane.xlu1 %3392 }
 0x582   : > { %v3451_v46 = vmul.f32 %v3417_v57, %v7494_v19  ;;  %v3443_v11 = vmul.f32 %v3393_v38, %v7494_v19 }
 0x583   : > { %v3689_v49 = vsub.f32 1.5, %v3688_v0 }
 0x584   : > { %v4706_v13 = vpop.eup %4705  ;;  %v3483_v18 = vadd.f32 1e-05, %v3451_v46  ;;  %v3475_v58 = vadd.f32 1e-05, %v3443_v11  ;;  %v8851_v46 = vld [vmem:[#allocation22_spill] sm:$0xff] }
 0x585   : > { %v3690_v10 = vmul.f32 %v4704_v35, %v3689_v49  ;;  %v3696_v1 = vmul.f32 %v4706_v13, %v3474_v27  ;;  %vm3702_vm0 = vweird.f32 %v4706_v13 }
 0x586   : > { %4707 = vrsqrt.f32 %v3483_v18  ;;  %vm3703_vm2 = vmor %vm3701_vm1, %vm3702_vm0  ;;  %vm3791_vm4 = vweird.f32 %v3483_v18  ;;  %vm3711_vm7 = vweird.f32 %v3475_v58 }
 0x587   : > { %v3694_v34 = vsel %vm3693_vm15, %v4704_v35, %v3690_v10  ;;  %v3697_v22 = vmul.f32 %v4706_v13, %v3696_v1  ;;  %4709 = vrsqrt.f32 %v3475_v58 }
 0x588   : > { %v3845_v6 = vmul.f32 %v3694_v34, %v8036_v50  ;;  %v3846_v24 = vmul.f32 %v3694_v34, %v8039_v23 }
 0x589   : > { %v3698_v25 = vmul.f32 0.5, %v3697_v22  ;;  %v3420_v29 = vpop.xlane.xlu1 %3419 }
 0x58a   : > { %v3914_v20 = vmul.f32 %v7742_v60, %v3845_v6  ;;  %v3915_v2 = vmul.f32 %v7744_v32, %v3846_v24  ;;  %v3452_v50 = vmul.f32 %v3420_v29, %v7494_v19  ;;  %v3396_v59 = vpop.xlane.xlu2 %3395 }
 0x58b   : > { %v3699_v55 = vsub.f32 1.5, %v3698_v25  ;;  %v3444_v8 = vmul.f32 %v3396_v59, %v7494_v19 }
 0x58c   : > { %v4708_v48 = vpop.eup %4707  ;;  %v3983_v4 = vadd.f32 %v7752_v26, %v3914_v20  ;;  %v3984_v43 = vadd.f32 %v7757_v51, %v3915_v2  ;;  %v3484_v40 = vadd.f32 1e-05, %v3452_v50 }
 0x58d   : > { %v3700_v23 = vmul.f32 %v4706_v13, %v3699_v55  ;;  %v3786_v14 = vmul.f32 %v4708_v48, %v3483_v18  ;;  %v4710_v3 = vpop.eup %4709  ;;  %v8478_v62 = vadd.f32 1e-05, %v3444_v8  ;;  %vm3792_vm3 = vweird.f32 %v4708_v48 }
 0x58e   : > { %4047 = vst [vmem:[%s7803_s25 + $0x140] sm:$0xff] %v3983_v4  ;;  %v3706_v28 = vmul.f32 %v4710_v3, %v3475_v58  ;;  %4711 = vrsqrt.f32 %v3484_v40  ;;  %vm3712_vm5 = vweird.f32 %v4710_v3  ;;  %vm3793_vm6 = vmor %vm3791_vm4, %vm3792_vm3  ;;  %vm3801_vm10 = vweird.f32 %v3484_v40  ;;  %v8853_v4 = vld [vmem:[#allocation25_spill] sm:$0xff] }
 0x58f   : > { %4048 = vst [vmem:[%s7803_s25 + $0x148] sm:$0xff] %v3984_v43  ;;  %v3704_v9 = vsel %vm3703_vm2, %v4706_v13, %v3700_v23  ;;  %v3787_v54 = vmul.f32 %v4708_v48, %v3786_v14  ;;  %4713 = vrsqrt.f32 %v8478_v62  ;;  %vm3713_vm8 = vmor %vm3711_vm7, %vm3712_vm5  ;;  %vm3721_vm13 = vweird.f32 %v8478_v62 }
 0x590   : > { %v3847_v16 = vmul.f32 %v3704_v9, %v8050_v5  ;;  %v3848_v33 = vmul.f32 %v3704_v9, %v8053_v15  ;;  %v3707_v61 = vmul.f32 %v4710_v3, %v3706_v28  ;;  %v8854_v9 = vld [vmem:[#allocation26_spill] sm:$0xff] }
 0x591   : > { %v3788_v12 = vmul.f32 0.5, %v3787_v54  ;;  %v8855_v54 = vld [vmem:[#allocation21_spill] sm:$0xff] }
 0x592   : > { %v3916_v44 = vmul.f32 %v7742_v60, %v3847_v16  ;;  %v3917_v56 = vmul.f32 %v7744_v32, %v3848_v33  ;;  %v3708_v52 = vmul.f32 0.5, %v3707_v61  ;;  %v3414_v31 = vpop.xlane.xlu2 %3413 }
 0x593   : > { %v3789_v53 = vsub.f32 1.5, %v3788_v12  ;;  %v3450_v7 = vmul.f32 %v3414_v31, %v7494_v19  ;;  %v8852_v19 = vld [vmem:[#allocation19_spill] sm:$0xff]  ;;  %v8857_v31 = vld [vmem:[#allocation33_spill] sm:$0xff] }
 0x594   : > { %v3985_v5 = vadd.f32 %v7752_v26, %v3916_v44  ;;  %v3986_v15 = vadd.f32 %v7757_v51, %v3917_v56  ;;  %v3709_v30 = vsub.f32 1.5, %v3708_v52  ;;  %v4712_v41 = vpop.eup %4711 }
 0x595   : > { %v3790_v39 = vmul.f32 %v4708_v48, %v3789_v53  ;;  %v3796_v21 = vmul.f32 %v4712_v41, %v3484_v40  ;;  %v3482_v17 = vadd.f32 1e-05, %v3450_v7  ;;  %v4714_v37 = vpop.eup %4713  ;;  %vm3802_vm9 = vweird.f32 %v4712_v41 }
 0x596   : > { %4049 = vst [vmem:[%s7803_s25 + $0x150] sm:$0xff] %v3985_v5  ;;  %v3710_v63 = vmul.f32 %v4710_v3, %v3709_v30  ;;  %v3716_v10 = vmul.f32 %v4714_v37, %v8478_v62  ;;  %vm3803_vm11 = vmor %vm3801_vm10, %vm3802_vm9  ;;  %vm3722_vm12 = vweird.f32 %v4714_v37  ;;  %v8856_v5 = vld [vmem:[#allocation20_spill] sm:$0xff] }
 0x597   : > { %4050 = vst [vmem:[%s7803_s25 + $0x158] sm:$0xff] %v3986_v15  ;;  %v3794_v42 = vsel %vm3793_vm6, %v4708_v48, %v3790_v39  ;;  %v3797_v57 = vmul.f32 %v4712_v41, %v3796_v21  ;;  %4715 = vrsqrt.f32 %v3482_v17  ;;  %vm3723_vm14 = vmor %vm3721_vm13, %vm3722_vm12  ;;  %vm3781_vm0 = vweird.f32 %v3482_v17 }
 0x598   : > { %v3865_v35 = vmul.f32 %v3794_v42, %v8060_v36  ;;  %v3866_v27 = vmul.f32 %v3794_v42, %v8063_v47  ;;  %v3714_v0 = vsel %vm3713_vm8, %v4710_v3, %v3710_v63  ;;  %v3717_v22 = vmul.f32 %v4714_v37, %v3716_v10 }
 0x599   : > { %v3849_v49 = vmul.f32 %v3714_v0, %v8851_v46  ;;  %v3850_v38 = vmul.f32 %v3714_v0, %v8852_v19  ;;  %v3798_v18 = vmul.f32 0.5, %v3797_v57 }
 0x59a   : > { %v3934_v13 = vmul.f32 %v7742_v60, %v3865_v35  ;;  %v3935_v11 = vmul.f32 %v7744_v32, %v3866_v27  ;;  %v3718_v20 = vmul.f32 0.5, %v3717_v22 }
 0x59b   : > { %v3918_v36 = vmul.f32 %v7742_v60, %v3849_v49  ;;  %v3919_v47 = vmul.f32 %v7744_v32, %v3850_v38  ;;  %v3799_v34 = vsub.f32 1.5, %v3798_v18 }
 0x59c   : > { %v4003_v1 = vadd.f32 %v7752_v26, %v3934_v13  ;;  %v4004_v58 = vadd.f32 %v7757_v51, %v3935_v11  ;;  %v3719_v29 = vsub.f32 1.5, %v3718_v20 }
 0x59d   : > { %v3987_v6 = vadd.f32 %v7752_v26, %v3918_v36  ;;  %v3988_v24 = vadd.f32 %v7757_v51, %v3919_v47  ;;  %v3800_v25 = vmul.f32 %v4712_v41, %v3799_v34  ;;  %v4716_v2 = vpop.eup %4715 }
 0x59e   : > { %4067 = vst [vmem:[%s7803_s25 + $0x1e0] sm:$0xff] %v4003_v1  ;;  %v3776_v50 = vmul.f32 %v4716_v2, %v3482_v17  ;;  %v3720_v59 = vmul.f32 %v4714_v37, %v3719_v29  ;;  %vm3782_vm15 = vweird.f32 %v4716_v2 }
 0x59f   : > { %4068 = vst [vmem:[%s7803_s25 + $0x1e8] sm:$0xff] %v4004_v58  ;;  %v3804_v55 = vsel %vm3803_vm11, %v4712_v41, %v3800_v25  ;;  %vm3783_vm1 = vmor %vm3781_vm0, %vm3782_vm15 }
 0x5a0   : > { %4051 = vst [vmem:[%s7803_s25 + $0x160] sm:$0xff] %v3987_v6  ;;  %v3867_v48 = vmul.f32 %v3804_v55, %v8085_v45  ;;  %v3868_v43 = vmul.f32 %v3804_v55, %v8853_v4  ;;  %v3777_v8 = vmul.f32 %v4716_v2, %v3776_v50  ;;  %v3724_v3 = vsel %vm3723_vm14, %v4714_v37, %v3720_v59 }
 0x5a1   : > { %4052 = vst [vmem:[%s7803_s25 + $0x168] sm:$0xff] %v3988_v24  ;;  %v3851_v28 = vmul.f32 %v3724_v3, %v8854_v9  ;;  %v3852_v16 = vmul.f32 %v3724_v3, %v8855_v54 }
 0x5a2   : > { %v3936_v23 = vmul.f32 %v7742_v60, %v3867_v48  ;;  %v3937_v14 = vmul.f32 %v7744_v32, %v3868_v43  ;;  %v3778_v33 = vmul.f32 0.5, %v3777_v8 }
 0x5a3   : > { %v3920_v61 = vmul.f32 %v7742_v60, %v3851_v28  ;;  %v3921_v12 = vmul.f32 %v7744_v32, %v3852_v16 }
 0x5a4   : > { %v4005_v40 = vadd.f32 %v7752_v26, %v3936_v23  ;;  %v4006_v45 = vadd.f32 %v7757_v51, %v3937_v14  ;;  %v3779_v62 = vsub.f32 1.5, %v3778_v33 }
 0x5a5   : > { %v3989_v44 = vadd.f32 %v7752_v26, %v3920_v61  ;;  %v3990_v56 = vadd.f32 %v7757_v51, %v3921_v12 }
 0x5a6   : > { %4069 = vst [vmem:[%s7803_s25 + $0x1f0] sm:$0xff] %v4005_v40  ;;  %v3780_v52 = vmul.f32 %v4716_v2, %v3779_v62 }
 0x5a7   : > { %4070 = vst [vmem:[%s7803_s25 + $0x1f8] sm:$0xff] %v4006_v45 }
 0x5a8   : > { %4053 = vst [vmem:[%s7803_s25 + $0x170] sm:$0xff] %v3989_v44  ;;  %v3784_v53 = vsel %vm3783_vm1, %v4716_v2, %v3780_v52 }
 0x5a9   : > { %4054 = vst [vmem:[%s7803_s25 + $0x178] sm:$0xff] %v3990_v56  ;;  %v3863_v15 = vmul.f32 %v3784_v53, %v8856_v5  ;;  %v3864_v30 = vmul.f32 %v3784_v53, %v8857_v31 }
 0x5ab   : > { %v3932_v39 = vmul.f32 %v7742_v60, %v3863_v15  ;;  %v3933_v7 = vmul.f32 %v7744_v32, %v3864_v30 }
 0x5ad   : > { %v4001_v41 = vadd.f32 %v7752_v26, %v3932_v39  ;;  %v4002_v63 = vadd.f32 %v7757_v51, %v3933_v7 }
 0x5af   : > { %4065 = vst [vmem:[%s7803_s25 + $0x1d0] sm:$0xff] %v4001_v41 }
 0x5b0   : > { %4066 = vst [vmem:[%s7803_s25 + $0x1d8] sm:$0xff] %v4002_v63 }
 0x5b1   : > { %4935 = shalt.err (!%p4932_p9)
}
 0x5b2   : > { %s4999_s26 = smov 256   ;;  %s5000_s25 = smov 16  }
 0x5b3   : > { %4435 = dma.vmem_to_hbm [thread:$0]  (%p5140_p13), %s4086_s16, 8192, %s4088_s3, %s4072_s27, %s4999_s26, %s4999_s26, %s5000_s25  }
 0x5b4 PF: > { %s4102_s28 = sand.u32 1, %s4974_s30   ;;  %p8858_p10 = scmp.ge.s32.totalorder %s4986_s12, 2 }
 0x5b5   : > { %s4103_s19 = scalar_lea.sflag [#allocation4], %s4102_s28 }
 0x5b6   : > { %p4458_p11 = pnand %p8858_p10, %p5145_p5 }
 0x5b8   : > { %p4459_p0 = pneg %p4458_p11 }
 0x5ba   : > { %4969 = dma.done.wait (%p4459_p0), %s4103_s19, 8192  }
 0x5bb   : > { %4971 = vsyncadd (%p4459_p0), %s4103_s19, 4294959104  ;;  %p25_p2 = scmp.ge.s32.totalorder %s5120_s18, 4   ;;  %s8859_s30 = smov %s4978_s10 }
 0x5bc   : > { %s8860_s10 = smov %s4982_s11  ;;  %s8861_s11 = smov %s5132_s24 }
 0x5bd   : > { %s8862_s12 = smov %s5120_s18  ;;  %27 = sbr.rel (!%p25_p2) target bundleno = 12 (0xc), region = 121 }
 0x5c2   :  { %4109 = vsyncpa [#allocation3], 1 }
 0x5c3   :  { %4111 = vsyncpa [#allocation3 + $0x1], 1 }
 0x5c4   :  { %4112 = vsyncpa [#allocation6], 1 }
 0x5c5   :  { %4113 = vsyncpa [#allocation9], 1 }
 0x5c6   :  { %4114 = vsyncpa [#allocation12], 1 }
 0x5c7   :  { %4115 = vsyncpa [#allocation4], 1 }
 0x5c8   :  { %4117 = vsyncpa [#allocation4 + $0x1], 1 }

</bundles_post_ra>
